<compile_context>
chip_gen: v6e
topology: v6e:2x2x1
jax: 0.10.0
libtpu: 0.0.40
codegen_flags: <defaults>
</compile_context>

<pallas_src>
import functools

import jax
import jax.numpy as jnp
from jax import lax
from jax.experimental import pallas as pl
from jax.experimental.pallas import tpu as pltpu


def _features_head_kernel(x_ref, w_ref, b_ref, wl_ref, mapt_ref, ypart_ref,
                          acc_ref, *, H, W, Wp, HW_pad):
    """One grid step = (one tile of output channels, one batch element).

    x_ref    : ((H+3)*Wp, Cin)    bf16  zero-padded, flattened channels-last image
    w_ref    : (3, 3, Cin, TCO)   bf16  conv weight tile (HWIO layout)
    b_ref    : (1, TCO)           f32   conv bias tile
    wl_ref   : (TCO, NC_pad)      f32   classifier weight tile (channel-tile rows)
    mapt_ref : (TCO, HW_pad)            channel-major feature-map tile (output)
    ypart_ref: (1, NC_pad)        f32   partial classifier logits (output)
    acc_ref  : (H*Wp, TCO)        f32   VMEM scratch accumulator
    """
    HW = H * W
    HWp = H * Wp
    tco = w_ref.shape[-1]

    # 3x3 SAME conv as 9 shifted contiguous-row matmuls on the MXU, accumulated
    # in the VMEM scratch (tap 0 assigns -> no explicit zeroing pass).
    tap = 0
    for kh in range(3):
        for kw in range(3):
            start = kh * Wp + kw
            xs = x_ref[start:start + HWp, :]              # (H*Wp, Cin) bf16
            t = jnp.dot(xs, w_ref[kh, kw],
                        preferred_element_type=jnp.float32)
            if tap == 0:
                acc_ref[...] = t
            else:
                acc_ref[...] += t
            tap += 1

    # Strip the junk columns introduced by the width padding with ONE aligned
    # reshape/slice (Wp and W are multiples of 8 -> every boundary lands on an
    # (8,128) tile boundary; no cross-tile sublane shifts).
    acc = acc_ref[...]                                     # (H*Wp, TCO) f32
    fmap = acc.reshape(H, Wp, tco)[:, :W, :].reshape(HW, tco)
    fmap = jnp.maximum(fmap + b_ref[...], 0.0)             # bias + ReLU, f32

    # AdaptiveAvgPool2d((1,1)) + partial Linear head for this channel tile:
    # y_part = (mean_hw fmap) @ W_l[tile rows]; partials summed in the wrapper.
    pool = jnp.sum(fmap, axis=0, keepdims=True) * (1.0 / HW)   # (1, TCO) f32
    pool8 = jnp.broadcast_to(pool, (8, tco))               # MXU-friendly M dim
    logits = jnp.dot(pool8, wl_ref[...], preferred_element_type=jnp.float32)
    ypart_ref[...] = logits[0:1, :]                        # (1, NC_pad)

    # Emit the map channel-major (free NCHW reshape in the wrapper), lane-padded
    # to HW_pad so the writeback uses unmasked, lane-dense stores.
    fmap_t = fmap.T                                        # (TCO, HW) f32
    if HW_pad > HW:
        fmap_t = jnp.pad(fmap_t, ((0, 0), (0, HW_pad - HW)))
    mapt_ref[...] = fmap_t.astype(mapt_ref.dtype)


@functools.partial(jax.jit, static_argnames=("num_classes", "co_tile"))
def cam_forward(x_nchw, w_conv_hwio, b_conv, w_lin, b_lin, *, num_classes,
                co_tile=256):
    """CAM forward. Returns (y, map) with map in NCHW, like the PyTorch module."""
    B, Cin, H, W = x_nchw.shape
    KH, KW, _, Cout = w_conv_hwio.shape
    assert (KH, KW) == (3, 3)
    assert W % 8 == 0, "TODO(synk): general W needs masked pooling + lane strip"
    assert Cout % co_tile == 0

    Wp = (W + 2 + 7) // 8 * 8           # padded row width, multiple of 8
    HW = H * W
    HW_pad = (HW + 127) // 128 * 128    # lane-dense map writeback
    nc_pad = (num_classes + 127) // 128 * 128
    # +3 rows: SAME padding (1 top, 2 bottom incl. guard) so every shifted tap
    # slice [kh*Wp+kw, kh*Wp+kw + H*Wp) stays inside the flat buffer.
    n_flat = (H + 3) * Wp
    n_co = Cout // co_tile

    # ---- glue (one fused HBM pass): bf16, pad (SAME + width round-up), NHWC.
    xb = x_nchw.astype(jnp.bfloat16)
    xp = jnp.pad(xb, ((0, 0), (0, 0), (1, 2), (1, Wp - W - 1)))  # (B,Cin,H+3,Wp)
    x_flat = jnp.transpose(xp, (0, 2, 3, 1)).reshape(B, n_flat, Cin)

    w_bf = w_conv_hwio.astype(jnp.bfloat16)                      # (3,3,Cin,Cout)
    bc = b_conv.reshape(1, Cout).astype(jnp.float32)
    # PyTorch Linear weight is (NC, 512): transpose + pad NC to a lane multiple.
    wl = jnp.pad(jnp.transpose(w_lin).astype(jnp.float32),
                 ((0, 0), (0, nc_pad - num_classes)))            # (Cout, NC_pad)

    map_isize = jnp.dtype(x_nchw.dtype).itemsize
    cost = pl.CostEstimate(
        flops=2 * B * HW * 9 * Cin * Cout + 2 * B * Cout * nc_pad,
        transcendentals=0,
        bytes_accessed=(x_flat.size * 2 * n_co       # x re-fetched per co tile
                        + w_bf.size * 2               # weights resident across b
                        + bc.size * 4 + wl.size * 4
                        + B * Cout * HW_pad * map_isize
                        + B * n_co * nc_pad * 4),
    )

    mapt, y_part = pl.pallas_call(
        functools.partial(_features_head_kernel, H=H, W=W, Wp=Wp, HW_pad=HW_pad),
        out_shape=(
            jax.ShapeDtypeStruct((B, Cout, HW_pad), x_nchw.dtype),   # CAM map
            jax.ShapeDtypeStruct((B, 1, n_co * nc_pad), jnp.float32),# partial y
        ),
        grid=(n_co, B),                       # channel tiles outer, batch inner
        in_specs=[
            pl.BlockSpec((None, n_flat, Cin), lambda co, b: (b, 0, 0)),
            pl.BlockSpec((3, 3, Cin, co_tile), lambda co, b: (0, 0, 0, co)),
            pl.BlockSpec((1, co_tile), lambda co, b: (0, co)),
            pl.BlockSpec((co_tile, nc_pad), lambda co, b: (co, 0)),
        ],
        out_specs=[
            pl.BlockSpec((None, co_tile, HW_pad), lambda co, b: (b, co, 0)),
            pl.BlockSpec((None, 1, nc_pad), lambda co, b: (b, 0, co)),
        ],
        scratch_shapes=[pltpu.VMEM((H * Wp, co_tile), jnp.float32)],
        compiler_params=pltpu.CompilerParams(
            dimension_semantics=("parallel", "parallel")),
        cost_estimate=cost,
    )(x_flat, w_bf, bc, wl)

    # Map is already channel-major: strip lane padding (no-op here) + free reshape.
    map_flat = mapt if HW_pad == HW else mapt[:, :, :HW]
    map_nchw = map_flat.reshape(B, Cout, H, W)

    # Classifier finalize: sum the per-channel-tile partial logits, add bias.
    y = (jnp.sum(y_part.reshape(B, n_co, nc_pad), axis=1)[:, :num_classes]
         + b_lin[None, :]).astype(x_nchw.dtype)
    return y, map_nchw


def _reference(x_nchw, w_conv_hwio, b_conv, w_lin, b_lin):
    """Pure-JAX reference; conv operands rounded to bf16 like the kernel."""
    xb = x_nchw.astype(jnp.bfloat16).astype(jnp.float32)
    wb = w_conv_hwio.astype(jnp.bfloat16).astype(jnp.float32)
    fmap = lax.conv_general_dilated(
        xb, wb, window_strides=(1, 1), padding="SAME",
        dimension_numbers=("NCHW", "HWIO", "NCHW"),
        precision=lax.Precision.HIGHEST,
    ) + b_conv[None, :, None, None]
    fmap = jnp.maximum(fmap, 0.0)
    pooled = jnp.mean(fmap, axis=(2, 3))            # (B, Cout)
    y = pooled @ w_lin.T + b_lin
    return y, fmap


if __name__ == "__main__":
    B, Cin, H, W = 2, 4, 16, 16
    Cout, NUM_CLASSES = 512, 10

    key = jax.random.PRNGKey(0)
    kx, kw, kb, kwl, kbl = jax.random.split(key, 5)

    x = jax.random.normal(kx, (B, Cin, H, W), dtype=jnp.float32)
    # Synthetic "features": Conv2d(Cin, 512, 3, padding=1) + ReLU  (HWIO weight).
    w_conv = jax.random.normal(kw, (3, 3, Cin, Cout), dtype=jnp.float32) * 0.05
    b_conv = jax.random.normal(kb, (Cout,), dtype=jnp.float32) * 0.05
    # Linear(512, num_classes), PyTorch weight layout (NC, 512).
    w_lin = jax.random.normal(kwl, (NUM_CLASSES, Cout), dtype=jnp.float32) * 0.05
    b_lin = jax.random.normal(kbl, (NUM_CLASSES,), dtype=jnp.float32) * 0.05

    y, fmap = cam_forward(x, w_conv, b_conv, w_lin, b_lin,
                          num_classes=NUM_CLASSES)
    jax.block_until_ready((y, fmap))

    y_ref, fmap_ref = _reference(x, w_conv, b_conv, w_lin, b_lin)
    assert y.shape == (B, NUM_CLASSES) and fmap.shape == (B, Cout, H, W)
    assert jnp.allclose(fmap, fmap_ref, atol=2e-3, rtol=2e-3), float(
        jnp.max(jnp.abs(fmap - fmap_ref)))
    assert jnp.allclose(y, y_ref, atol=1e-2, rtol=1e-2), float(
        jnp.max(jnp.abs(y - y_ref)))

    print("KERNEL_OK")
</pallas_src>

<mosaic_0001>
module attributes {stable_mosaic.version = 11 : i64} {
  func.func @_features_head_kernel(%arg0: i32, %arg1: i32, %arg2: memref<1x456x4xbf16, #tpu.memory_space<vmem>>, %arg3: memref<3x3x4x256xbf16, #tpu.memory_space<vmem>>, %arg4: memref<1x256xf32, #tpu.memory_space<vmem>>, %arg5: memref<256x128xf32, #tpu.memory_space<vmem>>, %arg6: memref<1x256x256xf32, #tpu.memory_space<vmem>>, %arg7: memref<1x1x128xf32, #tpu.memory_space<vmem>>, %arg8: memref<384x256xf32, #tpu.memory_space<vmem>>) attributes {dimension_semantics = [#tpu.dimension_semantics<parallel>, #tpu.dimension_semantics<parallel>], iteration_bounds = array<i64: 2, 2>, scalar_prefetch = 0 : i64, scratch_operands = 1 : i64, tpu.core_type = #tpu.core_type<tc>, window_params = [{transform_indices = @transform_0, window_bounds = array<i64: 1, 456, 4>}, {transform_indices = @transform_1, window_bounds = array<i64: 3, 3, 4, 256>}, {transform_indices = @transform_2, window_bounds = array<i64: 1, 256>}, {transform_indices = @transform_3, window_bounds = array<i64: 256, 128>}, {transform_indices = @transform_4, window_bounds = array<i64: 1, 256, 256>}, {transform_indices = @transform_5, window_bounds = array<i64: 1, 1, 128>}]} {
    %c0 = arith.constant 0 : index
    %c0_0 = arith.constant 0 : index
    %c0_1 = arith.constant 0 : index
    %0 = vector.load %arg2[%c0, %c0_0, %c0_1] : memref<1x456x4xbf16, #tpu.memory_space<vmem>>, vector<1x384x4xbf16>
    %1 = vector.shape_cast %0 : vector<1x384x4xbf16> to vector<384x4xbf16>
    %c0_2 = arith.constant 0 : index
    %c0_3 = arith.constant 0 : index
    %c0_4 = arith.constant 0 : index
    %c0_5 = arith.constant 0 : index
    %2 = vector.load %arg3[%c0_2, %c0_3, %c0_4, %c0_5] : memref<3x3x4x256xbf16, #tpu.memory_space<vmem>>, vector<1x1x4x256xbf16>
    %3 = vector.shape_cast %2 : vector<1x1x4x256xbf16> to vector<4x256xbf16>
    %cst = arith.constant dense<0.000000e+00> : vector<384x256xf32>
    %4 = tpu.matmul %1, %3, %cst {dimension_numbers = #tpu.dot_dimension_numbers<[1], [0], [0], [1], [0, 0, 1, 1], [], []>} : vector<384x4xbf16>, vector<4x256xbf16>, vector<384x256xf32> -> vector<384x256xf32>
    %c0_6 = arith.constant 0 : index
    %c0_7 = arith.constant 0 : index
    %5 = vector.load %arg8[%c0_6, %c0_7] : memref<384x256xf32, #tpu.memory_space<vmem>>, vector<384x256xf32>
    tpu.vector_store %arg8[%c0_6, %c0_7], %4 {strides = array<i32>} : memref<384x256xf32, #tpu.memory_space<vmem>>, vector<384x256xf32>,
    %c0_8 = arith.constant 0 : index
    %c1 = arith.constant 1 : index
    %c0_9 = arith.constant 0 : index
    %6 = vector.load %arg2[%c0_8, %c1, %c0_9] : memref<1x456x4xbf16, #tpu.memory_space<vmem>>, vector<1x384x4xbf16>
    %7 = vector.shape_cast %6 : vector<1x384x4xbf16> to vector<384x4xbf16>
    %c0_10 = arith.constant 0 : index
    %c1_11 = arith.constant 1 : index
    %c0_12 = arith.constant 0 : index
    %c0_13 = arith.constant 0 : index
    %8 = vector.load %arg3[%c0_10, %c1_11, %c0_12, %c0_13] : memref<3x3x4x256xbf16, #tpu.memory_space<vmem>>, vector<1x1x4x256xbf16>
    %9 = vector.shape_cast %8 : vector<1x1x4x256xbf16> to vector<4x256xbf16>
    %cst_14 = arith.constant dense<0.000000e+00> : vector<384x256xf32>
    %10 = tpu.matmul %7, %9, %cst_14 {dimension_numbers = #tpu.dot_dimension_numbers<[1], [0], [0], [1], [0, 0, 1, 1], [], []>} : vector<384x4xbf16>, vector<4x256xbf16>, vector<384x256xf32> -> vector<384x256xf32>
    %c0_15 = arith.constant 0 : index
    %c0_16 = arith.constant 0 : index
    %11 = vector.load %arg8[%c0_15, %c0_16] : memref<384x256xf32, #tpu.memory_space<vmem>>, vector<384x256xf32>
    %12 = arith.addf %11, %10 : vector<384x256xf32>
    %c0_17 = arith.constant 0 : index
    %c0_18 = arith.constant 0 : index
    %13 = vector.load %arg8[%c0_17, %c0_18] : memref<384x256xf32, #tpu.memory_space<vmem>>, vector<384x256xf32>
    tpu.vector_store %arg8[%c0_17, %c0_18], %12 {strides = array<i32>} : memref<384x256xf32, #tpu.memory_space<vmem>>, vector<384x256xf32>,
    %c0_19 = arith.constant 0 : index
    %c2 = arith.constant 2 : index
    %c0_20 = arith.constant 0 : index
    %14 = vector.load %arg2[%c0_19, %c2, %c0_20] : memref<1x456x4xbf16, #tpu.memory_space<vmem>>, vector<1x384x4xbf16>
    %15 = vector.shape_cast %14 : vector<1x384x4xbf16> to vector<384x4xbf16>
    %c0_21 = arith.constant 0 : index
    %c2_22 = arith.constant 2 : index
    %c0_23 = arith.constant 0 : index
    %c0_24 = arith.constant 0 : index
    %16 = vector.load %arg3[%c0_21, %c2_22, %c0_23, %c0_24] : memref<3x3x4x256xbf16, #tpu.memory_space<vmem>>, vector<1x1x4x256xbf16>
    %17 = vector.shape_cast %16 : vector<1x1x4x256xbf16> to vector<4x256xbf16>
    %cst_25 = arith.constant dense<0.000000e+00> : vector<384x256xf32>
    %18 = tpu.matmul %15, %17, %cst_25 {dimension_numbers = #tpu.dot_dimension_numbers<[1], [0], [0], [1], [0, 0, 1, 1], [], []>} : vector<384x4xbf16>, vector<4x256xbf16>, vector<384x256xf32> -> vector<384x256xf32>
    %c0_26 = arith.constant 0 : index
    %c0_27 = arith.constant 0 : index
    %19 = vector.load %arg8[%c0_26, %c0_27] : memref<384x256xf32, #tpu.memory_space<vmem>>, vector<384x256xf32>
    %20 = arith.addf %19, %18 : vector<384x256xf32>
    %c0_28 = arith.constant 0 : index
    %c0_29 = arith.constant 0 : index
    %21 = vector.load %arg8[%c0_28, %c0_29] : memref<384x256xf32, #tpu.memory_space<vmem>>, vector<384x256xf32>
    tpu.vector_store %arg8[%c0_28, %c0_29], %20 {strides = array<i32>} : memref<384x256xf32, #tpu.memory_space<vmem>>, vector<384x256xf32>,
    %c0_30 = arith.constant 0 : index
    %c24 = arith.constant 24 : index
    %c0_31 = arith.constant 0 : index
    %22 = vector.load %arg2[%c0_30, %c24, %c0_31] : memref<1x456x4xbf16, #tpu.memory_space<vmem>>, vector<1x384x4xbf16>
    %23 = vector.shape_cast %22 : vector<1x384x4xbf16> to vector<384x4xbf16>
    %c1_32 = arith.constant 1 : index
    %c0_33 = arith.constant 0 : index
    %c0_34 = arith.constant 0 : index
    %c0_35 = arith.constant 0 : index
    %24 = vector.load %arg3[%c1_32, %c0_33, %c0_34, %c0_35] : memref<3x3x4x256xbf16, #tpu.memory_space<vmem>>, vector<1x1x4x256xbf16>
    %25 = vector.shape_cast %24 : vector<1x1x4x256xbf16> to vector<4x256xbf16>
    %cst_36 = arith.constant dense<0.000000e+00> : vector<384x256xf32>
    %26 = tpu.matmul %23, %25, %cst_36 {dimension_numbers = #tpu.dot_dimension_numbers<[1], [0], [0], [1], [0, 0, 1, 1], [], []>} : vector<384x4xbf16>, vector<4x256xbf16>, vector<384x256xf32> -> vector<384x256xf32>
    %c0_37 = arith.constant 0 : index
    %c0_38 = arith.constant 0 : index
    %27 = vector.load %arg8[%c0_37, %c0_38] : memref<384x256xf32, #tpu.memory_space<vmem>>, vector<384x256xf32>
    %28 = arith.addf %27, %26 : vector<384x256xf32>
    %c0_39 = arith.constant 0 : index
    %c0_40 = arith.constant 0 : index
    %29 = vector.load %arg8[%c0_39, %c0_40] : memref<384x256xf32, #tpu.memory_space<vmem>>, vector<384x256xf32>
    tpu.vector_store %arg8[%c0_39, %c0_40], %28 {strides = array<i32>} : memref<384x256xf32, #tpu.memory_space<vmem>>, vector<384x256xf32>,
    %c0_41 = arith.constant 0 : index
    %c25 = arith.constant 25 : index
    %c0_42 = arith.constant 0 : index
    %30 = vector.load %arg2[%c0_41, %c25, %c0_42] : memref<1x456x4xbf16, #tpu.memory_space<vmem>>, vector<1x384x4xbf16>
    %31 = vector.shape_cast %30 : vector<1x384x4xbf16> to vector<384x4xbf16>
    %c1_43 = arith.constant 1 : index
    %c1_44 = arith.constant 1 : index
    %c0_45 = arith.constant 0 : index
    %c0_46 = arith.constant 0 : index
    %32 = vector.load %arg3[%c1_43, %c1_44, %c0_45, %c0_46] : memref<3x3x4x256xbf16, #tpu.memory_space<vmem>>, vector<1x1x4x256xbf16>
    %33 = vector.shape_cast %32 : vector<1x1x4x256xbf16> to vector<4x256xbf16>
    %cst_47 = arith.constant dense<0.000000e+00> : vector<384x256xf32>
    %34 = tpu.matmul %31, %33, %cst_47 {dimension_numbers = #tpu.dot_dimension_numbers<[1], [0], [0], [1], [0, 0, 1, 1], [], []>} : vector<384x4xbf16>, vector<4x256xbf16>, vector<384x256xf32> -> vector<384x256xf32>
    %c0_48 = arith.constant 0 : index
    %c0_49 = arith.constant 0 : index
    %35 = vector.load %arg8[%c0_48, %c0_49] : memref<384x256xf32, #tpu.memory_space<vmem>>, vector<384x256xf32>
    %36 = arith.addf %35, %34 : vector<384x256xf32>
    %c0_50 = arith.constant 0 : index
    %c0_51 = arith.constant 0 : index
    %37 = vector.load %arg8[%c0_50, %c0_51] : memref<384x256xf32, #tpu.memory_space<vmem>>, vector<384x256xf32>
    tpu.vector_store %arg8[%c0_50, %c0_51], %36 {strides = array<i32>} : memref<384x256xf32, #tpu.memory_space<vmem>>, vector<384x256xf32>,
    %c0_52 = arith.constant 0 : index
    %c26 = arith.constant 26 : index
    %c0_53 = arith.constant 0 : index
    %38 = vector.load %arg2[%c0_52, %c26, %c0_53] : memref<1x456x4xbf16, #tpu.memory_space<vmem>>, vector<1x384x4xbf16>
    %39 = vector.shape_cast %38 : vector<1x384x4xbf16> to vector<384x4xbf16>
    %c1_54 = arith.constant 1 : index
    %c2_55 = arith.constant 2 : index
    %c0_56 = arith.constant 0 : index
    %c0_57 = arith.constant 0 : index
    %40 = vector.load %arg3[%c1_54, %c2_55, %c0_56, %c0_57] : memref<3x3x4x256xbf16, #tpu.memory_space<vmem>>, vector<1x1x4x256xbf16>
    %41 = vector.shape_cast %40 : vector<1x1x4x256xbf16> to vector<4x256xbf16>
    %cst_58 = arith.constant dense<0.000000e+00> : vector<384x256xf32>
    %42 = tpu.matmul %39, %41, %cst_58 {dimension_numbers = #tpu.dot_dimension_numbers<[1], [0], [0], [1], [0, 0, 1, 1], [], []>} : vector<384x4xbf16>, vector<4x256xbf16>, vector<384x256xf32> -> vector<384x256xf32>
    %c0_59 = arith.constant 0 : index
    %c0_60 = arith.constant 0 : index
    %43 = vector.load %arg8[%c0_59, %c0_60] : memref<384x256xf32, #tpu.memory_space<vmem>>, vector<384x256xf32>
    %44 = arith.addf %43, %42 : vector<384x256xf32>
    %c0_61 = arith.constant 0 : index
    %c0_62 = arith.constant 0 : index
    %45 = vector.load %arg8[%c0_61, %c0_62] : memref<384x256xf32, #tpu.memory_space<vmem>>, vector<384x256xf32>
    tpu.vector_store %arg8[%c0_61, %c0_62], %44 {strides = array<i32>} : memref<384x256xf32, #tpu.memory_space<vmem>>, vector<384x256xf32>,
    %c0_63 = arith.constant 0 : index
    %c48 = arith.constant 48 : index
    %c0_64 = arith.constant 0 : index
    %46 = vector.load %arg2[%c0_63, %c48, %c0_64] : memref<1x456x4xbf16, #tpu.memory_space<vmem>>, vector<1x384x4xbf16>
    %47 = vector.shape_cast %46 : vector<1x384x4xbf16> to vector<384x4xbf16>
    %c2_65 = arith.constant 2 : index
    %c0_66 = arith.constant 0 : index
    %c0_67 = arith.constant 0 : index
    %c0_68 = arith.constant 0 : index
    %48 = vector.load %arg3[%c2_65, %c0_66, %c0_67, %c0_68] : memref<3x3x4x256xbf16, #tpu.memory_space<vmem>>, vector<1x1x4x256xbf16>
    %49 = vector.shape_cast %48 : vector<1x1x4x256xbf16> to vector<4x256xbf16>
    %cst_69 = arith.constant dense<0.000000e+00> : vector<384x256xf32>
    %50 = tpu.matmul %47, %49, %cst_69 {dimension_numbers = #tpu.dot_dimension_numbers<[1], [0], [0], [1], [0, 0, 1, 1], [], []>} : vector<384x4xbf16>, vector<4x256xbf16>, vector<384x256xf32> -> vector<384x256xf32>
    %c0_70 = arith.constant 0 : index
    %c0_71 = arith.constant 0 : index
    %51 = vector.load %arg8[%c0_70, %c0_71] : memref<384x256xf32, #tpu.memory_space<vmem>>, vector<384x256xf32>
    %52 = arith.addf %51, %50 : vector<384x256xf32>
    %c0_72 = arith.constant 0 : index
    %c0_73 = arith.constant 0 : index
    %53 = vector.load %arg8[%c0_72, %c0_73] : memref<384x256xf32, #tpu.memory_space<vmem>>, vector<384x256xf32>
    tpu.vector_store %arg8[%c0_72, %c0_73], %52 {strides = array<i32>} : memref<384x256xf32, #tpu.memory_space<vmem>>, vector<384x256xf32>,
    %c0_74 = arith.constant 0 : index
    %c49 = arith.constant 49 : index
    %c0_75 = arith.constant 0 : index
    %54 = vector.load %arg2[%c0_74, %c49, %c0_75] : memref<1x456x4xbf16, #tpu.memory_space<vmem>>, vector<1x384x4xbf16>
    %55 = vector.shape_cast %54 : vector<1x384x4xbf16> to vector<384x4xbf16>
    %c2_76 = arith.constant 2 : index
    %c1_77 = arith.constant 1 : index
    %c0_78 = arith.constant 0 : index
    %c0_79 = arith.constant 0 : index
    %56 = vector.load %arg3[%c2_76, %c1_77, %c0_78, %c0_79] : memref<3x3x4x256xbf16, #tpu.memory_space<vmem>>, vector<1x1x4x256xbf16>
    %57 = vector.shape_cast %56 : vector<1x1x4x256xbf16> to vector<4x256xbf16>
    %cst_80 = arith.constant dense<0.000000e+00> : vector<384x256xf32>
    %58 = tpu.matmul %55, %57, %cst_80 {dimension_numbers = #tpu.dot_dimension_numbers<[1], [0], [0], [1], [0, 0, 1, 1], [], []>} : vector<384x4xbf16>, vector<4x256xbf16>, vector<384x256xf32> -> vector<384x256xf32>
    %c0_81 = arith.constant 0 : index
    %c0_82 = arith.constant 0 : index
    %59 = vector.load %arg8[%c0_81, %c0_82] : memref<384x256xf32, #tpu.memory_space<vmem>>, vector<384x256xf32>
    %60 = arith.addf %59, %58 : vector<384x256xf32>
    %c0_83 = arith.constant 0 : index
    %c0_84 = arith.constant 0 : index
    %61 = vector.load %arg8[%c0_83, %c0_84] : memref<384x256xf32, #tpu.memory_space<vmem>>, vector<384x256xf32>
    tpu.vector_store %arg8[%c0_83, %c0_84], %60 {strides = array<i32>} : memref<384x256xf32, #tpu.memory_space<vmem>>, vector<384x256xf32>,
    %c0_85 = arith.constant 0 : index
    %c50 = arith.constant 50 : index
    %c0_86 = arith.constant 0 : index
    %62 = vector.load %arg2[%c0_85, %c50, %c0_86] : memref<1x456x4xbf16, #tpu.memory_space<vmem>>, vector<1x384x4xbf16>
    %63 = vector.shape_cast %62 : vector<1x384x4xbf16> to vector<384x4xbf16>
    %c2_87 = arith.constant 2 : index
    %c2_88 = arith.constant 2 : index
    %c0_89 = arith.constant 0 : index
    %c0_90 = arith.constant 0 : index
    %64 = vector.load %arg3[%c2_87, %c2_88, %c0_89, %c0_90] : memref<3x3x4x256xbf16, #tpu.memory_space<vmem>>, vector<1x1x4x256xbf16>
    %65 = vector.shape_cast %64 : vector<1x1x4x256xbf16> to vector<4x256xbf16>
    %cst_91 = arith.constant dense<0.000000e+00> : vector<384x256xf32>
    %66 = tpu.matmul %63, %65, %cst_91 {dimension_numbers = #tpu.dot_dimension_numbers<[1], [0], [0], [1], [0, 0, 1, 1], [], []>} : vector<384x4xbf16>, vector<4x256xbf16>, vector<384x256xf32> -> vector<384x256xf32>
    %c0_92 = arith.constant 0 : index
    %c0_93 = arith.constant 0 : index
    %67 = vector.load %arg8[%c0_92, %c0_93] : memref<384x256xf32, #tpu.memory_space<vmem>>, vector<384x256xf32>
    %68 = arith.addf %67, %66 : vector<384x256xf32>
    %c0_94 = arith.constant 0 : index
    %c0_95 = arith.constant 0 : index
    %69 = vector.load %arg8[%c0_94, %c0_95] : memref<384x256xf32, #tpu.memory_space<vmem>>, vector<384x256xf32>
    tpu.vector_store %arg8[%c0_94, %c0_95], %68 {strides = array<i32>} : memref<384x256xf32, #tpu.memory_space<vmem>>, vector<384x256xf32>,
    %c0_96 = arith.constant 0 : index
    %c0_97 = arith.constant 0 : index
    %70 = vector.load %arg8[%c0_96, %c0_97] : memref<384x256xf32, #tpu.memory_space<vmem>>, vector<384x256xf32>
    %71 = vector.shape_cast %70 : vector<384x256xf32> to vector<16x24x256xf32>
    %72 = vector.extract_strided_slice %71 {offsets = [0, 0, 0], sizes = [16, 16, 256], strides = [1, 1, 1]} : vector<16x24x256xf32> to vector<16x16x256xf32>
    %73 = vector.shape_cast %72 : vector<16x16x256xf32> to vector<256x256xf32>
    %c0_98 = arith.constant 0 : index
    %c0_99 = arith.constant 0 : index
    %74 = vector.load %arg4[%c0_98, %c0_99] : memref<1x256xf32, #tpu.memory_space<vmem>>, vector<1x256xf32>
    %75 = vector.broadcast %74 : vector<1x256xf32> to vector<256x256xf32>
    %76 = arith.addf %73, %75 : vector<256x256xf32>
    %cst_100 = arith.constant 0.000000e+00 : f32
    %77 = vector.broadcast %cst_100 : f32 to vector<256x256xf32>
    %78 = arith.maximumf %76, %77 : vector<256x256xf32>
    %cst_101 = arith.constant dense<0.000000e+00> : vector<256xf32>
    %79 = vector.multi_reduction <add>, %78, %cst_101 [0] : vector<256x256xf32> to vector<256xf32>
    %80 = vector.shape_cast %79 : vector<256xf32> to vector<1x256xf32>
    %cst_102 = arith.constant 3.906250e-03 : f32
    %81 = vector.broadcast %cst_102 : f32 to vector<1x256xf32>
    %82 = arith.mulf %80, %81 : vector<1x256xf32>
    %83 = vector.shape_cast %82 : vector<1x256xf32> to vector<1x256xf32>
    %84 = vector.broadcast %83 : vector<1x256xf32> to vector<8x256xf32>
    %c0_103 = arith.constant 0 : index
    %c0_104 = arith.constant 0 : index
    %85 = vector.load %arg5[%c0_103, %c0_104] : memref<256x128xf32, #tpu.memory_space<vmem>>, vector<256x128xf32>
    %cst_105 = arith.constant dense<0.000000e+00> : vector<8x128xf32>
    %86 = tpu.matmul %84, %85, %cst_105 {dimension_numbers = #tpu.dot_dimension_numbers<[1], [0], [0], [1], [0, 0, 1, 1], [], []>} : vector<8x256xf32>, vector<256x128xf32>, vector<8x128xf32> -> vector<8x128xf32>
    %87 = vector.extract_strided_slice %86 {offsets = [0, 0], sizes = [1, 128], strides = [1, 1]} : vector<8x128xf32> to vector<1x128xf32>
    %c0_106 = arith.constant 0 : index
    %c0_107 = arith.constant 0 : index
    %c0_108 = arith.constant 0 : index
    %88 = vector.load %arg7[%c0_106, %c0_107, %c0_108] : memref<1x1x128xf32, #tpu.memory_space<vmem>>, vector<1x1x128xf32>
    %89 = vector.shape_cast %88 : vector<1x1x128xf32> to vector<1x128xf32>
    %90 = vector.shape_cast %87 : vector<1x128xf32> to vector<1x1x128xf32>
    tpu.vector_store %arg7[%c0_106, %c0_107, %c0_108], %90 {strides = array<i32>} : memref<1x1x128xf32, #tpu.memory_space<vmem>>, vector<1x1x128xf32>,
    %91 = tpu.transpose %78, [1, 0] : vector<256x256xf32> -> vector<256x256xf32>
    %c0_109 = arith.constant 0 : index
    %c0_110 = arith.constant 0 : index
    %c0_111 = arith.constant 0 : index
    %92 = vector.load %arg6[%c0_109, %c0_110, %c0_111] : memref<1x256x256xf32, #tpu.memory_space<vmem>>, vector<1x256x256xf32>
    %93 = vector.shape_cast %92 : vector<1x256x256xf32> to vector<256x256xf32>
    %94 = vector.shape_cast %91 : vector<256x256xf32> to vector<1x256x256xf32>
    tpu.vector_store %arg6[%c0_109, %c0_110, %c0_111], %94 {strides = array<i32>} : memref<1x256x256xf32, #tpu.memory_space<vmem>>, vector<1x256x256xf32>,
    return
  }
  func.func @transform_0(%arg0: i32, %arg1: i32) -> (i32, i32, i32) {
    %c0_i32 = arith.constant 0 : i32
    %c0_i32_0 = arith.constant 0 : i32
    %c0_i32_1 = arith.constant 0 : i32
    return %arg1, %c0_i32, %c0_i32_0 : i32, i32, i32
  }
  func.func @transform_1(%arg0: i32, %arg1: i32) -> (i32, i32, i32, i32) {
    %c0_i32 = arith.constant 0 : i32
    %c0_i32_0 = arith.constant 0 : i32
    %c0_i32_1 = arith.constant 0 : i32
    %c0_i32_2 = arith.constant 0 : i32
    return %c0_i32, %c0_i32_0, %c0_i32_1, %arg0 : i32, i32, i32, i32
  }
  func.func @transform_2(%arg0: i32, %arg1: i32) -> (i32, i32) {
    %c0_i32 = arith.constant 0 : i32
    %c0_i32_0 = arith.constant 0 : i32
    return %c0_i32, %arg0 : i32, i32
  }
  func.func @transform_3(%arg0: i32, %arg1: i32) -> (i32, i32) {
    %c0_i32 = arith.constant 0 : i32
    %c0_i32_0 = arith.constant 0 : i32
    return %arg0, %c0_i32 : i32, i32
  }
  func.func @transform_4(%arg0: i32, %arg1: i32) -> (i32, i32, i32) {
    %c0_i32 = arith.constant 0 : i32
    %c0_i32_0 = arith.constant 0 : i32
    return %arg1, %arg0, %c0_i32 : i32, i32, i32
  }
  func.func @transform_5(%arg0: i32, %arg1: i32) -> (i32, i32, i32) {
    %c0_i32 = arith.constant 0 : i32
    %c0_i32_0 = arith.constant 0 : i32
    return %arg1, %c0_i32, %arg0 : i32, i32, i32
  }
}

</mosaic_0001>

<bundles_post_ra>
// kernel: cam_forward.1
= control target key start
LH: loop header
LB: loop body
LE: loop exit
PB: predicated region body
PF: predicated region fallthrough
CT: control target
= control target key end

     0   :  { %s9974_s18 = smov 0   ;;  %s9976_s19 = smov 0   ;;  %s11907_s0 = inlined_call_operand.vmem [shape: bf16[2,456,4], index: 0, kind: input, shape index: {}]   ;;  %s11908_s1 = inlined_call_operand.vmem [shape: bf16[3,3,4,512], index: 1, kind: input, shape index: {}]   ;;  %s11909_s2 = inlined_call_operand.vmem [shape: f32[1,512], index: 2, kind: input, shape index: {}]   ;;  %s11910_s3 = inlined_call_operand.vmem [shape: f32[512,128], index: 3, kind: input, shape index: {}]   ;;  %s11911_s4 = inlined_call_operand.vmem [shape: f32[2,512,256], index: 4, kind: output, shape index: {0}]   ;;  %s11912_s5 = inlined_call_operand.vmem [shape: f32[2,1,256], index: 5, kind: output, shape index: {1}]  }
   0x1   :  { %s9978_s20 = smov 0   ;;  %s9980_s21 = smov 0  }
   0x2   :  { %s9982_s22 = smov 0   ;;  %s9984_s23 = smov 0  }
   0x3   :  { %s9986_s24 = smov 0  }
   0x4 LB: > { %s25_s25 = sadd.s32 1, %s9933_s22  ;;  %s28_s26 = sadd.s32 1, %s9937_s23  ;;  %s9941_s24 = sphi %s9986_s24, %s16_s24   ;;  %s9937_s23 = sphi %s9984_s23, %s12121_s23   ;;  %s9933_s22 = sphi %s9982_s22, %s12120_s22   ;;  %s9929_s21 = sphi %s9980_s21, %s12119_s21   ;;  %s9925_s20 = sphi %s9978_s20, %s12118_s20   ;;  %s9921_s19 = sphi %s9976_s19, %s12117_s19   ;;  %s9917_s18 = sphi %s9974_s18, %s12116_s18  }
   0x5   : > { %p26_p0 = scmp.ge.s32.totalorder %s25_s25, 2  ;;  %p68_p1 = scmp.ne.s32.totalorder %s9921_s19, %s9917_s18 }
   0x6   : > { %p69_p2 = scmp.eq.s32.totalorder %s9941_s24, 0  ;;  %s61_s28 = sadd.s32 1, %s9921_s19 }
   0x7   : > { %s12123_s25 = smov (%p26_p0, %s25_s25), 0  ;;  %s12125_s26 = smov (!%p26_p0, %s28_s26), %s9937_s23 }
   0x8   : > { %p70_p3 = por %p69_p2, %p68_p1  ;;  %p30_p4 = scmp.ge.s32.totalorder %s12125_s26, 2 }
   0x9   : > { %p9088_p6 = scmp.ge.s32.totalorder %s9941_s24, 4 }
   0xa   : > { %s12127_s26 = smov (%p30_p4, %s12125_s26), 0 }
   0xb   : > { %s58_s27 = ssub.s32 %s9937_s23, %s12127_s26  ;;  %202 = sbr.rel (%p9088_p6) target bundleno = 26 (0x1a), region = 16 }
   0xc   : > { %p59_p5 = scmp.eq.s32.totalorder %s58_s27, 0 }
   0xe   : > { %s10023_s29 = scalar_select %p59_p5, %s9921_s19, %s61_s28  }
  0x10   : > { %213 = sbr.rel (!%p70_p3) target bundleno = 26 (0x1a), region = 24  ;;  %s215_s30 = sand.u32 (%p70_p3), 1, %s9921_s19  }
  0x11   : > { %s9567_s6 = sshll.u32 (%p70_p3), %s9937_s23, 2  ;;  %s9605_s7 = smul.u32 (%p70_p3), 36, %s215_s30 }
  0x12   : > { %s220_s10 = scalar_lea.vmem (%p70_p3), %s11908_s1, %s9567_s6 }
  0x13   : > { %v237_v0 = vld [vmem:[%s220_s10] sm:$0xf] (%p70_p3)  ;;  %v239_v1 = vld [vmem:[%s220_s10 + $0x8] sm:$0xf] (%p70_p3)  ;;  %v241_v2 = vld [vmem:[%s220_s10 + $0x10] sm:$0xf] (%p70_p3) }
  0x14   : > { %v243_v3 = vld [vmem:[%s220_s10 + $0x18] sm:$0xf] (%p70_p3)  ;;  %v245_v4 = vld [vmem:[%s220_s10 + $0x20] sm:$0xf] (%p70_p3)  ;;  %s217_s11 = scalar_lea.vmem (%p70_p3), [#allocation3], %s9605_s7 }
  0x15   : > { %238 = vst [vmem:[%s217_s11] sm:$0xf] %v237_v0  ;;  %240 = vst [vmem:[%s217_s11 + $0x4] sm:$0xf] %v239_v1  ;;  %v247_v5 = vld [vmem:[%s220_s10 + $0x28] sm:$0xf] }
  0x16   : > { %242 = vst [vmem:[%s217_s11 + $0x8] sm:$0xf] %v241_v2  ;;  %244 = vst [vmem:[%s217_s11 + $0xc] sm:$0xf] %v243_v3  ;;  %v249_v6 = vld [vmem:[%s220_s10 + $0x30] sm:$0xf] }
  0x17   : > { %246 = vst [vmem:[%s217_s11 + $0x10] sm:$0xf] %v245_v4  ;;  %v251_v7 = vld [vmem:[%s220_s10 + $0x38] sm:$0xf]  ;;  %248 = vst [vmem:[%s217_s11 + $0x14] sm:$0xf] %v247_v5 }
  0x18   : > { %250 = vst [vmem:[%s217_s11 + $0x18] sm:$0xf] %v249_v6  ;;  %252 = vst [vmem:[%s217_s11 + $0x1c] sm:$0xf] %v251_v7  ;;  %v253_v8 = vld [vmem:[%s220_s10 + $0x40] sm:$0xf] }
  0x19   : > { %254 = vst [vmem:[%s217_s11 + $0x20] sm:$0xf] %v253_v8 }
  0x1a PF: > { %p9091_p7 = scmp.ge.s32.totalorder %s9941_s24, 1  ;;  %p312_p8 = scmp.lt.s32.totalorder %s9941_s24, 5 }
  0x1c   : > { %p313_p9 = pnand %p9091_p7, %p312_p8 }
  0x1e   : > { %316 = sbr.rel (%p313_p9) target bundleno = 1326 (0x52e), region = 73 }
  0x23   : > { %s319_s12 = sand.u32 1, %s9917_s18   ;;  %p372_p10 = scmp.lt.s32.totalorder %s9925_s20, 1  ;;  %v11913_v9 = vmov 0   ;;  %vm659_vm0 = vcmask 1041408   ;;  %vm586_vm1 = vcmask 31744   ;;  %vm2228_vm3 = vcmask 1046528  }
  0x24   : > { %s9606_s13 = smul.u32 36, %s319_s12  ;;  %698 = vmatprep.mubr.bf16.mxu0 %v11913_v9  ;;  %828 = vmatprep.mubr.bf16.mxu1 %v11913_v9  ;;  %vm1209_vm2 = vsmask.f32 7424  ;;  %s9094_s27 = sshll.u32 %s9929_s21, 5 }
  0x25   : > { %s12129_s20 = smov (!%p372_p10, %s9925_s20), 1  ;;  %p384_p11 = scmp.lt.s32.totalorder %s9094_s27, 63 }
  0x26   : > { %s10040_s14 = scalar_lea.vmem [#allocation3], %s9606_s13  ;;  %s9607_s15 = smul.u32 228, %s12129_s20 }
  0x27   : > { %v9125_v10 = vld.sshfl [vmem:[%s10040_s14] sm:$0x33 pattern:$0x76325410]  ;;  %s12131_s27 = smov (!%p384_p11, %s9094_s27), 63  ;;  %s9093_s8 = sshll.u32 %s9929_s21, 1 }
  0x28   : > { %v585_v11 = vcombine.high %v9125_v10, %v9125_v10  ;;  %v661_v12 = vsel %vm659_vm0, %v9125_v10, 0  ;;  %v9229_v13 = vld.sshfl [vmem:[%s10040_s14 + $0x8] sm:$0x33 pattern:$0x76325410]  ;;  %s10049_s18 = scalar_lea.vmem %s11907_s0, %s9607_s15  ;;  %s9095_s28 = sshll.u32 %s12131_s27, 3 }
  0x29   : > { %v2286_v14 = vcombine.high %v9229_v13, %v9229_v13  ;;  %v9177_v15 = vld.sshfl [vmem:[%s10040_s14 + $0x4] sm:$0x33 pattern:$0x76325410]  ;;  %v2360_v19 = vsel %vm659_vm0, %v9229_v13, 0  ;;  %v9668_v22 = vld [vmem:[%s10049_s18 + $0x70] sm:$0xff]   ;;  %s11450_s7 = scalar_lea.vmem %s11910_s3, %s9095_s28 }
  0x2a   : > { %9126 = vmatprep.subr.msk.bf16.mxu0 %vm659_vm0, %v585_v11  ;;  %9603 = vmatprep.subr.msk.bf16.mxu1 %vm659_vm0, %v585_v11  ;;  %v9665_v16 = vld [vmem:[%s10049_s18] sm:$0xff]   ;;  %v1414_v17 = vcombine.high %v9177_v15, %v9177_v15  ;;  %v9666_v18 = vld [vmem:[%s10049_s18 + $0x68] sm:$0xff]   ;;  %v1488_v20 = vsel %vm659_vm0, %v9177_v15, 0  ;;  %v9669_v23 = vld [vmem:[%s10049_s18 + $0x10] sm:$0xff]   ;;  %p379_p12 = scmp.lt.s32.totalorder %s9093_s8, 3  ;;  %s9097_s12 = sshll.u32 %s12131_s27, 1 }
  0x2b   : > { %681 = vmatpush1.bf16.msra.mxu0 %v661_v12  ;;  %9604 = vmatpush1.bf16.msra.mxu1 %v661_v12  ;;  %v9667_v21 = vld [vmem:[%s10049_s18 + $0x8] sm:$0xff]   ;;  %v9670_v24 = vld [vmem:[%s10049_s18 + $0x78] sm:$0xff]   ;;  %v9672_v26 = vld [vmem:[%s10049_s18 + $0x80] sm:$0xff]   ;;  %s9098_s13 = sshll.u32 %s12129_s20, 7  ;;  %p402_p13 = scmp.lt.s32.totalorder %s9929_s21, 1 }
  0x2c   : > { %9230 = vmatprep.subr.msk.bf16.mxu0 %vm659_vm0, %v2286_v14  ;;  %9178 = vmatprep.subr.msk.bf16.mxu1 %vm659_vm0, %v1414_v17  ;;  %v9671_v25 = vld [vmem:[%s10049_s18 + $0x18] sm:$0xff]   ;;  %v10083_v27 = vld.sshfl [vmem:[%s10040_s14 + $0xc] sm:$0x33 pattern:$0x76325410]  ;;  %v9673_v29 = vld [vmem:[%s10049_s18 + $0x20] sm:$0xff]  }
  0x2d   : > { %v3104_v28 = vcombine.high %v10083_v27, %v10083_v27  ;;  %v9674_v30 = vld [vmem:[%s10049_s18 + $0x88] sm:$0xff]   ;;  %v10091_v31 = vld.sshfl [vmem:[%s10040_s14 + $0x10] sm:$0x33 pattern:$0x76325410]  ;;  %v9678_v36 = vld [vmem:[%s10049_s18 + $0x98] sm:$0xff]  }
  0x2e   : > { %9127 = vmatmul.mubr.msk.bf16.vlgmr.msra.gmra.mxu0 %vm586_vm1, %v9665_v16  ;;  %9140 = vmatmul.mubr.msk.bf16.vlgmr.msra.gmra.mxu1 %vm586_vm1, %v9666_v18  ;;  %v4122_v32 = vcombine.high %v10091_v31, %v10091_v31  ;;  %v9675_v33 = vld [vmem:[%s10049_s18 + $0x28] sm:$0xff]   ;;  %v9676_v34 = vld [vmem:[%s10049_s18 + $0x90] sm:$0xff]   ;;  %v9679_v37 = vld [vmem:[%s10049_s18 + $0x38] sm:$0xff]   ;;  %v3178_v59 = vsel %vm659_vm0, %v10083_v27, 0  ;;  %v4196_v11 = vsel %vm659_vm0, %v10091_v31, 0  ;;  %s12133_s8 = smov (!%p379_p12, %s9093_s8), 3 }
  0x2f   : > { %2380 = vmatpush1.bf16.msra.mxu0 %v2360_v19  ;;  %708 = vmatprep.mubr.bf16.mxu0 %v11913_v9  ;;  %v9677_v35 = vld [vmem:[%s10049_s18 + $0x30] sm:$0xff]   ;;  %v9680_v38 = vld [vmem:[%s10049_s18 + $0xa0] sm:$0xff]   ;;  %v9682_v40 = vld [vmem:[%s10049_s18 + $0xa8] sm:$0xff]   ;;  %s381_s11 = scalar_lea.vmem %s11909_s2, %s12133_s8  ;;  %s12135_s21 = smov (!%p402_p13, %s9929_s21), 1 }
  0x30   : > { %838 = vmatprep.mubr.bf16.mxu1 %v11913_v9  ;;  %1508 = vmatpush1.bf16.msra.mxu1 %v1488_v20  ;;  %v9681_v39 = vld [vmem:[%s10049_s18 + $0x40] sm:$0xff]   ;;  %v9683_v41 = vld [vmem:[%s10049_s18 + $0x48] sm:$0xff]   ;;  %v9684_v42 = vld [vmem:[%s10049_s18 + $0xb0] sm:$0xff]   ;;  %s9100_s27 = sshll.u32 %s12129_s20, 1 }
  0x31   : > { %9281 = vmatprep.subr.msk.bf16.mxu1 %vm659_vm0, %v3104_v28  ;;  %9333 = vmatprep.subr.msk.bf16.mxu0 %vm659_vm0, %v4122_v32  ;;  %v9688_v43 = vld [vmem:[%s10049_s18] sm:$0xff]   ;;  %v9689_v44 = vld [vmem:[%s10049_s18 + $0x8] sm:$0xff]   ;;  %v9685_v46 = vld [vmem:[%s10049_s18 + $0x50] sm:$0xff]   ;;  %s405_s28 = sadd.s32 %s9100_s27, %s12135_s21 }
  0x32   : > { %v1213_v45 = vshll.u32 %v9688_v43, 16  ;;  %v9686_v47 = vld [vmem:[%s10049_s18 + $0xb8] sm:$0xff]   ;;  %v1211_v48 = vshrl.u32 %v9688_v43, 16  ;;  %v1218_v50 = vshll.u32 %v9689_v44, 16  ;;  %v9691_v53 = vld [vmem:[%s10049_s18 + $0x10] sm:$0xff]   ;;  %v1222_v55 = vshrl.u32 %v9689_v44, 16 }
  0x33   : > { %v9687_v54 = vld [vmem:[%s10049_s18 + $0x58] sm:$0xff]   ;;  %v1226_v58 = vshll.u32 %v9691_v53, 16  ;;  %v1230_v60 = vshrl.u32 %v9691_v53, 16  ;;  %v9694_v0 = vld [vmem:[%s10049_s18 + $0x8] sm:$0xff]   ;;  %v9690_v1 = vld [vmem:[%s10049_s18 + $0x60] sm:$0xff]  }
  0x34   : > { %v1215_v49 = vrot.slane %v1213_v45, 1  ;;  %v1220_v52 = vrot.slane %v1218_v50, 1  ;;  %v9692_v56 = vld [vmem:[%s10049_s18 + $0x18] sm:$0xff]   ;;  %v9693_v2 = vld [vmem:[%s10049_s18] sm:$0xfe]   ;;  %v2230_v5 = vrot.slane %v9694_v0, 1 }
  0x35   : > { %v1234_v61 = vshll.u32 %v9692_v56, 16  ;;  %v1228_v63 = vrot.slane %v1226_v58, 1  ;;  %v9695_v6 = vld [vmem:[%s10049_s18 + $0x20] sm:$0xff]   ;;  %v2229_v8 = vrot.slane %v9693_v2, 1  ;;  %v9696_v10 = vld [vmem:[%s10049_s18 + $0x10] sm:$0xff]   ;;  %v1238_v12 = vshrl.u32 %v9692_v56, 16 }
  0x36   : > { %9128 = vmatmul.mubr.msk.bf16.gmra.mxu0 %vm586_vm1, %v9667_v21  ;;  %9141 = vmatmul.mubr.msk.bf16.gmra.mxu1 %vm586_vm1, %v9668_v22  ;;  %v1216_v51 = vor.u32 %v1215_v49, %v1211_v48  ;;  %v1224_v62 = vor.u32 %v1222_v55, %v1220_v52  ;;  %v1242_v15 = vshll.u32 %v9695_v6, 16  ;;  %v2232_v16 = vrot.slane %v9696_v10, 1  ;;  %v9697_v17 = vld [vmem:[%s10049_s18 + $0x28] sm:$0xff]   ;;  %v9698_v20 = vld [vmem:[%s10049_s18 + $0x18] sm:$0xff]   ;;  %v9704_v48 = vld [vmem:[%s10049_s18 + $0x30] sm:$0xff]  }
  0x37   : > { %718 = vmatprep.mubr.bf16.mxu0 %v11913_v9  ;;  %848 = vmatprep.mubr.bf16.mxu1 %v11913_v9  ;;  %v1236_v4 = vrot.slane %v1234_v61, 1  ;;  %v1232_v7 = vor.u32 %v1230_v60, %v1228_v63  ;;  %v2231_v14 = vsel %vm2228_vm3, %v2229_v8, %v2230_v5  ;;  %v1246_v21 = vshrl.u32 %v9695_v6, 16  ;;  %v9701_v31 = vld [vmem:[%s10049_s18 + $0x38] sm:$0xff]   ;;  %v9702_v43 = vld [vmem:[%s10049_s18 + $0x28] sm:$0xff]   ;;  %v9707_v58 = vld [vmem:[%s10049_s18 + $0x50] sm:$0xff]  }
  0x38   : > { %v1221_v57 = vsel %vm1209_vm2, %v1216_v51, %v1220_v52  ;;  %v1229_v3 = vsel %vm1209_vm2, %v1224_v62, %v1228_v63  ;;  %v1244_v19 = vrot.slane %v1242_v15, 1  ;;  %v2238_v45 = vrot.slane %v9702_v43, 1  ;;  %v9705_v49 = vld [vmem:[%s10049_s18 + $0x48] sm:$0xff]   ;;  %v9706_v53 = vld [vmem:[%s10049_s18 + $0x38] sm:$0xff]  }
  0x39   : > { %v1237_v13 = vsel %vm1209_vm2, %v1232_v7, %v1236_v4  ;;  %v1240_v18 = vor.u32 %v1238_v12, %v1236_v4  ;;  %v2240_v56 = vrot.slane %v9704_v48, 1  ;;  %v2242_v60 = vrot.slane %v9706_v53, 1  ;;  %v9709_v8 = vld [vmem:[%s10049_s18 + $0x58] sm:$0xff]   ;;  %v9710_v15 = vld [vmem:[%s10049_s18 + $0x48] sm:$0xff]  }
  0x3a   : > { %v1248_v27 = vor.u32 %v1246_v21, %v1244_v19  ;;  %v1290_v0 = vshll.u32 %v9707_v58, 16 }
  0x3b   : > { %v1245_v22 = vsel %vm1209_vm2, %v1240_v18, %v1244_v19  ;;  %v2241_v62 = vsel %vm2228_vm3, %v2238_v45, %v2240_v56  ;;  %v2243_v4 = vsel %vm2228_vm3, %v2240_v56, %v2242_v60  ;;  %v2246_v19 = vrot.slane %v9710_v15, 1  ;;  %v9721_v15 = vld [vmem:[%s10049_s18 + $0x88] sm:$0xff]  }
  0x3c   : > { %v1292_v6 = vrot.slane %v1290_v0, 1 }
  0x3e   : > { %9129 = vmatmul.mubr.msk.bf16.gmra.mxu0 %vm586_vm1, %v9669_v23  ;;  %9142 = vmatmul.mubr.msk.bf16.gmra.mxu1 %vm586_vm1, %v9670_v24  ;;  %v2233_v23 = vsel %vm2228_vm3, %v2230_v5, %v2232_v16  ;;  %v1250_v24 = vshll.u32 %v9697_v17, 16  ;;  %v1286_v5 = vshrl.u32 %v9705_v49, 16 }
  0x3f   : > { %728 = vmatprep.mubr.bf16.mxu0 %v11913_v9  ;;  %858 = vmatprep.mubr.bf16.mxu1 %v11913_v9 }
  0x40   : > { %v1252_v28 = vrot.slane %v1250_v24, 1  ;;  %v9712_v24 = vld [vmem:[%s10049_s18 + $0x50] sm:$0xff]  }
  0x42   : > { %v1253_v32 = vsel %vm1209_vm2, %v1248_v27, %v1252_v28 }
  0x46   : > { %9130 = vmatmul.mubr.msk.bf16.gmra.mxu0 %vm586_vm1, %v9671_v25  ;;  %9143 = vmatmul.mubr.msk.bf16.gmra.mxu1 %vm586_vm1, %v9672_v26  ;;  %v2234_v25 = vrot.slane %v9698_v20, 1  ;;  %v9699_v26 = vld [vmem:[%s10049_s18 + $0x30] sm:$0xff]   ;;  %v1302_v20 = vshrl.u32 %v9709_v8, 16 }
  0x47   : > { %738 = vmatprep.mubr.bf16.mxu0 %v11913_v9  ;;  %868 = vmatprep.mubr.bf16.mxu1 %v11913_v9 }
  0x4e   : > { %9131 = vmatmul.mubr.msk.bf16.gmra.mxu0 %vm586_vm1, %v9673_v29  ;;  %9144 = vmatmul.mubr.msk.bf16.gmra.mxu1 %vm586_vm1, %v9674_v30  ;;  %v9700_v29 = vld [vmem:[%s10049_s18 + $0x20] sm:$0xff]   ;;  %v1254_v30 = vshrl.u32 %v9697_v17, 16 }
  0x4f   : > { %748 = vmatprep.mubr.bf16.mxu0 %v11913_v9  ;;  %878 = vmatprep.mubr.bf16.mxu1 %v11913_v9 }
  0x56   : > { %9132 = vmatmul.mubr.msk.bf16.gmra.mxu0 %vm586_vm1, %v9675_v33  ;;  %9145 = vmatmul.mubr.msk.bf16.gmra.mxu1 %vm586_vm1, %v9676_v34  ;;  %v2235_v33 = vsel %vm2228_vm3, %v2232_v16, %v2234_v25  ;;  %v1258_v34 = vshll.u32 %v9699_v26, 16  ;;  %v9711_v16 = vld [vmem:[%s10049_s18 + $0x60] sm:$0xff]  }
  0x57   : > { %758 = vmatprep.mubr.bf16.mxu0 %v11913_v9  ;;  %888 = vmatprep.mubr.bf16.mxu1 %v11913_v9 }
  0x5e   : > { %9133 = vmatmul.mubr.msk.bf16.gmra.mxu0 %vm586_vm1, %v9677_v35  ;;  %9146 = vmatmul.mubr.msk.bf16.gmra.mxu1 %vm586_vm1, %v9678_v36  ;;  %v2236_v35 = vrot.slane %v9700_v29, 1  ;;  %v1256_v36 = vor.u32 %v1254_v30, %v1252_v28  ;;  %v2248_v30 = vrot.slane %v9712_v24, 1  ;;  %v9722_v24 = vld [vmem:[%s10049_s18 + $0x78] sm:$0xff]  }
  0x5f   : > { %768 = vmatprep.mubr.bf16.mxu0 %v11913_v9  ;;  %898 = vmatprep.mubr.bf16.mxu1 %v11913_v9 }
  0x60   : > { %v2239_v51 = vsel %vm2228_vm3, %v2236_v35, %v2238_v45 }
  0x66   : > { %9134 = vmatmul.mubr.msk.bf16.gmra.mxu0 %vm586_vm1, %v9679_v37  ;;  %9147 = vmatmul.mubr.msk.bf16.gmra.mxu1 %vm586_vm1, %v9680_v38  ;;  %v1260_v37 = vrot.slane %v1258_v34, 1  ;;  %v1266_v38 = vshll.u32 %v9701_v31, 16  ;;  %v9714_v34 = vld [vmem:[%s10049_s18 + $0x58] sm:$0xff]  }
  0x67   : > { %778 = vmatprep.mubr.bf16.mxu0 %v11913_v9  ;;  %908 = vmatprep.mubr.bf16.mxu1 %v11913_v9 }
  0x6e   : > { %9135 = vmatmul.mubr.msk.bf16.gmra.mxu0 %vm586_vm1, %v9681_v39  ;;  %9148 = vmatmul.mubr.msk.bf16.gmra.mxu1 %vm586_vm1, %v9682_v40  ;;  %v1262_v39 = vshrl.u32 %v9699_v26, 16  ;;  %v1261_v40 = vsel %vm1209_vm2, %v1256_v36, %v1260_v37  ;;  %v10228_v26 = vld.sshfl [vmem:[%s10040_s14 + $0x14] sm:$0x33 pattern:$0x76325410]  ;;  %v2249_v36 = vsel %vm2228_vm3, %v2246_v19, %v2248_v30 }
  0x6f   : > { %788 = vmatprep.mubr.bf16.mxu0 %v11913_v9  ;;  %918 = vmatprep.mubr.bf16.mxu1 %v11913_v9  ;;  %v4993_v27 = vcombine.high %v10228_v26, %v10228_v26 }
  0x70   : > { %v1264_v44 = vor.u32 %v1262_v39, %v1260_v37  ;;  %v1310_v37 = vshrl.u32 %v9711_v16, 16 }
  0x76   : > { %9136 = vmatmul.mubr.msk.bf16.gmra.mxu0 %vm586_vm1, %v9683_v41  ;;  %9149 = vmatmul.mubr.msk.bf16.gmra.mxu1 %vm586_vm1, %v9684_v42  ;;  %v2237_v41 = vsel %vm2228_vm3, %v2234_v25, %v2236_v35  ;;  %v1268_v42 = vrot.slane %v1266_v38, 1  ;;  %v9713_v25 = vld [vmem:[%s10049_s18 + $0x68] sm:$0xff]   ;;  %v9715_v38 = vld [vmem:[%s10049_s18 + $0x70] sm:$0xff]  }
  0x77   : > { %798 = vmatprep.mubr.bf16.mxu0 %v11913_v9  ;;  %928 = vmatprep.mubr.bf16.mxu1 %v11913_v9  ;;  %v1318_v45 = vshrl.u32 %v9713_v25, 16 }
  0x78   : > { %v1269_v50 = vsel %vm1209_vm2, %v1264_v44, %v1268_v42 }
  0x7e   : > { %9137 = vmatmul.mubr.msk.bf16.gmra.mxu0 %vm586_vm1, %v9685_v46  ;;  %9150 = vmatmul.mubr.msk.bf16.gmra.mxu1 %vm586_vm1, %v9686_v47  ;;  %v9703_v46 = vld [vmem:[%s10049_s18 + $0x40] sm:$0xff]   ;;  %v1270_v47 = vshrl.u32 %v9701_v31, 16  ;;  %v10237_v31 = vld.sshfl [vmem:[%s10040_s14 + $0x18] sm:$0x33 pattern:$0x76325410] }
  0x7f   : > { %808 = vmatprep.mubr.bf16.mxu0 %v11913_v9  ;;  %1525 = vmatprep.mubr.bf16.mxu1 %v11913_v9  ;;  %v1274_v52 = vshll.u32 %v9703_v46, 16 }
  0x81   : > { %v1276_v55 = vrot.slane %v1274_v52, 1 }
  0x86   : > { %9138 = vmatmul.mubr.msk.bf16.gmra.mxu0 %vm586_vm1, %v9687_v54  ;;  %9179 = vmatmul.mubr.msk.bf16.vlgmr.msra.gmra.mxu1 %vm586_vm1, %v1221_v57  ;;  %v1272_v54 = vor.u32 %v1270_v47, %v1268_v42  ;;  %v1282_v57 = vshll.u32 %v9705_v49, 16  ;;  %v1322_v42 = vshll.u32 %v9715_v38, 16 }
  0x87   : > { %818 = vmatprep.mubr.bf16.mxu0 %v11913_v9  ;;  %1535 = vmatprep.mubr.bf16.mxu1 %v11913_v9 }
  0x88   : > { %3198 = vmatpush1.bf16.msra.mxu1 %v3178_v59  ;;  %v1278_v59 = vshrl.u32 %v9703_v46, 16  ;;  %v1277_v61 = vsel %vm1209_vm2, %v1272_v54, %v1276_v55  ;;  %v1284_v63 = vrot.slane %v1282_v57, 1  ;;  %v9716_v46 = vld [vmem:[%s10049_s18 + $0x60] sm:$0xff]   ;;  %v1324_v47 = vrot.slane %v1322_v42, 1 }
  0x89   : > { %9385 = vmatprep.subr.msk.bf16.mxu1 %vm659_vm0, %v4993_v27  ;;  %v2252_v49 = vrot.slane %v9716_v46, 1 }
  0x8a   : > { %v1280_v2 = vor.u32 %v1278_v59, %v1276_v55  ;;  %v1288_v10 = vor.u32 %v1286_v5, %v1284_v63  ;;  %v9718_v55 = vld [vmem:[%s10049_s18 + $0x68] sm:$0xff]  }
  0x8c   : > { %v1293_v12 = vsel %vm1209_vm2, %v1288_v10, %v1292_v6 }
  0x8e   : > { %9139 = vmatmul.mubr.msk.bf16.gmra.mxu0 %vm586_vm1, %v9690_v1  ;;  %9180 = vmatmul.mubr.msk.bf16.gmra.mxu1 %vm586_vm1, %v1229_v3  ;;  %v9708_v1 = vld [vmem:[%s10049_s18 + $0x40] sm:$0xff]   ;;  %v1285_v3 = vsel %vm1209_vm2, %v1280_v2, %v1284_v63 }
  0x8f   : > { %1545 = vmatprep.mubr.bf16.mxu1 %v11913_v9  ;;  %2397 = vmatprep.mubr.bf16.mxu0 %v11913_v9  ;;  %v2244_v7 = vrot.slane %v9708_v1, 1 }
  0x96   : > { %9181 = vmatmul.mubr.msk.bf16.gmra.mxu1 %vm586_vm1, %v1237_v13  ;;  %9231 = vmatmul.mubr.msk.bf16.vlgmr.msra.gmra.mxu0 %vm586_vm1, %v2231_v14  ;;  %v2245_v13 = vsel %vm2228_vm3, %v2242_v60, %v2244_v7  ;;  %v1298_v14 = vshll.u32 %v9709_v8, 16  ;;  %v2254_v60 = vrot.slane %v9718_v55, 1 }
  0x97   : > { %4216 = vmatpush1.bf16.msra.mxu0 %v4196_v11  ;;  %1555 = vmatprep.mubr.bf16.mxu1 %v11913_v9  ;;  %v1294_v11 = vshrl.u32 %v9707_v58, 16 }
  0x98   : > { %2407 = vmatprep.mubr.bf16.mxu0 %v11913_v9  ;;  %v1300_v18 = vrot.slane %v1298_v14, 1 }
  0x99   : > { %v1296_v17 = vor.u32 %v1294_v11, %v1292_v6  ;;  %v9720_v6 = vld [vmem:[%s10049_s18 + $0x70] sm:$0xff]  }
  0x9a   : > { %v1304_v28 = vor.u32 %v1302_v20, %v1300_v18  ;;  %v2256_v14 = vrot.slane %v9720_v6, 1 }
  0x9b   : > { %v1301_v21 = vsel %vm1209_vm2, %v1296_v17, %v1300_v18 }
  0x9e   : > { %9182 = vmatmul.mubr.msk.bf16.gmra.mxu1 %vm586_vm1, %v1245_v22  ;;  %9232 = vmatmul.mubr.msk.bf16.gmra.mxu0 %vm586_vm1, %v2233_v23  ;;  %v2247_v22 = vsel %vm2228_vm3, %v2244_v7, %v2246_v19  ;;  %v1306_v23 = vshll.u32 %v9711_v16, 16 }
  0x9f   : > { %1565 = vmatprep.mubr.bf16.mxu1 %v11913_v9  ;;  %2417 = vmatprep.mubr.bf16.mxu0 %v11913_v9 }
  0xa0   : > { %v1308_v29 = vrot.slane %v1306_v23, 1  ;;  %v1346_v23 = vshll.u32 %v9721_v15, 16 }
  0xa2   : > { %v1309_v35 = vsel %vm1209_vm2, %v1304_v28, %v1308_v29 }
  0xa6   : > { %9183 = vmatmul.mubr.msk.bf16.gmra.mxu1 %vm586_vm1, %v1253_v32  ;;  %9233 = vmatmul.mubr.msk.bf16.gmra.mxu0 %vm586_vm1, %v2235_v33  ;;  %v1314_v32 = vshll.u32 %v9713_v25, 16  ;;  %v5811_v33 = vcombine.high %v10237_v31, %v10237_v31 }
  0xa7   : > { %1575 = vmatprep.mubr.bf16.mxu1 %v11913_v9  ;;  %2427 = vmatprep.mubr.bf16.mxu0 %v11913_v9 }
  0xa8   : > { %9436 = vmatprep.subr.msk.bf16.mxu0 %vm659_vm0, %v5811_v33  ;;  %v1316_v39 = vrot.slane %v1314_v32, 1  ;;  %v1348_v32 = vrot.slane %v1346_v23, 1  ;;  %v2258_v33 = vrot.slane %v9722_v24, 1  ;;  %v9728_v23 = vld [vmem:[%s10049_s18 + $0x90] sm:$0xff]  }
  0xaa   : > { %v1320_v48 = vor.u32 %v1318_v45, %v1316_v39 }
  0xac   : > { %v1325_v52 = vsel %vm1209_vm2, %v1320_v48, %v1324_v47 }
  0xae   : > { %9184 = vmatmul.mubr.msk.bf16.gmra.mxu1 %vm586_vm1, %v1261_v40  ;;  %9234 = vmatmul.mubr.msk.bf16.gmra.mxu0 %vm586_vm1, %v2237_v41  ;;  %v1312_v40 = vor.u32 %v1310_v37, %v1308_v29  ;;  %v2250_v41 = vrot.slane %v9714_v34, 1  ;;  %v9723_v34 = vld [vmem:[%s10049_s18 + $0x90] sm:$0xff]  }
  0xaf   : > { %1585 = vmatprep.mubr.bf16.mxu1 %v11913_v9  ;;  %2437 = vmatprep.mubr.bf16.mxu0 %v11913_v9  ;;  %v1354_v42 = vshll.u32 %v9723_v34, 16 }
  0xb0   : > { %v1317_v43 = vsel %vm1209_vm2, %v1312_v40, %v1316_v39  ;;  %v2251_v44 = vsel %vm2228_vm3, %v2248_v30, %v2250_v41  ;;  %v2253_v53 = vsel %vm2228_vm3, %v2250_v41, %v2252_v49  ;;  %v1350_v40 = vshrl.u32 %v9721_v15, 16 }
  0xb1   : > { %v2259_v41 = vsel %vm2228_vm3, %v2256_v14, %v2258_v33 }
  0xb2   : > { %v1352_v48 = vor.u32 %v1350_v40, %v1348_v32 }
  0xb6   : > { %9185 = vmatmul.mubr.msk.bf16.gmra.mxu1 %vm586_vm1, %v1269_v50  ;;  %9235 = vmatmul.mubr.msk.bf16.gmra.mxu0 %vm586_vm1, %v2239_v51  ;;  %v9717_v50 = vld [vmem:[%s10049_s18 + $0x78] sm:$0xff]   ;;  %v1326_v51 = vshrl.u32 %v9715_v38, 16 }
  0xb7   : > { %1595 = vmatprep.mubr.bf16.mxu1 %v11913_v9  ;;  %2447 = vmatprep.mubr.bf16.mxu0 %v11913_v9  ;;  %v1330_v54 = vshll.u32 %v9717_v50, 16 }
  0xb8   : > { %v1328_v58 = vor.u32 %v1326_v51, %v1324_v47  ;;  %v9725_v51 = vld [vmem:[%s10049_s18 + $0x98] sm:$0xff]  }
  0xb9   : > { %v1332_v59 = vrot.slane %v1330_v54, 1 }
  0xbb   : > { %v1333_v2 = vsel %vm1209_vm2, %v1328_v58, %v1332_v59 }
  0xbe   : > { %9186 = vmatmul.mubr.msk.bf16.gmra.mxu1 %vm586_vm1, %v1277_v61  ;;  %9236 = vmatmul.mubr.msk.bf16.gmra.mxu0 %vm586_vm1, %v2241_v62  ;;  %v9719_v61 = vld [vmem:[%s10049_s18 + $0x80] sm:$0xff]  }
  0xbf   : > { %1605 = vmatprep.mubr.bf16.mxu1 %v11913_v9  ;;  %2457 = vmatprep.mubr.bf16.mxu0 %v11913_v9  ;;  %v1338_v5 = vshll.u32 %v9719_v61, 16 }
  0xc6   : > { %9187 = vmatmul.mubr.msk.bf16.gmra.mxu1 %vm586_vm1, %v1285_v3  ;;  %9237 = vmatmul.mubr.msk.bf16.gmra.mxu0 %vm586_vm1, %v2243_v4  ;;  %v2255_v3 = vsel %vm2228_vm3, %v2252_v49, %v2254_v60  ;;  %v1334_v4 = vshrl.u32 %v9717_v50, 16  ;;  %v1356_v49 = vrot.slane %v1354_v42, 1 }
  0xc7   : > { %1615 = vmatprep.mubr.bf16.mxu1 %v11913_v9  ;;  %2467 = vmatprep.mubr.bf16.mxu0 %v11913_v9 }
  0xce   : > { %9188 = vmatmul.mubr.msk.bf16.gmra.mxu1 %vm586_vm1, %v1293_v12  ;;  %9238 = vmatmul.mubr.msk.bf16.gmra.mxu0 %vm586_vm1, %v2245_v13  ;;  %v1336_v12 = vor.u32 %v1334_v4, %v1332_v59  ;;  %v1340_v13 = vrot.slane %v1338_v5, 1  ;;  %v1358_v59 = vshrl.u32 %v9723_v34, 16 }
  0xcf   : > { %1625 = vmatprep.mubr.bf16.mxu1 %v11913_v9  ;;  %2477 = vmatprep.mubr.bf16.mxu0 %v11913_v9 }
  0xd0   : > { %v1341_v20 = vsel %vm1209_vm2, %v1336_v12, %v1340_v13  ;;  %v1360_v5 = vor.u32 %v1358_v59, %v1356_v49  ;;  %v9727_v12 = vld [vmem:[%s10049_s18 + $0xa0] sm:$0xff]  }
  0xd6   : > { %9189 = vmatmul.mubr.msk.bf16.gmra.mxu1 %vm586_vm1, %v1301_v21  ;;  %9239 = vmatmul.mubr.msk.bf16.gmra.mxu0 %vm586_vm1, %v2247_v22  ;;  %v2257_v21 = vsel %vm2228_vm3, %v2254_v60, %v2256_v14  ;;  %v1342_v22 = vshrl.u32 %v9719_v61, 16  ;;  %v1362_v60 = vshll.u32 %v9725_v51, 16  ;;  %v9726_v61 = vld [vmem:[%s10049_s18 + $0x88] sm:$0xff]  }
  0xd7   : > { %1635 = vmatprep.mubr.bf16.mxu1 %v11913_v9  ;;  %2487 = vmatprep.mubr.bf16.mxu0 %v11913_v9 }
  0xd8   : > { %v1344_v30 = vor.u32 %v1342_v22, %v1340_v13  ;;  %v1364_v6 = vrot.slane %v1362_v60, 1  ;;  %v1370_v22 = vshll.u32 %v9727_v12, 16 }
  0xda   : > { %v1349_v39 = vsel %vm1209_vm2, %v1344_v30, %v1348_v32  ;;  %v1372_v34 = vrot.slane %v1370_v22, 1 }
  0xde   : > { %9190 = vmatmul.mubr.msk.bf16.gmra.mxu1 %vm586_vm1, %v1309_v35  ;;  %9240 = vmatmul.mubr.msk.bf16.gmra.mxu0 %vm586_vm1, %v2249_v36 }
  0xdf   : > { %1645 = vmatprep.mubr.bf16.mxu1 %v11913_v9  ;;  %2497 = vmatprep.mubr.bf16.mxu0 %v11913_v9 }
  0xe6   : > { %9191 = vmatmul.mubr.msk.bf16.gmra.mxu1 %vm586_vm1, %v1317_v43  ;;  %9241 = vmatmul.mubr.msk.bf16.gmra.mxu0 %vm586_vm1, %v2251_v44  ;;  %v9724_v43 = vld [vmem:[%s10049_s18 + $0x80] sm:$0xff]  }
  0xe7   : > { %1655 = vmatprep.mubr.bf16.mxu1 %v11913_v9  ;;  %2507 = vmatprep.mubr.bf16.mxu0 %v11913_v9  ;;  %v2260_v50 = vrot.slane %v9724_v43, 1 }
  0xe9   : > { %v2261_v58 = vsel %vm2228_vm3, %v2258_v33, %v2260_v50 }
  0xee   : > { %v10262_v56 = vpop.f32.mrf.mxu0  ;;  %v830_v57 = vpop.f32.mrf.mxu1  ;;  %9192 = vmatmul.mubr.msk.bf16.gmra.mxu1 %vm586_vm1, %v1325_v52  ;;  %9242 = vmatmul.mubr.msk.bf16.gmra.mxu0 %vm586_vm1, %v2253_v53 }
  0xef   : > { %1665 = vmatprep.mubr.bf16.mxu1 %v11913_v9  ;;  %2517 = vmatprep.mubr.bf16.mxu0 %v11913_v9  ;;  %v1357_v57 = vsel %vm1209_vm2, %v1352_v48, %v1356_v49  ;;  %v1374_v48 = vshrl.u32 %v9727_v12, 16 }
  0xf0   : > { %v10269_v62 = vpop.f32.mrf.mxu0  ;;  %v832_v63 = vpop.f32.mrf.mxu1 }
  0xf1   : > { %v1376_v59 = vor.u32 %v1374_v48, %v1372_v34 }
  0xf2   : > { %v10271_v0 = vpop.f32.mrf.mxu0  ;;  %v10273_v1 = vpop.f32.mrf.mxu1 }
  0xf4   : > { %v10278_v7 = vpop.f32.mrf.mxu0  ;;  %v10280_v8 = vpop.f32.mrf.mxu1 }
  0xf6   : > { %v710_v10 = vpop.f32.mrf.mxu0  ;;  %v10282_v11 = vpop.f32.mrf.mxu1  ;;  %9193 = vmatmul.mubr.msk.bf16.gmra.mxu1 %vm586_vm1, %v1333_v2  ;;  %9243 = vmatmul.mubr.msk.bf16.gmra.mxu0 %vm586_vm1, %v2255_v3 }
  0xf7   : > { %11915 = vst [vmem:[#allocation4_spill] sm:$0xff] %v10282_v11  ;;  %1675 = vmatprep.mubr.bf16.mxu1 %v11913_v9  ;;  %2527 = vmatprep.mubr.bf16.mxu0 %v11913_v9  ;;  %v2262_v10 = vrot.slane %v9726_v61, 1 }
  0xf8   : > { %v712_v16 = vpop.f32.mrf.mxu0  ;;  %v10289_v17 = vpop.f32.mrf.mxu1 }
  0xf9   : > { %11916 = vst [vmem:[#allocation5_spill] sm:$0xff] %v10289_v17  ;;  %v9744_v17 = vld [vmem:[%s10049_s18 + $0x24] sm:$0xff]  }
  0xfa   : > { %v10291_v18 = vpop.f32.mrf.mxu0  ;;  %v844_v19 = vpop.f32.mrf.mxu1 }
  0xfb   : > { %v1365_v19 = vsel %vm1209_vm2, %v1360_v5, %v1364_v6 }
  0xfc   : > { %v10296_v25 = vpop.f32.mrf.mxu0  ;;  %v846_v27 = vpop.f32.mrf.mxu1 }
  0xfe   : > { %v10298_v28 = vpop.f32.mrf.mxu0  ;;  %v10300_v29 = vpop.f32.mrf.mxu1  ;;  %9194 = vmatmul.mubr.msk.bf16.gmra.mxu1 %vm586_vm1, %v1341_v20  ;;  %9244 = vmatmul.mubr.msk.bf16.gmra.mxu0 %vm586_vm1, %v2257_v21  ;;  %v2263_v20 = vsel %vm2228_vm3, %v2260_v50, %v2262_v10  ;;  %v1366_v21 = vshrl.u32 %v9725_v51, 16  ;;  %v9730_v50 = vld [vmem:[%s10049_s18 + $0x98] sm:$0xff]  }
  0xff   : > { %11917 = vst [vmem:[#allocation6_spill] sm:$0xff] %v10300_v29  ;;  %1685 = vmatprep.mubr.bf16.mxu1 %v11913_v9  ;;  %2537 = vmatprep.mubr.bf16.mxu0 %v11913_v9  ;;  %v2266_v61 = vrot.slane %v9730_v50, 1 }
 0x100   : > { %v10307_v35 = vpop.f32.mrf.mxu0  ;;  %v10309_v36 = vpop.f32.mrf.mxu1  ;;  %v1368_v33 = vor.u32 %v1366_v21, %v1364_v6  ;;  %v9732_v21 = vld [vmem:[%s10049_s18 + $0xa0] sm:$0xff]  }
 0x101   : > { %11918 = vst [vmem:[#allocation7_spill] sm:$0xff] %v10309_v36 }
 0x102   : > { %v724_v37 = vpop.f32.mrf.mxu0  ;;  %v10311_v38 = vpop.f32.mrf.mxu1 }
 0x103   : > { %11919 = vst [vmem:[#allocation8_spill] sm:$0xff] %v10311_v38  ;;  %v2264_v37 = vrot.slane %v9728_v23, 1 }
 0x104   : > { %v726_v44 = vpop.f32.mrf.mxu0  ;;  %v10316_v45 = vpop.f32.mrf.mxu1 }
 0x105   : > { %11920 = vst [vmem:[#allocation9_spill] sm:$0xff] %v10316_v45  ;;  %v1373_v44 = vsel %vm1209_vm2, %v1368_v33, %v1372_v34 }
 0x106   : > { %v10318_v46 = vpop.f32.mrf.mxu0  ;;  %v860_v47 = vpop.f32.mrf.mxu1  ;;  %9195 = vmatmul.mubr.msk.bf16.gmra.mxu1 %vm586_vm1, %v1349_v39  ;;  %9245 = vmatmul.mubr.msk.bf16.gmra.mxu0 %vm586_vm1, %v2259_v41  ;;  %v9729_v39 = vld [vmem:[%s10049_s18 + $0xa8] sm:$0xff]  }
 0x107   : > { %1695 = vmatprep.mubr.bf16.mxu1 %v11913_v9  ;;  %2547 = vmatprep.mubr.bf16.mxu0 %v11913_v9  ;;  %v2265_v47 = vsel %vm2228_vm3, %v2262_v10, %v2264_v37  ;;  %v1378_v49 = vshll.u32 %v9729_v39, 16 }
 0x108   : > { %v10325_v52 = vpop.f32.mrf.mxu0  ;;  %v862_v53 = vpop.f32.mrf.mxu1 }
 0x109   : > { %v1380_v60 = vrot.slane %v1378_v49, 1 }
 0x10a   : > { %v10327_v54 = vpop.f32.mrf.mxu0  ;;  %v10329_v55 = vpop.f32.mrf.mxu1 }
 0x10b   : > { %11921 = vst [vmem:[#allocation10_spill] sm:$0xff] %v10329_v55 }
 0x10c   : > { %v10334_v63 = vpop.f32.mrf.mxu0  ;;  %v10336_v2 = vpop.f32.mrf.mxu1 }
 0x10d   : > { %11922 = vst [vmem:[#allocation11_spill] sm:$0xff] %v10336_v2 }
 0x10e   : > { %v740_v3 = vpop.f32.mrf.mxu0  ;;  %v10338_v4 = vpop.f32.mrf.mxu1  ;;  %9196 = vmatmul.mubr.msk.bf16.gmra.mxu1 %vm586_vm1, %v1357_v57  ;;  %9246 = vmatmul.mubr.msk.bf16.gmra.mxu0 %vm586_vm1, %v2261_v58 }
 0x10f   : > { %11923 = vst [vmem:[#allocation12_spill] sm:$0xff] %v10338_v4  ;;  %1705 = vmatprep.mubr.bf16.mxu1 %v11913_v9  ;;  %2557 = vmatprep.mubr.bf16.mxu0 %v11913_v9  ;;  %v9731_v3 = vld [vmem:[%s10049_s18 + $0xb0] sm:$0xff]   ;;  %v9741_v4 = vld [vmem:[%s10049_s18 + $0x1c] sm:$0xff]  }
 0x110   : > { %v742_v13 = vpop.f32.mrf.mxu0  ;;  %v10345_v14 = vpop.f32.mrf.mxu1 }
 0x111   : > { %11924 = vst [vmem:[#allocation13_spill] sm:$0xff] %v10345_v14  ;;  %v1381_v13 = vsel %vm1209_vm2, %v1376_v59, %v1380_v60 }
 0x112   : > { %v10347_v15 = vpop.f32.mrf.mxu0  ;;  %v874_v16 = vpop.f32.mrf.mxu1 }
 0x113   : > { %v2267_v16 = vsel %vm2228_vm3, %v2264_v37, %v2266_v61 }
 0x114   : > { %v10352_v24 = vpop.f32.mrf.mxu0  ;;  %v876_v27 = vpop.f32.mrf.mxu1 }
 0x116   : > { %v10354_v30 = vpop.f32.mrf.mxu0  ;;  %v10356_v32 = vpop.f32.mrf.mxu1  ;;  %9197 = vmatmul.mubr.msk.bf16.gmra.mxu1 %vm586_vm1, %v1365_v19  ;;  %9247 = vmatmul.mubr.msk.bf16.gmra.mxu0 %vm586_vm1, %v2263_v20  ;;  %v1382_v19 = vshrl.u32 %v9729_v39, 16  ;;  %v1386_v20 = vshll.u32 %v9731_v3, 16  ;;  %v2268_v39 = vrot.slane %v9732_v21, 1  ;;  %v9735_v21 = vld [vmem:[%s10049_s18 + $0xc0] ss:$0 sps:$4 sm:$0x11]  }
 0x117   : > { %11925 = vst [vmem:[#allocation14_spill] sm:$0xff] %v10356_v32  ;;  %1715 = vmatprep.mubr.bf16.mxu1 %v11913_v9  ;;  %2567 = vmatprep.mubr.bf16.mxu0 %v11913_v9 }
 0x118   : > { %v10363_v40 = vpop.f32.mrf.mxu0  ;;  %v10365_v41 = vpop.f32.mrf.mxu1  ;;  %v1384_v34 = vor.u32 %v1382_v19, %v1380_v60  ;;  %v1388_v37 = vrot.slane %v1386_v20, 1 }
 0x119   : > { %11926 = vst [vmem:[#allocation15_spill] sm:$0xff] %v10365_v41 }
 0x11a   : > { %v754_v42 = vpop.f32.mrf.mxu0  ;;  %v10367_v43 = vpop.f32.mrf.mxu1  ;;  %v1389_v50 = vsel %vm1209_vm2, %v1384_v34, %v1388_v37 }
 0x11b   : > { %11927 = vst [vmem:[#allocation16_spill] sm:$0xff] %v10367_v43  ;;  %v9733_v42 = vld [vmem:[%s10049_s18 + $0xb8] sm:$0xff]  }
 0x11c   : > { %v756_v51 = vpop.f32.mrf.mxu0  ;;  %v10372_v53 = vpop.f32.mrf.mxu1  ;;  %v1394_v59 = vshll.u32 %v9733_v42, 16 }
 0x11d   : > { %11928 = vst [vmem:[#allocation17_spill] sm:$0xff] %v10372_v53  ;;  %v2269_v51 = vsel %vm2228_vm3, %v2266_v61, %v2268_v39 }
 0x11e   : > { %v10374_v57 = vpop.f32.mrf.mxu0  ;;  %v890_v58 = vpop.f32.mrf.mxu1  ;;  %9198 = vmatmul.mubr.msk.bf16.gmra.mxu1 %vm586_vm1, %v1373_v44  ;;  %9248 = vmatmul.mubr.msk.bf16.gmra.mxu0 %vm586_vm1, %v2265_v47 }
 0x11f   : > { %1725 = vmatprep.mubr.bf16.mxu1 %v11913_v9  ;;  %2577 = vmatprep.mubr.bf16.mxu0 %v11913_v9  ;;  %v1390_v58 = vshrl.u32 %v9731_v3, 16  ;;  %v1396_v3 = vrot.slane %v1394_v59, 1  ;;  %v11937_v59 = vmov 0  }
 0x120   : > { %v10381_v5 = vpop.f32.mrf.mxu0  ;;  %v892_v6 = vpop.f32.mrf.mxu1 }
 0x121   : > { %v9734_v6 = vld [vmem:[%s10049_s18 + $0xa8] sm:$0xff]   ;;  %v1392_v61 = vor.u32 %v1390_v58, %v1388_v37 }
 0x122   : > { %v10383_v10 = vpop.f32.mrf.mxu0  ;;  %v10385_v12 = vpop.f32.mrf.mxu1  ;;  %v2270_v20 = vrot.slane %v9734_v6, 1 }
 0x123   : > { %11929 = vst [vmem:[#allocation18_spill] sm:$0xff] %v10385_v12  ;;  %v9740_v12 = vld [vmem:[%s10049_s18 + $0x14] sm:$0xff]  }
 0x124   : > { %v10390_v22 = vpop.f32.mrf.mxu0  ;;  %v10392_v23 = vpop.f32.mrf.mxu1 }
 0x125   : > { %11930 = vst [vmem:[#allocation19_spill] sm:$0xff] %v10392_v23 }
 0x126   : > { %v770_v27 = vpop.f32.mrf.mxu0  ;;  %v10394_v33 = vpop.f32.mrf.mxu1  ;;  %9199 = vmatmul.mubr.msk.bf16.gmra.mxu1 %vm586_vm1, %v1381_v13  ;;  %9249 = vmatmul.mubr.msk.bf16.gmra.mxu0 %vm586_vm1, %v2267_v16 }
 0x127   : > { %11931 = vst [vmem:[#allocation20_spill] sm:$0xff] %v10394_v33  ;;  %1735 = vmatprep.mubr.bf16.mxu1 %v11913_v9  ;;  %2587 = vmatprep.mubr.bf16.mxu0 %v11913_v9 }
 0x128   : > { %v772_v44 = vpop.f32.mrf.mxu0  ;;  %v10401_v47 = vpop.f32.mrf.mxu1 }
 0x129   : > { %11932 = vst [vmem:[#allocation21_spill] sm:$0xff] %v10401_v47  ;;  %v9736_v47 = vld [vmem:[%s10049_s18 + $0xb0] sm:$0xff]  }
 0x12a   : > { %v10403_v48 = vpop.f32.mrf.mxu0  ;;  %v904_v49 = vpop.f32.mrf.mxu1 }
 0x12c   : > { %v10408_v13 = vpop.f32.mrf.mxu0  ;;  %v906_v60 = vpop.f32.mrf.mxu1 }
 0x12d   : > { %v2271_v60 = vsel %vm2228_vm3, %v2268_v39, %v2270_v20 }
 0x12e   : > { %v10410_v16 = vpop.f32.mrf.mxu0  ;;  %v10412_v19 = vpop.f32.mrf.mxu1  ;;  %9200 = vmatmul.mubr.msk.bf16.gmra.mxu1 %vm586_vm1, %v1389_v50  ;;  %9250 = vmatmul.mubr.msk.bf16.gmra.mxu0 %vm586_vm1, %v2269_v51  ;;  %v1397_v50 = vsel %vm1209_vm2, %v1392_v61, %v1396_v3  ;;  %v1398_v51 = vshrl.u32 %v9733_v42, 16  ;;  %v2272_v42 = vrot.slane %v9736_v47, 1 }
 0x12f   : > { %11933 = vst [vmem:[#allocation22_spill] sm:$0xff] %v10412_v19  ;;  %1745 = vmatprep.mubr.bf16.mxu1 %v11913_v9  ;;  %2597 = vmatprep.mubr.bf16.mxu0 %v11913_v9  ;;  %v1402_v19 = vshll.u32 %v9735_v21, 16 }
 0x130   : > { %v10419_v27 = vpop.f32.mrf.mxu0  ;;  %v10421_v34 = vpop.f32.mrf.mxu1  ;;  %v1400_v6 = vor.u32 %v1398_v51, %v1396_v3 }
 0x131   : > { %11934 = vst [vmem:[#allocation23_spill] sm:$0xff] %v10421_v34  ;;  %v1404_v39 = vrot.slane %v1402_v19, 1 }
 0x132   : > { %v784_v44 = vpop.f32.mrf.mxu0  ;;  %v10423_v49 = vpop.f32.mrf.mxu1 }
 0x133   : > { %11935 = vst [vmem:[#allocation24_spill] sm:$0xff] %v10423_v49  ;;  %v5067_v49 = vsel %vm659_vm0, %v10228_v26, 0 }
 0x134   : > { %v786_v33 = vpop.f32.mrf.mxu0  ;;  %v10428_v9 = vpop.f32.mrf.mxu1 }
 0x135   : > { %11936 = vst [vmem:[#allocation25_spill] sm:$0xff] %v10428_v9 }
 0x136   : > { %v10430_v37 = vpop.f32.mrf.mxu0  ;;  %v920_v58 = vpop.f32.mrf.mxu1  ;;  %9201 = vmatmul.mubr.msk.bf16.gmra.mxu1 %vm586_vm1, %v1397_v50  ;;  %9251 = vmatmul.mubr.msk.bf16.gmra.mxu0 %vm586_vm1, %v2271_v60  ;;  %v2273_v50 = vsel %vm2228_vm3, %v2270_v20, %v2272_v42  ;;  %v9737_v60 = vld [vmem:[%s10049_s18 + $0xb8] sm:$0xff]  }
 0x137   : > { %1755 = vmatprep.mubr.bf16.mxu1 %v11937_v59  ;;  %2607 = vmatprep.mubr.bf16.mxu0 %v11937_v59  ;;  %v1405_v58 = vsel %vm1209_vm2, %v1400_v6, %v1404_v39  ;;  %v2274_v51 = vrot.slane %v9737_v60, 1 }
 0x138   : > { %v10436_v61 = vpop.f32.mrf.mxu0  ;;  %v922_v33 = vpop.f32.mrf.mxu1 }
 0x13a   : > { %v10438_v21 = vpop.f32.mrf.mxu0  ;;  %v10440_v44 = vpop.f32.mrf.mxu1 }
 0x13b   : > { %11938 = vst [vmem:[#allocation26_spill] sm:$0xff] %v10440_v44  ;;  %v9742_v44 = vld [vmem:[%s10049_s18 + $0xc] sm:$0xff]  }
 0x13c   : > { %v10445_v9 = vpop.f32.mrf.mxu0  ;;  %v10447_v3 = vpop.f32.mrf.mxu1 }
 0x13d   : > { %11939 = vst [vmem:[#allocation27_spill] sm:$0xff] %v10447_v3  ;;  %v9738_v3 = vld [vmem:[%s10049_s18 + $0xc] sm:$0xff]  }
 0x13e   : > { %v800_v47 = vpop.f32.mrf.mxu0  ;;  %v10449_v19 = vpop.f32.mrf.mxu1  ;;  %9202 = vmatmul.mubr.msk.bf16.gmra.mxu1 %vm586_vm1, %v1405_v58  ;;  %9252 = vmatmul.mubr.msk.bf16.gmra.mxu0 %vm586_vm1, %v2273_v50 }
 0x13f   : > { %11940 = vst [vmem:[#allocation28_spill] sm:$0xff] %v10449_v19  ;;  %2617 = vmatprep.mubr.bf16.mxu0 %v11937_v59  ;;  %3215 = vmatprep.mubr.bf16.mxu1 %v11937_v59  ;;  %v2275_v47 = vsel %vm2228_vm3, %v2272_v42, %v2274_v51  ;;  %v9739_v19 = vld [vmem:[%s10049_s18 + $0xc0] ss:$0 sps:$4 sm:$0x11]  }
 0x140   : > { %v802_v20 = vpop.f32.mrf.mxu0  ;;  %v10455_v6 = vpop.f32.mrf.mxu1  ;;  %v2276_v42 = vrot.slane %v9739_v19, 1 }
 0x141   : > { %11941 = vst [vmem:[#allocation29_spill] sm:$0xff] %v10455_v6  ;;  %v3921_v6 = vshll.u32 %v9742_v44, 16 }
 0x142   : > { %v10457_v39 = vpop.f32.mrf.mxu0  ;;  %v934_v33 = vpop.f32.mrf.mxu1  ;;  %v2277_v53 = vsel %vm2228_vm3, %v2274_v51, %v2276_v42  ;;  %v9745_v51 = vld [vmem:[%s10049_s18 + $0x1c] sm:$0xff]  }
 0x143   : > { %v9743_v33 = vld [vmem:[%s10049_s18 + $0x14] sm:$0xff]   ;;  %v3923_v43 = vrot.slane %v3921_v6, 1  ;;  %v3934_v2 = vshll.u32 %v9745_v51, 16  ;;  %v3938_v11 = vshrl.u32 %v9745_v51, 16 }
 0x144   : > { %v10463_v58 = vpop.f32.mrf.mxu0  ;;  %v936_v50 = vpop.f32.mrf.mxu1 }
 0x145   : > { %v3936_v36 = vrot.slane %v3934_v2, 1 }
 0x146   : > { %v10467_v60 = vpop.f32.mrf.mxu0  ;;  %v1527_v20 = vpop.f32.mrf.mxu1  ;;  %9253 = vmatmul.mubr.msk.bf16.gmra.mxu0 %vm586_vm1, %v2275_v47  ;;  %9282 = vmatmul.mubr.msk.bf16.vlgmr.msra.gmra.mxu1 %vm586_vm1, %v9738_v3  ;;  %v3919_v47 = vshrl.u32 %v9742_v44, 16  ;;  %v3926_v3 = vshll.u32 %v9743_v33, 16 }
 0x147   : > { %2627 = vmatprep.mubr.bf16.mxu0 %v11937_v59  ;;  %3225 = vmatprep.mubr.bf16.mxu1 %v11937_v59 }
 0x148   : > { %v10474_v34 = vpop.f32.mrf.mxu0  ;;  %v1529_v50 = vpop.f32.mrf.mxu1  ;;  %5087 = vmatpush1.bf16.msra.mxu1 %v5067_v49  ;;  %v3928_v49 = vrot.slane %v3926_v3, 1 }
 0x14a   : > { %v814_v23 = vpop.f32.mrf.mxu0  ;;  %v1531_v26 = vpop.f32.mrf.mxu1 }
 0x14b   : > { %v3924_v23 = vor.u32 %v3923_v43, %v3919_v47  ;;  %v5885_v43 = vsel %vm659_vm0, %v10237_v31, 0  ;;  %v1862_v47 = vadd.f32 %v1527_v20, %v10262_v56  ;;  %v1864_v56 = vadd.f32 %v1531_v26, %v10271_v0 }
 0x14c   : > { %v816_v41 = vpop.f32.mrf.mxu0  ;;  %v1533_v32 = vpop.f32.mrf.mxu1  ;;  %v3940_v26 = vor.u32 %v3938_v11, %v3936_v36 }
 0x14e   : > { %v10478_v14 = vpop.f32.mrf.mxu0  ;;  %v1537_v19 = vpop.f32.mrf.mxu1  ;;  %9254 = vmatmul.mubr.msk.bf16.gmra.mxu0 %vm586_vm1, %v2277_v53  ;;  %9283 = vmatmul.mubr.msk.bf16.gmra.mxu1 %vm586_vm1, %v9740_v12  ;;  %v3930_v53 = vshrl.u32 %v9743_v33, 16 }
 0x14f   : > { %3235 = vmatprep.mubr.bf16.mxu1 %v11937_v59  ;;  %4233 = vmatprep.mubr.bf16.mxu0 %v11937_v59  ;;  %v3929_v19 = vsel %vm1209_vm2, %v3924_v23, %v3928_v49  ;;  %v1863_v23 = vadd.f32 %v1529_v50, %v10269_v62 }
 0x150   : > { %v10485_v44 = vpop.f32.mrf.mxu0  ;;  %v1539_v6 = vpop.f32.mrf.mxu1  ;;  %v3932_v38 = vor.u32 %v3930_v53, %v3928_v49 }
 0x151   : > { %v9747_v6 = vld [vmem:[%s10049_s18 + $0x24] sm:$0xff]  }
 0x152   : > { %v10487_v41 = vpop.f32.mrf.mxu0  ;;  %v1541_v42 = vpop.f32.mrf.mxu1  ;;  %v3942_v62 = vshll.u32 %v9747_v6, 16  ;;  %v3937_v2 = vsel %vm1209_vm2, %v3932_v38, %v3936_v36  ;;  %v3946_v11 = vshrl.u32 %v9747_v6, 16 }
 0x154   : > { %v10491_v12 = vpop.f32.mrf.mxu0  ;;  %v1543_v55 = vpop.f32.mrf.mxu1  ;;  %v3944_v51 = vrot.slane %v3942_v62, 1 }
 0x156   : > { %v1547_v3 = vpop.f32.mrf.mxu1  ;;  %v2399_v45 = vpop.f32.mrf.mxu0  ;;  %9284 = vmatmul.mubr.msk.bf16.gmra.mxu1 %vm586_vm1, %v9741_v4  ;;  %9334 = vmatmul.mubr.msk.bf16.vlgmr.msra.gmra.mxu0 %vm586_vm1, %v3929_v19 }
 0x157   : > { %v10500_v33 = vadd.f32 %v2399_v45, %v1862_v47  ;;  %5905 = vmatpush1.bf16.msra.mxu0 %v5885_v43  ;;  %3245 = vmatprep.mubr.bf16.mxu1 %v11937_v59  ;;  %v1865_v45 = vadd.f32 %v1533_v32, %v10278_v7  ;;  %v9749_v7 = vld [vmem:[%s10049_s18 + $0x2c] sm:$0xff]   ;;  %v1868_v47 = vadd.f32 %v1541_v42, %v10291_v18 }
 0x158   : > { %v1549_v31 = vpop.f32.mrf.mxu1  ;;  %v2401_v29 = vpop.f32.mrf.mxu0  ;;  %4243 = vmatprep.mubr.bf16.mxu0 %v11937_v59  ;;  %v3950_v36 = vshll.u32 %v9749_v7, 16  ;;  %v3948_v42 = vor.u32 %v3946_v11, %v3944_v51  ;;  %v9753_v11 = vld [vmem:[%s10049_s18 + $0x3c] sm:$0xff]  }
 0x159   : > { %v10505_v4 = vadd.f32 %v2401_v29, %v1863_v23 }
 0x15a   : > { %v1551_v20 = vpop.f32.mrf.mxu1  ;;  %v2403_v19 = vpop.f32.mrf.mxu0  ;;  %v3952_v6 = vrot.slane %v3950_v36, 1 }
 0x15b   : > { %v10509_v50 = vadd.f32 %v2403_v19, %v1864_v56  ;;  %v9746_v20 = vld [vmem:[%s10049_s18 + $0x2c] sm:$0xff]   ;;  %v3945_v19 = vsel %vm1209_vm2, %v3940_v26, %v3944_v51 }
 0x15c   : > { %v1553_v49 = vpop.f32.mrf.mxu1  ;;  %v2405_v53 = vpop.f32.mrf.mxu0 }
 0x15d   : > { %v10512_v43 = vadd.f32 %v2405_v53, %v1865_v45  ;;  %v1870_v49 = vadd.f32 %v1547_v3, %v10298_v28  ;;  %v9751_v28 = vld [vmem:[%s10049_s18 + $0x34] sm:$0xff]  }
 0x15e   : > { %v1557_v0 = vpop.f32.mrf.mxu1  ;;  %v2409_v29 = vpop.f32.mrf.mxu0  ;;  %9285 = vmatmul.mubr.msk.bf16.gmra.mxu1 %vm586_vm1, %v9744_v17  ;;  %9335 = vmatmul.mubr.msk.bf16.gmra.mxu0 %vm586_vm1, %v3937_v2  ;;  %v1869_v17 = vadd.f32 %v1543_v55, %v10296_v25  ;;  %v1871_v25 = vadd.f32 %v1549_v31, %v10307_v35  ;;  %v3954_v35 = vshrl.u32 %v9749_v7, 16  ;;  %v3958_v31 = vshll.u32 %v9751_v28, 16 }
 0x15f   : > { %3255 = vmatprep.mubr.bf16.mxu1 %v11937_v59  ;;  %4253 = vmatprep.mubr.bf16.mxu0 %v11937_v59 }
 0x160   : > { %v1559_v32 = vpop.f32.mrf.mxu1  ;;  %v2411_v38 = vpop.f32.mrf.mxu0  ;;  %v3956_v7 = vor.u32 %v3954_v35, %v3952_v6 }
 0x161   : > { %v1875_v36 = vadd.f32 %v1559_v32, %v10325_v52  ;;  %v3966_v52 = vshll.u32 %v9753_v11, 16 }
 0x162   : > { %v1561_v23 = vpop.f32.mrf.mxu1  ;;  %v2413_v56 = vpop.f32.mrf.mxu0 }
 0x163   : > { %v10523_v45 = vadd.f32 %v2413_v56, %v1868_v47 }
 0x164   : > { %v1563_v62 = vpop.f32.mrf.mxu1  ;;  %v2415_v2 = vpop.f32.mrf.mxu0 }
 0x165   : > { %v10526_v53 = vadd.f32 %v2415_v2, %v1869_v17  ;;  %v1877_v32 = vadd.f32 %v1563_v62, %v10334_v63  ;;  %v9755_v63 = vld [vmem:[%s10049_s18 + $0x44] sm:$0xff]  }
 0x166   : > { %v1567_v29 = vpop.f32.mrf.mxu1  ;;  %v2419_v18 = vpop.f32.mrf.mxu0  ;;  %9286 = vmatmul.mubr.msk.bf16.gmra.mxu1 %vm586_vm1, %v9746_v20  ;;  %9336 = vmatmul.mubr.msk.bf16.gmra.mxu0 %vm586_vm1, %v3945_v19  ;;  %v9748_v20 = vld [vmem:[%s10049_s18 + $0x34] sm:$0xff]   ;;  %v3953_v19 = vsel %vm1209_vm2, %v3948_v42, %v3952_v6 }
 0x167   : > { %v10531_v55 = vadd.f32 %v2419_v18, %v1870_v49  ;;  %3265 = vmatprep.mubr.bf16.mxu1 %v11937_v59  ;;  %4263 = vmatprep.mubr.bf16.mxu0 %v11937_v59  ;;  %v1874_v49 = vadd.f32 %v1557_v0, %v10318_v46  ;;  %v1876_v0 = vadd.f32 %v1561_v23, %v10327_v54 }
 0x168   : > { %v1569_v3 = vpop.f32.mrf.mxu1  ;;  %v2421_v26 = vpop.f32.mrf.mxu0 }
 0x169   : > { %v10536_v38 = vadd.f32 %v2421_v26, %v1871_v25  ;;  %v3960_v25 = vrot.slane %v3958_v31, 1 }
 0x16a   : > { %v1571_v47 = vpop.f32.mrf.mxu1  ;;  %v2423_v56 = vpop.f32.mrf.mxu0 }
 0x16c   : > { %v1573_v17 = vpop.f32.mrf.mxu1  ;;  %v2425_v2 = vpop.f32.mrf.mxu0 }
 0x16e   : > { %v1577_v29 = vpop.f32.mrf.mxu1  ;;  %v2429_v51 = vpop.f32.mrf.mxu0  ;;  %9287 = vmatmul.mubr.msk.bf16.gmra.mxu1 %vm586_vm1, %v9748_v20  ;;  %9337 = vmatmul.mubr.msk.bf16.gmra.mxu0 %vm586_vm1, %v3953_v19  ;;  %v9750_v20 = vld [vmem:[%s10049_s18 + $0x3c] sm:$0xff]   ;;  %v3962_v19 = vshrl.u32 %v9751_v28, 16 }
 0x16f   : > { %v10545_v18 = vadd.f32 %v2429_v51, %v1874_v49  ;;  %3275 = vmatprep.mubr.bf16.mxu1 %v11937_v59  ;;  %4273 = vmatprep.mubr.bf16.mxu0 %v11937_v59  ;;  %v3961_v49 = vsel %vm1209_vm2, %v3956_v7, %v3960_v25  ;;  %v3968_v51 = vrot.slane %v3966_v52, 1  ;;  %v1880_v7 = vadd.f32 %v1571_v47, %v10347_v15 }
 0x170   : > { %v1579_v42 = vpop.f32.mrf.mxu1  ;;  %v2431_v46 = vpop.f32.mrf.mxu0  ;;  %v3964_v28 = vor.u32 %v3962_v19, %v3960_v25  ;;  %v3970_v25 = vshrl.u32 %v9753_v11, 16  ;;  %v3974_v19 = vshll.u32 %v9755_v63, 16 }
 0x171   : > { %v10550_v3 = vadd.f32 %v2431_v46, %v1875_v36 }
 0x172   : > { %v1581_v26 = vpop.f32.mrf.mxu1  ;;  %v2433_v56 = vpop.f32.mrf.mxu0  ;;  %v3976_v11 = vrot.slane %v3974_v19, 1 }
 0x173   : > { %v10554_v2 = vadd.f32 %v2433_v56, %v1876_v0  ;;  %v9752_v26 = vld [vmem:[%s10049_s18 + $0x44] sm:$0xff]   ;;  %v3969_v56 = vsel %vm1209_vm2, %v3964_v28, %v3968_v51 }
 0x174   : > { %v1583_v6 = vpop.f32.mrf.mxu1  ;;  %v2435_v35 = vpop.f32.mrf.mxu0 }
 0x175   : > { %v10557_v31 = vadd.f32 %v2435_v35, %v1877_v32  ;;  %v1882_v6 = vadd.f32 %v1577_v29, %v10354_v30  ;;  %v9757_v30 = vld [vmem:[%s10049_s18 + $0x4c] sm:$0xff]  }
 0x176   : > { %v1587_v54 = vpop.f32.mrf.mxu1  ;;  %v2439_v23 = vpop.f32.mrf.mxu0  ;;  %9288 = vmatmul.mubr.msk.bf16.gmra.mxu1 %vm586_vm1, %v9750_v20  ;;  %9338 = vmatmul.mubr.msk.bf16.gmra.mxu0 %vm586_vm1, %v3961_v49  ;;  %v1881_v20 = vadd.f32 %v1573_v17, %v10352_v24  ;;  %v1883_v24 = vadd.f32 %v1579_v42, %v10363_v40  ;;  %v3972_v17 = vor.u32 %v3970_v25, %v3968_v51  ;;  %v3978_v40 = vshrl.u32 %v9755_v63, 16  ;;  %v9759_v25 = vld [vmem:[%s10049_s18 + $0x54] sm:$0xff]  }
 0x177   : > { %3285 = vmatprep.mubr.bf16.mxu1 %v11937_v59  ;;  %4283 = vmatprep.mubr.bf16.mxu0 %v11937_v59  ;;  %v3982_v42 = vshll.u32 %v9757_v30, 16 }
 0x178   : > { %v1589_v62 = vpop.f32.mrf.mxu1  ;;  %v2441_v36 = vpop.f32.mrf.mxu0  ;;  %v3980_v63 = vor.u32 %v3978_v40, %v3976_v11 }
 0x179   : > { %v1887_v19 = vadd.f32 %v1589_v62, %v10381_v5  ;;  %v3990_v5 = vshll.u32 %v9759_v25, 16 }
 0x17a   : > { %v1591_v46 = vpop.f32.mrf.mxu1  ;;  %v2443_v0 = vpop.f32.mrf.mxu0 }
 0x17b   : > { %v10568_v32 = vadd.f32 %v2443_v0, %v1880_v7 }
 0x17c   : > { %v1593_v52 = vpop.f32.mrf.mxu1  ;;  %v2445_v49 = vpop.f32.mrf.mxu0 }
 0x17d   : > { %v10571_v35 = vadd.f32 %v2445_v49, %v1881_v20  ;;  %v1889_v62 = vadd.f32 %v1593_v52, %v10390_v22  ;;  %v9761_v22 = vld [vmem:[%s10049_s18 + $0x5c] sm:$0xff]  }
 0x17e   : > { %v1597_v23 = vpop.f32.mrf.mxu1  ;;  %v2449_v15 = vpop.f32.mrf.mxu0  ;;  %9289 = vmatmul.mubr.msk.bf16.gmra.mxu1 %vm586_vm1, %v9752_v26  ;;  %9339 = vmatmul.mubr.msk.bf16.gmra.mxu0 %vm586_vm1, %v3969_v56  ;;  %v9754_v26 = vld [vmem:[%s10049_s18 + $0x4c] sm:$0xff]   ;;  %v3977_v56 = vsel %vm1209_vm2, %v3972_v17, %v3976_v11 }
 0x17f   : > { %v10576_v47 = vadd.f32 %v2449_v15, %v1882_v6  ;;  %3295 = vmatprep.mubr.bf16.mxu1 %v11937_v59  ;;  %4293 = vmatprep.mubr.bf16.mxu0 %v11937_v59  ;;  %v1886_v6 = vadd.f32 %v1587_v54, %v10374_v57  ;;  %v1888_v54 = vadd.f32 %v1591_v46, %v10383_v10 }
 0x180   : > { %v1599_v29 = vpop.f32.mrf.mxu1  ;;  %v2451_v28 = vpop.f32.mrf.mxu0 }
 0x181   : > { %v10581_v36 = vadd.f32 %v2451_v28, %v1883_v24  ;;  %v3984_v24 = vrot.slane %v3982_v42, 1 }
 0x182   : > { %v1601_v7 = vpop.f32.mrf.mxu1  ;;  %v2453_v0 = vpop.f32.mrf.mxu0 }
 0x184   : > { %v1603_v20 = vpop.f32.mrf.mxu1  ;;  %v2455_v49 = vpop.f32.mrf.mxu0 }
 0x186   : > { %v1607_v23 = vpop.f32.mrf.mxu1  ;;  %v2459_v51 = vpop.f32.mrf.mxu0  ;;  %9290 = vmatmul.mubr.msk.bf16.gmra.mxu1 %vm586_vm1, %v9754_v26  ;;  %9340 = vmatmul.mubr.msk.bf16.gmra.mxu0 %vm586_vm1, %v3977_v56  ;;  %v9756_v26 = vld [vmem:[%s10049_s18 + $0x54] sm:$0xff]   ;;  %v3986_v56 = vshrl.u32 %v9757_v30, 16 }
 0x187   : > { %v10590_v15 = vadd.f32 %v2459_v51, %v1886_v6  ;;  %3305 = vmatprep.mubr.bf16.mxu1 %v11937_v59  ;;  %4303 = vmatprep.mubr.bf16.mxu0 %v11937_v59  ;;  %v3985_v6 = vsel %vm1209_vm2, %v3980_v63, %v3984_v24  ;;  %v3992_v51 = vrot.slane %v3990_v5, 1  ;;  %v1892_v63 = vadd.f32 %v1601_v7, %v10403_v48  ;;  %v10619_v48 = vld.sshfl [vmem:[%s10040_s14 + $0x1c] sm:$0x33 pattern:$0x76325410] }
 0x188   : > { %v1609_v17 = vpop.f32.mrf.mxu1  ;;  %v2461_v57 = vpop.f32.mrf.mxu0  ;;  %v3988_v30 = vor.u32 %v3986_v56, %v3984_v24  ;;  %v3994_v24 = vshrl.u32 %v9759_v25, 16  ;;  %v3998_v56 = vshll.u32 %v9761_v22, 16 }
 0x189   : > { %v10595_v29 = vadd.f32 %v2461_v57, %v1887_v19 }
 0x18a   : > { %v1611_v28 = vpop.f32.mrf.mxu1  ;;  %v2463_v0 = vpop.f32.mrf.mxu0 }
 0x18b   : > { %v10599_v49 = vadd.f32 %v2463_v0, %v1888_v54  ;;  %v9758_v28 = vld [vmem:[%s10049_s18 + $0x5c] sm:$0xff]   ;;  %v3993_v0 = vsel %vm1209_vm2, %v3988_v30, %v3992_v51  ;;  %v9763_v30 = vld [vmem:[%s10049_s18 + $0x64] sm:$0xff]  }
 0x18c   : > { %v1613_v11 = vpop.f32.mrf.mxu1  ;;  %v2465_v40 = vpop.f32.mrf.mxu0 }
 0x18d   : > { %v10602_v42 = vadd.f32 %v2465_v40, %v1889_v62  ;;  %v1894_v11 = vadd.f32 %v1607_v23, %v10410_v16  ;;  %v3996_v16 = vor.u32 %v3994_v24, %v3992_v51  ;;  %v4000_v23 = vrot.slane %v3998_v56, 1 }
 0x18e   : > { %v1617_v10 = vpop.f32.mrf.mxu1  ;;  %v2469_v46 = vpop.f32.mrf.mxu0  ;;  %9291 = vmatmul.mubr.msk.bf16.gmra.mxu1 %vm586_vm1, %v9756_v26  ;;  %9341 = vmatmul.mubr.msk.bf16.gmra.mxu0 %vm586_vm1, %v3985_v6  ;;  %v1893_v26 = vadd.f32 %v1603_v20, %v10408_v13  ;;  %v6829_v13 = vcombine.high %v10619_v48, %v10619_v48  ;;  %v1895_v20 = vadd.f32 %v1609_v17, %v10419_v27  ;;  %v4002_v24 = vshrl.u32 %v9761_v22, 16 }
 0x18f   : > { %3315 = vmatprep.mubr.bf16.mxu1 %v11937_v59  ;;  %4313 = vmatprep.mubr.bf16.mxu0 %v11937_v59  ;;  %v4001_v51 = vsel %vm1209_vm2, %v3996_v16, %v4000_v23  ;;  %v4006_v56 = vshll.u32 %v9763_v30, 16 }
 0x190   : > { %v1619_v52 = vpop.f32.mrf.mxu1  ;;  %v2471_v19 = vpop.f32.mrf.mxu0  ;;  %9488 = vmatprep.subr.msk.bf16.mxu1 %vm659_vm0, %v6829_v13  ;;  %v4004_v22 = vor.u32 %v4002_v24, %v4000_v23 }
 0x191   : > { %v10632_v19 = vld.sshfl [vmem:[%s10040_s14 + $0x20] sm:$0x33 pattern:$0x76325410]  ;;  %v4008_v16 = vrot.slane %v4006_v56, 1  ;;  %s396_s14 = sadd.s32 %s9098_s13, %s9097_s12 }
 0x192   : > { %v1621_v57 = vpop.f32.mrf.mxu1  ;;  %v2473_v54 = vpop.f32.mrf.mxu0  ;;  %s9099_s15 = sshll.u32 %s396_s14, 3 }
 0x193   : > { %v10613_v62 = vadd.f32 %v2473_v54, %v1892_v63 }
 0x194   : > { %v1623_v5 = vpop.f32.mrf.mxu1  ;;  %v2475_v6 = vpop.f32.mrf.mxu0 }
 0x195   : > { %v10616_v40 = vadd.f32 %v2475_v6, %v1893_v26  ;;  %v9760_v26 = vld [vmem:[%s10049_s18 + $0x64] sm:$0xff]  }
 0x196   : > { %v1627_v7 = vpop.f32.mrf.mxu1  ;;  %v2479_v46 = vpop.f32.mrf.mxu0  ;;  %9292 = vmatmul.mubr.msk.bf16.gmra.mxu1 %vm586_vm1, %v9758_v28  ;;  %9342 = vmatmul.mubr.msk.bf16.gmra.mxu0 %vm586_vm1, %v3993_v0  ;;  %v7700_v28 = vcombine.high %v10632_v19, %v10632_v19 }
 0x197   : > { %v10626_v25 = vadd.f32 %v2479_v46, %v1894_v11  ;;  %3325 = vmatprep.mubr.bf16.mxu1 %v11937_v59  ;;  %4323 = vmatprep.mubr.bf16.mxu0 %v11937_v59  ;;  %v1898_v7 = vadd.f32 %v1617_v10, %v10430_v37  ;;  %v1900_v10 = vadd.f32 %v1621_v57, %v10438_v21 }
 0x198   : > { %v1629_v63 = vpop.f32.mrf.mxu1  ;;  %v2481_v54 = vpop.f32.mrf.mxu0  ;;  %9540 = vmatprep.subr.msk.bf16.mxu0 %vm659_vm0, %v7700_v28 }
 0x199   : > { %v10637_v27 = vadd.f32 %v2481_v54, %v1895_v20  ;;  %v9765_v20 = vld [vmem:[%s10049_s18 + $0x6c] sm:$0xff]   ;;  %v1899_v63 = vadd.f32 %v1619_v52, %v10436_v61  ;;  %v1901_v52 = vadd.f32 %v1623_v5, %v10445_v9  ;;  %v9767_v9 = vld [vmem:[%s10049_s18 + $0x74] sm:$0xff]  }
 0x19a   : > { %v1631_v17 = vpop.f32.mrf.mxu1  ;;  %v2483_v0 = vpop.f32.mrf.mxu0  ;;  %v4014_v61 = vshll.u32 %v9765_v20, 16 }
 0x19b   : > { %11942 = vst [vmem:[#allocation30_spill] sm:$0xff] %v10637_v27  ;;  %v4010_v27 = vshrl.u32 %v9763_v30, 16 }
 0x19c   : > { %v1633_v6 = vpop.f32.mrf.mxu1  ;;  %v2485_v11 = vpop.f32.mrf.mxu0 }
 0x19d   : > { %v4012_v30 = vor.u32 %v4010_v27, %v4008_v16  ;;  %v4018_v27 = vshrl.u32 %v9765_v20, 16 }
 0x19e   : > { %v1637_v46 = vpop.f32.mrf.mxu1  ;;  %v2489_v13 = vpop.f32.mrf.mxu0  ;;  %9293 = vmatmul.mubr.msk.bf16.gmra.mxu1 %vm586_vm1, %v9760_v26  ;;  %9343 = vmatmul.mubr.msk.bf16.gmra.mxu0 %vm586_vm1, %v4001_v51  ;;  %v9762_v51 = vld [vmem:[%s10049_s18 + $0x6c] sm:$0xff]  }
 0x19f   : > { %v10647_v54 = vadd.f32 %v2489_v13, %v1898_v7  ;;  %3335 = vmatprep.mubr.bf16.mxu1 %v11937_v59  ;;  %4333 = vmatprep.mubr.bf16.mxu0 %v11937_v59  ;;  %v4009_v13 = vsel %vm1209_vm2, %v4004_v22, %v4008_v16  ;;  %v4022_v16 = vshll.u32 %v9767_v9, 16 }
 0x1a0   : > { %v1639_v28 = vpop.f32.mrf.mxu1  ;;  %v2491_v37 = vpop.f32.mrf.mxu0 }
 0x1a1   : > { %v10652_v0 = vadd.f32 %v2491_v37, %v1899_v63  ;;  %v4016_v63 = vrot.slane %v4014_v61, 1  ;;  %v1904_v37 = vadd.f32 %v1631_v17, %v10457_v39  ;;  %v4024_v20 = vrot.slane %v4022_v16, 1 }
 0x1a2   : > { %v1641_v26 = vpop.f32.mrf.mxu1  ;;  %v2493_v11 = vpop.f32.mrf.mxu0 }
 0x1a3   : > { %v10656_v7 = vadd.f32 %v2493_v11, %v1900_v10  ;;  %v9764_v11 = vld [vmem:[%s10049_s18 + $0x74] sm:$0xff]  }
 0x1a4   : > { %v1643_v23 = vpop.f32.mrf.mxu1  ;;  %v2495_v24 = vpop.f32.mrf.mxu0 }
 0x1a5   : > { %v10659_v56 = vadd.f32 %v2495_v24, %v1901_v52  ;;  %v4017_v52 = vsel %vm1209_vm2, %v4012_v30, %v4016_v63  ;;  %v1906_v24 = vadd.f32 %v1637_v46, %v10467_v60  ;;  %v9769_v60 = vld [vmem:[%s10049_s18 + $0x7c] sm:$0xff]  }
 0x1a6   : > { %v1647_v21 = vpop.f32.mrf.mxu1  ;;  %v2499_v57 = vpop.f32.mrf.mxu0  ;;  %9294 = vmatmul.mubr.msk.bf16.gmra.mxu1 %vm586_vm1, %v9762_v51  ;;  %9344 = vmatmul.mubr.msk.bf16.gmra.mxu0 %vm586_vm1, %v4009_v13  ;;  %v1905_v51 = vadd.f32 %v1633_v6, %v10463_v58  ;;  %v1907_v58 = vadd.f32 %v1639_v28, %v10474_v34  ;;  %v4020_v6 = vor.u32 %v4018_v27, %v4016_v63  ;;  %v4026_v34 = vshrl.u32 %v9767_v9, 16  ;;  %v9771_v27 = vld [vmem:[%s10049_s18 + $0x84] sm:$0xff]  }
 0x1a7   : > { %3345 = vmatprep.mubr.bf16.mxu1 %v11937_v59  ;;  %4343 = vmatprep.mubr.bf16.mxu0 %v11937_v59  ;;  %v4030_v28 = vshll.u32 %v9769_v60, 16 }
 0x1a8   : > { %v1649_v5 = vpop.f32.mrf.mxu1  ;;  %v2501_v22 = vpop.f32.mrf.mxu0  ;;  %v4028_v9 = vor.u32 %v4026_v34, %v4024_v20 }
 0x1a9   : > { %v1911_v16 = vadd.f32 %v1649_v5, %v10485_v44  ;;  %v4038_v44 = vshll.u32 %v9771_v27, 16 }
 0x1aa   : > { %v1651_v10 = vpop.f32.mrf.mxu1  ;;  %v2503_v26 = vpop.f32.mrf.mxu0 }
 0x1ab   : > { %v10670_v23 = vadd.f32 %v2503_v26, %v1904_v37 }
 0x1ac   : > { %v1653_v61 = vpop.f32.mrf.mxu1  ;;  %v2505_v13 = vpop.f32.mrf.mxu0 }
 0x1ad   : > { %v10673_v57 = vadd.f32 %v2505_v13, %v1905_v51  ;;  %v9766_v51 = vld [vmem:[%s10049_s18 + $0x7c] sm:$0xff]   ;;  %v1913_v5 = vadd.f32 %v1653_v61, %v10491_v12  ;;  %v9773_v12 = vld [vmem:[%s10049_s18 + $0x8c] sm:$0xff]  }
 0x1ae   : > { %v1657_v22 = vpop.f32.mrf.mxu1  ;;  %v2509_v39 = vpop.f32.mrf.mxu0  ;;  %9295 = vmatmul.mubr.msk.bf16.gmra.mxu1 %vm586_vm1, %v9764_v11  ;;  %9345 = vmatmul.mubr.msk.bf16.gmra.mxu0 %vm586_vm1, %v4017_v52  ;;  %v4025_v52 = vsel %vm1209_vm2, %v4020_v6, %v4024_v20  ;;  %v4032_v6 = vrot.slane %v4030_v28, 1 }
 0x1af   : > { %v10678_v17 = vadd.f32 %v2509_v39, %v1906_v24  ;;  %3355 = vmatprep.mubr.bf16.mxu1 %v11937_v59  ;;  %4353 = vmatprep.mubr.bf16.mxu0 %v11937_v59  ;;  %v1910_v22 = vadd.f32 %v1647_v21, %v10478_v14  ;;  %v1912_v21 = vadd.f32 %v1651_v10, %v10487_v41 }
 0x1b0   : > { %v1659_v46 = vpop.f32.mrf.mxu1  ;;  %v2511_v30 = vpop.f32.mrf.mxu0 }
 0x1b1   : > { %v10683_v37 = vadd.f32 %v2511_v30, %v1907_v58 }
 0x1b2   : > { %v1661_v26 = vpop.f32.mrf.mxu1  ;;  %v2513_v11 = vpop.f32.mrf.mxu0 }
 0x1b4   : > { %v1663_v13 = vpop.f32.mrf.mxu1  ;;  %v2515_v24 = vpop.f32.mrf.mxu0 }
 0x1b5   : > { %v4034_v24 = vshrl.u32 %v9769_v60, 16 }
 0x1b6   : > { %v1667_v39 = vpop.f32.mrf.mxu1  ;;  %v2519_v63 = vpop.f32.mrf.mxu0  ;;  %9296 = vmatmul.mubr.msk.bf16.gmra.mxu1 %vm586_vm1, %v9766_v51  ;;  %9346 = vmatmul.mubr.msk.bf16.gmra.mxu0 %vm586_vm1, %v4025_v52  ;;  %v9768_v52 = vld [vmem:[%s10049_s18 + $0x84] sm:$0xff]  }
 0x1b7   : > { %v10692_v58 = vadd.f32 %v2519_v63, %v1910_v22  ;;  %3365 = vmatprep.mubr.bf16.mxu1 %v11937_v59  ;;  %4363 = vmatprep.mubr.bf16.mxu0 %v11937_v59  ;;  %v4033_v63 = vsel %vm1209_vm2, %v4028_v9, %v4032_v6  ;;  %v4036_v60 = vor.u32 %v4034_v24, %v4032_v6  ;;  %v4042_v6 = vshrl.u32 %v9771_v27, 16 }
 0x1b8   : > { %v1669_v46 = vpop.f32.mrf.mxu1  ;;  %v2521_v14 = vpop.f32.mrf.mxu0  ;;  %v4046_v24 = vshll.u32 %v9773_v12, 16 }
 0x1b9   : > { %11943 = vst [vmem:[#allocation31_spill] sm:$0xff] %v10692_v58  ;;  %v10697_v30 = vadd.f32 %v2521_v14, %v1911_v16  ;;  %v4040_v16 = vrot.slane %v4038_v44, 1  ;;  %v1916_v14 = vadd.f32 %v1661_v26, %v10273_v1  ;;  %v11950_v26 = vld [vmem:[#allocation5_spill] sm:$0xff] }
 0x1ba   : > { %v1671_v11 = vpop.f32.mrf.mxu1  ;;  %v2523_v51 = vpop.f32.mrf.mxu0 }
 0x1bb   : > { %11944 = vst [vmem:[#allocation32_spill] sm:$0xff] %v10697_v30  ;;  %v10701_v22 = vadd.f32 %v2523_v51, %v1912_v21  ;;  %v9770_v51 = vld [vmem:[%s10049_s18 + $0x8c] sm:$0xff]   ;;  %v4044_v27 = vor.u32 %v4042_v6, %v4040_v16  ;;  %v9777_v6 = vld [vmem:[%s10049_s18 + $0x9c] sm:$0xff]  }
 0x1bc   : > { %v1673_v20 = vpop.f32.mrf.mxu1  ;;  %v2525_v34 = vpop.f32.mrf.mxu0 }
 0x1bd   : > { %11945 = vst [vmem:[#allocation33_spill] sm:$0xff] %v10701_v22  ;;  %v10704_v28 = vadd.f32 %v2525_v34, %v1913_v5  ;;  %v4041_v5 = vsel %vm1209_vm2, %v4036_v60, %v4040_v16  ;;  %v11948_v34 = vld [vmem:[#allocation4_spill] sm:$0xff]  ;;  %v4048_v60 = vrot.slane %v4046_v24, 1  ;;  %v11954_v24 = vld [vmem:[#allocation7_spill] sm:$0xff] }
 0x1be   : > { %v1677_v41 = vpop.f32.mrf.mxu1  ;;  %v2529_v10 = vpop.f32.mrf.mxu0  ;;  %9297 = vmatmul.mubr.msk.bf16.gmra.mxu1 %vm586_vm1, %v9768_v52  ;;  %9347 = vmatmul.mubr.msk.bf16.gmra.mxu0 %vm586_vm1, %v4033_v63  ;;  %v1917_v52 = vadd.f32 %v1663_v13, %v10280_v8  ;;  %v1919_v8 = vadd.f32 %v1669_v46, %v11950_v26  ;;  %v4050_v46 = vshrl.u32 %v9773_v12, 16  ;;  %v11953_v26 = vld [vmem:[#allocation6_spill] sm:$0xff] }
 0x1bf   : > { %11946 = vst [vmem:[#allocation34_spill] sm:$0xff] %v10704_v28  ;;  %3375 = vmatprep.mubr.bf16.mxu1 %v11937_v59  ;;  %4373 = vmatprep.mubr.bf16.mxu0 %v11937_v59  ;;  %v1918_v10 = vadd.f32 %v1667_v39, %v11948_v34  ;;  %v9775_v39 = vld [vmem:[%s10049_s18 + $0x94] sm:$0xff]  }
 0x1c0   : > { %v1679_v61 = vpop.f32.mrf.mxu1  ;;  %v2531_v9 = vpop.f32.mrf.mxu0  ;;  %v9772_v34 = vld [vmem:[%s10049_s18 + $0x94] sm:$0xff]   ;;  %v4052_v12 = vor.u32 %v4050_v46, %v4048_v60 }
 0x1c2   : > { %v1681_v21 = vpop.f32.mrf.mxu1  ;;  %v2533_v11 = vpop.f32.mrf.mxu0 }
 0x1c3   : > { %v10715_v20 = vadd.f32 %v2533_v11, %v1916_v14 }
 0x1c4   : > { %v1683_v44 = vpop.f32.mrf.mxu1  ;;  %v2535_v63 = vpop.f32.mrf.mxu0 }
 0x1c5   : > { %11947 = vst [vmem:[#allocation35_spill] sm:$0xff] %v10715_v20  ;;  %v10718_v28 = vadd.f32 %v2535_v63, %v1917_v52  ;;  %v4058_v20 = vshrl.u32 %v9775_v39, 16 }
 0x1c6   : > { %v1687_v9 = vpop.f32.mrf.mxu1  ;;  %v2539_v1 = vpop.f32.mrf.mxu0  ;;  %9298 = vmatmul.mubr.msk.bf16.gmra.mxu1 %vm586_vm1, %v9770_v51  ;;  %9348 = vmatmul.mubr.msk.bf16.gmra.mxu0 %vm586_vm1, %v4041_v5  ;;  %v4049_v5 = vsel %vm1209_vm2, %v4044_v27, %v4048_v60 }
 0x1c7   : > { %11949 = vst [vmem:[#allocation4_spill] sm:$0xff] %v10718_v28  ;;  %v10723_v13 = vadd.f32 %v2539_v1, %v1918_v10  ;;  %3385 = vmatprep.mubr.bf16.mxu1 %v11937_v59  ;;  %4383 = vmatprep.mubr.bf16.mxu0 %v11937_v59  ;;  %v4054_v10 = vshll.u32 %v9775_v39, 16 }
 0x1c8   : > { %v1689_v14 = vpop.f32.mrf.mxu1  ;;  %v2541_v11 = vpop.f32.mrf.mxu0 }
 0x1c9   : > { %11951 = vst [vmem:[#allocation5_spill] sm:$0xff] %v10723_v13  ;;  %v10728_v52 = vadd.f32 %v2541_v11, %v1919_v8  ;;  %v1922_v13 = vadd.f32 %v1677_v41, %v11953_v26  ;;  %v1923_v8 = vadd.f32 %v1679_v61, %v11954_v24  ;;  %v4056_v27 = vrot.slane %v4054_v10, 1 }
 0x1ca   : > { %v1691_v63 = vpop.f32.mrf.mxu1  ;;  %v2543_v51 = vpop.f32.mrf.mxu0  ;;  %v4062_v61 = vshll.u32 %v9777_v6, 16 }
 0x1cb   : > { %11952 = vst [vmem:[#allocation36_spill] sm:$0xff] %v10728_v52  ;;  %v11956_v51 = vld [vmem:[#allocation8_spill] sm:$0xff]  ;;  %v4060_v39 = vor.u32 %v4058_v20, %v4056_v27  ;;  %v4066_v20 = vshrl.u32 %v9777_v6, 16 }
 0x1cc   : > { %v1693_v9 = vpop.f32.mrf.mxu1  ;;  %v2545_v1 = vpop.f32.mrf.mxu0 }
 0x1cd   : > { %v1924_v1 = vadd.f32 %v1681_v21, %v11956_v51  ;;  %v11961_v51 = vld [vmem:[#allocation10_spill] sm:$0xff] }
 0x1ce   : > { %v1697_v28 = vpop.f32.mrf.mxu1  ;;  %v2549_v16 = vpop.f32.mrf.mxu0  ;;  %9299 = vmatmul.mubr.msk.bf16.gmra.mxu1 %vm586_vm1, %v9772_v34  ;;  %9349 = vmatmul.mubr.msk.bf16.gmra.mxu0 %vm586_vm1, %v4049_v5  ;;  %v9774_v5 = vld [vmem:[%s10049_s18 + $0x9c] sm:$0xff]  }
 0x1cf   : > { %v10737_v14 = vadd.f32 %v2549_v16, %v1922_v13  ;;  %3395 = vmatprep.mubr.bf16.mxu1 %v11937_v59  ;;  %4393 = vmatprep.mubr.bf16.mxu0 %v11937_v59  ;;  %v11958_v13 = vld [vmem:[#allocation9_spill] sm:$0xff] }
 0x1d0   : > { %v1699_v11 = vpop.f32.mrf.mxu1  ;;  %v2551_v41 = vpop.f32.mrf.mxu0  ;;  %v1925_v16 = vadd.f32 %v1683_v44, %v11958_v13  ;;  %v9779_v44 = vld [vmem:[%s10049_s18 + $0xa4] sm:$0xff]  }
 0x1d1   : > { %11955 = vst [vmem:[#allocation6_spill] sm:$0xff] %v10737_v14  ;;  %v10742_v26 = vadd.f32 %v2551_v41, %v1923_v8  ;;  %v4057_v14 = vsel %vm1209_vm2, %v4052_v12, %v4056_v27  ;;  %v4064_v41 = vrot.slane %v4062_v61, 1 }
 0x1d2   : > { %v1701_v34 = vpop.f32.mrf.mxu1  ;;  %v2553_v52 = vpop.f32.mrf.mxu0 }
 0x1d3   : > { %11957 = vst [vmem:[#allocation7_spill] sm:$0xff] %v10742_v26  ;;  %v10746_v24 = vadd.f32 %v2553_v52, %v1924_v1  ;;  %v1928_v1 = vadd.f32 %v1691_v63, %v11961_v51  ;;  %v4068_v6 = vor.u32 %v4066_v20, %v4064_v41  ;;  %v9783_v20 = vld [vmem:[%s10049_s18 + $0xb4] sm:$0xff]  }
 0x1d4   : > { %v1703_v60 = vpop.f32.mrf.mxu1  ;;  %v2555_v46 = vpop.f32.mrf.mxu0 }
 0x1d5   : > { %11959 = vst [vmem:[#allocation8_spill] sm:$0xff] %v10746_v24  ;;  %v10749_v10 = vadd.f32 %v2555_v46, %v1925_v16  ;;  %v9776_v16 = vld [vmem:[%s10049_s18 + $0xa4] sm:$0xff]   ;;  %v4065_v60 = vsel %vm1209_vm2, %v4060_v39, %v4064_v41  ;;  %v11966_v39 = vld [vmem:[#allocation13_spill] sm:$0xff] }
 0x1d6   : > { %v1707_v21 = vpop.f32.mrf.mxu1  ;;  %v2559_v8 = vpop.f32.mrf.mxu0  ;;  %9300 = vmatmul.mubr.msk.bf16.gmra.mxu1 %vm586_vm1, %v9774_v5  ;;  %9350 = vmatmul.mubr.msk.bf16.gmra.mxu0 %vm586_vm1, %v4057_v14  ;;  %v11962_v46 = vld [vmem:[#allocation11_spill] sm:$0xff]  ;;  %v4070_v14 = vshll.u32 %v9779_v44, 16 }
 0x1d7   : > { %11960 = vst [vmem:[#allocation9_spill] sm:$0xff] %v10749_v10  ;;  %3405 = vmatprep.mubr.bf16.mxu1 %v11937_v59  ;;  %4403 = vmatprep.mubr.bf16.mxu0 %v11937_v59  ;;  %v1929_v5 = vadd.f32 %v1693_v9, %v11962_v46  ;;  %v11964_v10 = vld [vmem:[#allocation12_spill] sm:$0xff]  ;;  %v1931_v9 = vadd.f32 %v1699_v11, %v11966_v39  ;;  %v4074_v11 = vshrl.u32 %v9779_v44, 16  ;;  %v11969_v39 = vld [vmem:[#allocation14_spill] sm:$0xff] }
 0x1d8   : > { %v1709_v52 = vpop.f32.mrf.mxu1  ;;  %v2561_v12 = vpop.f32.mrf.mxu0  ;;  %v1930_v24 = vadd.f32 %v1697_v28, %v11964_v10  ;;  %v9781_v28 = vld [vmem:[%s10049_s18 + $0xac] sm:$0xff]  }
 0x1da   : > { %v1711_v34 = vpop.f32.mrf.mxu1  ;;  %v2563_v13 = vpop.f32.mrf.mxu0 }
 0x1db   : > { %v10760_v8 = vadd.f32 %v2563_v13, %v1928_v1  ;;  %v4072_v1 = vrot.slane %v4070_v14, 1  ;;  %v11970_v14 = vld [vmem:[#allocation15_spill] sm:$0xff] }
 0x1dc   : > { %v1713_v27 = vpop.f32.mrf.mxu1  ;;  %v2565_v61 = vpop.f32.mrf.mxu0 }
 0x1dd   : > { %11963 = vst [vmem:[#allocation10_spill] sm:$0xff] %v10760_v8  ;;  %v10763_v26 = vadd.f32 %v2565_v61, %v1929_v5  ;;  %v9778_v61 = vld [vmem:[%s10049_s18 + $0xac] sm:$0xff]   ;;  %v4076_v44 = vor.u32 %v4074_v11, %v4072_v1  ;;  %v4082_v8 = vshrl.u32 %v9781_v28, 16 }
 0x1de   : > { %v1717_v12 = vpop.f32.mrf.mxu1  ;;  %v2569_v63 = vpop.f32.mrf.mxu0  ;;  %9301 = vmatmul.mubr.msk.bf16.gmra.mxu1 %vm586_vm1, %v9776_v16  ;;  %9351 = vmatmul.mubr.msk.bf16.gmra.mxu0 %vm586_vm1, %v4065_v60  ;;  %v4073_v60 = vsel %vm1209_vm2, %v4068_v6, %v4072_v1 }
 0x1df   : > { %11965 = vst [vmem:[#allocation11_spill] sm:$0xff] %v10763_v26  ;;  %v10768_v51 = vadd.f32 %v2569_v63, %v1930_v24  ;;  %3415 = vmatprep.mubr.bf16.mxu1 %v11937_v59  ;;  %4413 = vmatprep.mubr.bf16.mxu0 %v11937_v59  ;;  %v4078_v24 = vshll.u32 %v9781_v28, 16 }
 0x1e0   : > { %v1719_v10 = vpop.f32.mrf.mxu1  ;;  %v2571_v13 = vpop.f32.mrf.mxu0 }
 0x1e1   : > { %11967 = vst [vmem:[#allocation12_spill] sm:$0xff] %v10768_v51  ;;  %v10773_v46 = vadd.f32 %v2571_v13, %v1931_v9  ;;  %v1934_v51 = vadd.f32 %v1707_v21, %v11969_v39  ;;  %v1935_v9 = vadd.f32 %v1709_v52, %v11970_v14  ;;  %v4080_v6 = vrot.slane %v4078_v24, 1 }
 0x1e2   : > { %v1721_v5 = vpop.f32.mrf.mxu1  ;;  %v2573_v16 = vpop.f32.mrf.mxu0  ;;  %v4086_v52 = vshll.u32 %v9783_v20, 16 }
 0x1e3   : > { %11968 = vst [vmem:[#allocation13_spill] sm:$0xff] %v10773_v46  ;;  %v11972_v16 = vld [vmem:[#allocation16_spill] sm:$0xff]  ;;  %v4084_v28 = vor.u32 %v4082_v8, %v4080_v6  ;;  %v4090_v8 = vshrl.u32 %v9783_v20, 16 }
 0x1e4   : > { %v1723_v12 = vpop.f32.mrf.mxu1  ;;  %v2575_v63 = vpop.f32.mrf.mxu0 }
 0x1e5   : > { %v1936_v63 = vadd.f32 %v1711_v34, %v11972_v16  ;;  %v11977_v16 = vld [vmem:[#allocation18_spill] sm:$0xff] }
 0x1e6   : > { %v1727_v26 = vpop.f32.mrf.mxu1  ;;  %v2579_v41 = vpop.f32.mrf.mxu0  ;;  %9302 = vmatmul.mubr.msk.bf16.gmra.mxu1 %vm586_vm1, %v9778_v61  ;;  %9352 = vmatmul.mubr.msk.bf16.gmra.mxu0 %vm586_vm1, %v4073_v60  ;;  %v9780_v60 = vld [vmem:[%s10049_s18 + $0xb4] sm:$0xff]  }
 0x1e7   : > { %v10782_v10 = vadd.f32 %v2579_v41, %v1934_v51  ;;  %3425 = vmatprep.mubr.bf16.mxu1 %v11937_v59  ;;  %4423 = vmatprep.mubr.bf16.mxu0 %v11937_v59  ;;  %v11974_v51 = vld [vmem:[#allocation17_spill] sm:$0xff] }
 0x1e8   : > { %v1729_v13 = vpop.f32.mrf.mxu1  ;;  %v2581_v21 = vpop.f32.mrf.mxu0  ;;  %v1937_v41 = vadd.f32 %v1713_v27, %v11974_v51  ;;  %v9785_v27 = vld [vmem:[%s10049_s18 + $0xbc] sm:$0xff]  }
 0x1e9   : > { %11971 = vst [vmem:[#allocation14_spill] sm:$0xff] %v10782_v10  ;;  %v10787_v39 = vadd.f32 %v2581_v21, %v1935_v9  ;;  %v4081_v10 = vsel %vm1209_vm2, %v4076_v44, %v4080_v6  ;;  %v4088_v21 = vrot.slane %v4086_v52, 1  ;;  %v4094_v6 = vshll.u32 %v9785_v27, 16 }
 0x1ea   : > { %v1731_v61 = vpop.f32.mrf.mxu1  ;;  %v2583_v46 = vpop.f32.mrf.mxu0 }
 0x1eb   : > { %11973 = vst [vmem:[#allocation15_spill] sm:$0xff] %v10787_v39  ;;  %v10791_v14 = vadd.f32 %v2583_v46, %v1936_v63  ;;  %v1940_v63 = vadd.f32 %v1721_v5, %v11977_v16  ;;  %v11982_v16 = vld [vmem:[#allocation21_spill] sm:$0xff] }
 0x1ec   : > { %v1733_v1 = vpop.f32.mrf.mxu1  ;;  %v2585_v11 = vpop.f32.mrf.mxu0 }
 0x1ed   : > { %11975 = vst [vmem:[#allocation16_spill] sm:$0xff] %v10791_v14  ;;  %v10794_v24 = vadd.f32 %v2585_v11, %v1937_v41  ;;  %v9782_v41 = vld [vmem:[%s10049_s18 + $0xbc] sm:$0xff]   ;;  %v4089_v1 = vsel %vm1209_vm2, %v4084_v28, %v4088_v21  ;;  %v9786_v28 = vld [vmem:[%s10049_s18 + $0xc4] sm:$0xff]  }
 0x1ee   : > { %v1737_v34 = vpop.f32.mrf.mxu1  ;;  %v2589_v9 = vpop.f32.mrf.mxu0  ;;  %9303 = vmatmul.mubr.msk.bf16.gmra.mxu1 %vm586_vm1, %v9780_v60  ;;  %9353 = vmatmul.mubr.msk.bf16.gmra.mxu0 %vm586_vm1, %v4081_v10  ;;  %v11978_v60 = vld [vmem:[#allocation19_spill] sm:$0xff] }
 0x1ef   : > { %11976 = vst [vmem:[#allocation17_spill] sm:$0xff] %v10794_v24  ;;  %3435 = vmatprep.mubr.bf16.mxu1 %v11937_v59  ;;  %4433 = vmatprep.mubr.bf16.mxu0 %v11937_v59  ;;  %v1941_v11 = vadd.f32 %v1723_v12, %v11978_v60  ;;  %v11980_v24 = vld [vmem:[#allocation20_spill] sm:$0xff]  ;;  %v1943_v12 = vadd.f32 %v1729_v13, %v11982_v16 }
 0x1f0   : > { %v1739_v46 = vpop.f32.mrf.mxu1  ;;  %v2591_v44 = vpop.f32.mrf.mxu0  ;;  %v1942_v14 = vadd.f32 %v1727_v26, %v11980_v24  ;;  %v4092_v26 = vor.u32 %v4090_v8, %v4088_v21  ;;  %v4096_v24 = vrot.slane %v4094_v6, 1 }
 0x1f2   : > { %v1741_v61 = vpop.f32.mrf.mxu1  ;;  %v2593_v51 = vpop.f32.mrf.mxu0  ;;  %v4097_v13 = vsel %vm1209_vm2, %v4092_v26, %v4096_v24 }
 0x1f3   : > { %v10805_v10 = vadd.f32 %v2593_v51, %v1940_v63 }
 0x1f4   : > { %v1743_v52 = vpop.f32.mrf.mxu1  ;;  %v2595_v9 = vpop.f32.mrf.mxu0 }
 0x1f5   : > { %11979 = vst [vmem:[#allocation18_spill] sm:$0xff] %v10805_v10  ;;  %v10808_v39 = vadd.f32 %v2595_v9, %v1941_v11  ;;  %v4098_v9 = vshrl.u32 %v9785_v27, 16 }
 0x1f6   : > { %v1747_v44 = vpop.f32.mrf.mxu1  ;;  %v2599_v5 = vpop.f32.mrf.mxu0  ;;  %9304 = vmatmul.mubr.msk.bf16.gmra.mxu1 %vm586_vm1, %v9782_v41  ;;  %9354 = vmatmul.mubr.msk.bf16.gmra.mxu0 %vm586_vm1, %v4089_v1  ;;  %v9784_v1 = vld [vmem:[%s10049_s18 + $0xc4] sm:$0xff]  }
 0x1f7   : > { %11981 = vst [vmem:[#allocation19_spill] sm:$0xff] %v10808_v39  ;;  %v10814_v20 = vadd.f32 %v2599_v5, %v1942_v14  ;;  %3445 = vmatprep.mubr.bf16.mxu1 %v11937_v59  ;;  %4443 = vmatprep.mubr.bf16.mxu0 %v11937_v59  ;;  %v4102_v44 = vshll.u32 %v9786_v28, 16  ;;  %v9787_v14 = vld [vmem:[%s10049_s18 + $0xc] sm:$0xfe]   ;;  %v9788_v5 = vld [vmem:[%s10049_s18 + $0x14] sm:$0xff]   ;;  %v4100_v6 = vor.u32 %v4098_v9, %v4096_v24 }
 0x1f8   : > { %v1749_v63 = vpop.f32.mrf.mxu1  ;;  %v2601_v51 = vpop.f32.mrf.mxu0  ;;  %v11985_v39 = vld [vmem:[#allocation22_spill] sm:$0xff] }
 0x1f9   : > { %11983 = vst [vmem:[#allocation20_spill] sm:$0xff] %v10814_v20  ;;  %v10818_v60 = vadd.f32 %v2601_v51, %v1943_v12  ;;  %v1946_v10 = vadd.f32 %v1737_v34, %v11985_v39  ;;  %v4104_v12 = vrot.slane %v4102_v44, 1  ;;  %v9789_v63 = vld [vmem:[%s10049_s18 + $0xcc] ss:$0 sps:$4 sm:$0x11]   ;;  %v11986_v51 = vld [vmem:[#allocation23_spill] sm:$0xff] }
 0x1fa   : > { %v1751_v41 = vpop.f32.mrf.mxu1  ;;  %v2603_v11 = vpop.f32.mrf.mxu0  ;;  %v1947_v27 = vadd.f32 %v1739_v46, %v11986_v51  ;;  %v4937_v39 = vrot.slane %v9788_v5, 1  ;;  %v4106_v44 = vshrl.u32 %v9786_v28, 16  ;;  %v11989_v46 = vld [vmem:[#allocation25_spill] sm:$0xff] }
 0x1fb   : > { %11984 = vst [vmem:[#allocation21_spill] sm:$0xff] %v10818_v60  ;;  %v11988_v60 = vld [vmem:[#allocation24_spill] sm:$0xff]  ;;  %v4105_v51 = vsel %vm1209_vm2, %v4100_v6, %v4104_v12 }
 0x1fc   : > { %v1753_v16 = vpop.f32.mrf.mxu1  ;;  %v2605_v20 = vpop.f32.mrf.mxu0 }
 0x1fd   : > { %v4936_v20 = vrot.slane %v9787_v14, 1  ;;  %v9790_v14 = vld [vmem:[%s10049_s18 + $0x1c] sm:$0xff]  }
 0x1fe   : > { %v1757_v21 = vpop.f32.mrf.mxu1  ;;  %v2609_v8 = vpop.f32.mrf.mxu0  ;;  %9305 = vmatmul.mubr.msk.bf16.gmra.mxu1 %vm586_vm1, %v9784_v1  ;;  %9355 = vmatmul.mubr.msk.bf16.gmra.mxu0 %vm586_vm1, %v4097_v13  ;;  %v1948_v1 = vadd.f32 %v1741_v61, %v11988_v60  ;;  %v4110_v13 = vshll.u32 %v9789_v63, 16  ;;  %v6903_v61 = vsel %vm659_vm0, %v10619_v48, 0  ;;  %v11990_v48 = vld [vmem:[#allocation26_spill] sm:$0xff] }
 0x1ff   : > { %v10829_v11 = vadd.f32 %v2609_v8, %v1946_v10  ;;  %4453 = vmatprep.mubr.bf16.mxu0 %v11937_v59  ;;  %5104 = vmatprep.mubr.bf16.mxu1 %v11937_v59  ;;  %v1949_v10 = vadd.f32 %v1743_v52, %v11989_v46  ;;  %v4108_v52 = vor.u32 %v4106_v44, %v4104_v12 }
 0x200   : > { %v1759_v34 = vpop.f32.mrf.mxu1  ;;  %v2611_v26 = vpop.f32.mrf.mxu0  ;;  %v4112_v28 = vrot.slane %v4110_v13, 1 }
 0x201   : > { %11987 = vst [vmem:[#allocation22_spill] sm:$0xff] %v10829_v11  ;;  %v10834_v22 = vadd.f32 %v2611_v26, %v1947_v27  ;;  %v4938_v11 = vsel %vm2228_vm3, %v4936_v20, %v4937_v39  ;;  %v1952_v26 = vadd.f32 %v1751_v41, %v11990_v48  ;;  %v9792_v48 = vld [vmem:[%s10049_s18 + $0x18] sm:$0xff]  }
 0x202   : > { %v1761_v24 = vpop.f32.mrf.mxu1  ;;  %v2613_v9 = vpop.f32.mrf.mxu0  ;;  %v4113_v12 = vsel %vm1209_vm2, %v4108_v52, %v4112_v28 }
 0x203   : > { %v10837_v8 = vadd.f32 %v2613_v9, %v1948_v1 }
 0x204   : > { %v1763_v5 = vpop.f32.mrf.mxu1  ;;  %v2615_v30 = vpop.f32.mrf.mxu0 }
 0x205   : > { %v10842_v58 = vadd.f32 %v2615_v30, %v1949_v10  ;;  %v4939_v30 = vrot.slane %v9790_v14, 1  ;;  %v9791_v10 = vld [vmem:[%s10049_s18 + $0x24] sm:$0xff]  }
 0x206   : > { %v2619_v60 = vpop.f32.mrf.mxu0  ;;  %v3217_v27 = vpop.f32.mrf.mxu1  ;;  %9356 = vmatmul.mubr.msk.bf16.gmra.mxu0 %vm586_vm1, %v4105_v51  ;;  %9386 = vmatmul.mubr.msk.bf16.vlgmr.msra.gmra.mxu1 %vm586_vm1, %v4938_v11  ;;  %v11991_v11 = vld [vmem:[#allocation27_spill] sm:$0xff]  ;;  %v11992_v5 = vld [vmem:[#allocation28_spill] sm:$0xff] }
 0x207   : > { %v3552_v6 = vadd.f32 %v3217_v27, %v10500_v33  ;;  %4463 = vmatprep.mubr.bf16.mxu0 %v11937_v59  ;;  %5114 = vmatprep.mubr.bf16.mxu1 %v11937_v59  ;;  %v1953_v44 = vadd.f32 %v1753_v16, %v11991_v11  ;;  %v4940_v46 = vsel %vm2228_vm3, %v4937_v39, %v4939_v30  ;;  %v7774_v11 = vsel %vm659_vm0, %v10632_v19, 0 }
 0x208   : > { %v2621_v63 = vpop.f32.mrf.mxu0  ;;  %v3219_v20 = vpop.f32.mrf.mxu1  ;;  %6923 = vmatpush1.bf16.msra.mxu1 %v6903_v61  ;;  %v1954_v61 = vadd.f32 %v1757_v21, %v11992_v5  ;;  %v4941_v21 = vrot.slane %v9791_v10, 1 }
 0x209   : > { %v3553_v1 = vadd.f32 %v3219_v20, %v10505_v4 }
 0x20a   : > { %v2623_v24 = vpop.f32.mrf.mxu0  ;;  %v3221_v9 = vpop.f32.mrf.mxu1 }
 0x20b   : > { %v10855_v33 = vadd.f32 %v2623_v24, %v1952_v26  ;;  %v3554_v13 = vadd.f32 %v3221_v9, %v10509_v50  ;;  %v11993_v50 = vld [vmem:[#allocation29_spill] sm:$0xff]  ;;  %v4942_v24 = vsel %vm2228_vm3, %v4939_v30, %v4941_v21 }
 0x20c   : > { %v2625_v51 = vpop.f32.mrf.mxu0  ;;  %v3223_v14 = vpop.f32.mrf.mxu1  ;;  %v1955_v16 = vadd.f32 %v1759_v34, %v11993_v50  ;;  %v9793_v9 = vld [vmem:[%s10049_s18 + $0x2c] sm:$0xff]  }
 0x20d   : > { %v10861_v41 = vadd.f32 %v2625_v51, %v1953_v44  ;;  %v3555_v4 = vadd.f32 %v3223_v14, %v10512_v43  ;;  %v4943_v30 = vrot.slane %v9793_v9, 1  ;;  %v9796_v9 = vld [vmem:[%s10049_s18 + $0x28] sm:$0xff]  }
 0x20e   : > { %v2629_v60 = vpop.f32.mrf.mxu0  ;;  %v3227_v27 = vpop.f32.mrf.mxu1  ;;  %9357 = vmatmul.mubr.msk.bf16.gmra.mxu0 %vm586_vm1, %v4113_v12  ;;  %9387 = vmatmul.mubr.msk.bf16.gmra.mxu1 %vm586_vm1, %v4940_v46 }
 0x20f   : > { %v10867_v39 = vadd.f32 %v2629_v60, %v1954_v61  ;;  %5124 = vmatprep.mubr.bf16.mxu1 %v11937_v59  ;;  %5922 = vmatprep.mubr.bf16.mxu0 %v11937_v59  ;;  %v9794_v27 = vld [vmem:[%s10049_s18 + $0x20] sm:$0xff]  }
 0x210   : > { %v2631_v52 = vpop.f32.mrf.mxu0  ;;  %v3229_v28 = vpop.f32.mrf.mxu1 }
 0x211   : > { %v10871_v63 = vadd.f32 %v2631_v52, %v1955_v16 }
 0x212   : > { %v2633_v43 = vpop.f32.mrf.mxu0  ;;  %v3231_v20 = vpop.f32.mrf.mxu1 }
 0x213   : > { %v3558_v26 = vadd.f32 %v3231_v20, %v10523_v45 }
 0x214   : > { %v2635_v34 = vpop.f32.mrf.mxu0  ;;  %v3233_v12 = vpop.f32.mrf.mxu1 }
 0x215   : > { %v3559_v44 = vadd.f32 %v3233_v12, %v10526_v53 }
 0x216   : > { %v3237_v46 = vpop.f32.mrf.mxu1  ;;  %v4235_v10 = vpop.f32.mrf.mxu0  ;;  %9388 = vmatmul.mubr.msk.bf16.gmra.mxu1 %vm586_vm1, %v4942_v24  ;;  %9437 = vmatmul.mubr.msk.bf16.vlgmr.msra.gmra.mxu0 %vm586_vm1, %v9792_v48 }
 0x217   : > { %v3560_v45 = vadd.f32 %v3237_v46, %v10531_v55  ;;  %v10883_v51 = vadd.f32 %v4235_v10, %v3552_v6  ;;  %7794 = vmatpush1.bf16.msra.mxu0 %v7774_v11  ;;  %5134 = vmatprep.mubr.bf16.mxu1 %v11937_v59  ;;  %v4944_v55 = vsel %vm2228_vm3, %v4941_v21, %v4943_v30  ;;  %v9795_v6 = vld [vmem:[%s10049_s18 + $0x34] sm:$0xff]   ;;  %v9797_v46 = vld [vmem:[%s10049_s18 + $0x3c] sm:$0xff]  }
 0x218   : > { %v3239_v14 = vpop.f32.mrf.mxu1  ;;  %v4237_v19 = vpop.f32.mrf.mxu0  ;;  %5932 = vmatprep.mubr.bf16.mxu0 %v11937_v59 }
 0x219   : > { %v3561_v53 = vadd.f32 %v3239_v14, %v10536_v38  ;;  %v10888_v5 = vadd.f32 %v4237_v19, %v3553_v1  ;;  %v4945_v1 = vrot.slane %v9795_v6, 1 }
 0x21a   : > { %v3241_v61 = vpop.f32.mrf.mxu1  ;;  %v4239_v60 = vpop.f32.mrf.mxu0 }
 0x21b   : > { %v10891_v50 = vadd.f32 %v4239_v60, %v3554_v13  ;;  %v4946_v11 = vsel %vm2228_vm3, %v4943_v30, %v4945_v1 }
 0x21c   : > { %v3243_v16 = vpop.f32.mrf.mxu1  ;;  %v4241_v52 = vpop.f32.mrf.mxu0 }
 0x21d   : > { %v10895_v28 = vadd.f32 %v4241_v52, %v3555_v4  ;;  %v9799_v52 = vld [vmem:[%s10049_s18 + $0x44] sm:$0xff]  }
 0x21e   : > { %v3247_v43 = vpop.f32.mrf.mxu1  ;;  %v4245_v20 = vpop.f32.mrf.mxu0  ;;  %9389 = vmatmul.mubr.msk.bf16.gmra.mxu1 %vm586_vm1, %v4944_v55  ;;  %9438 = vmatmul.mubr.msk.bf16.gmra.mxu0 %vm586_vm1, %v9794_v27  ;;  %v9798_v55 = vld [vmem:[%s10049_s18 + $0x30] sm:$0xff]  }
 0x21f   : > { %v3564_v38 = vadd.f32 %v3247_v43, %v10545_v18  ;;  %5144 = vmatprep.mubr.bf16.mxu1 %v11937_v59  ;;  %5942 = vmatprep.mubr.bf16.mxu0 %v11937_v59 }
 0x220   : > { %v3249_v13 = vpop.f32.mrf.mxu1  ;;  %v4247_v21 = vpop.f32.mrf.mxu0 }
 0x221   : > { %v3565_v48 = vadd.f32 %v3249_v13, %v10550_v3 }
 0x222   : > { %v3251_v4 = vpop.f32.mrf.mxu1  ;;  %v4249_v24 = vpop.f32.mrf.mxu0 }
 0x223   : > { %v3566_v34 = vadd.f32 %v3251_v4, %v10554_v2  ;;  %v10905_v12 = vadd.f32 %v4249_v24, %v3558_v26  ;;  %v4947_v26 = vrot.slane %v9797_v46, 1 }
 0x224   : > { %v3253_v18 = vpop.f32.mrf.mxu1  ;;  %v4251_v10 = vpop.f32.mrf.mxu0 }
 0x225   : > { %v3567_v14 = vadd.f32 %v3253_v18, %v10557_v31  ;;  %v10910_v19 = vadd.f32 %v4251_v10, %v3559_v44  ;;  %v4948_v16 = vsel %vm2228_vm3, %v4945_v1, %v4947_v26  ;;  %v9800_v18 = vld [vmem:[%s10049_s18 + $0x38] sm:$0xff]  }
 0x226   : > { %v3257_v61 = vpop.f32.mrf.mxu1  ;;  %v4255_v3 = vpop.f32.mrf.mxu0  ;;  %9390 = vmatmul.mubr.msk.bf16.gmra.mxu1 %vm586_vm1, %v4946_v11  ;;  %9439 = vmatmul.mubr.msk.bf16.gmra.mxu0 %vm586_vm1, %v9796_v9 }
 0x227   : > { %v10914_v2 = vadd.f32 %v4255_v3, %v3560_v45  ;;  %5154 = vmatprep.mubr.bf16.mxu1 %v11937_v59  ;;  %5952 = vmatprep.mubr.bf16.mxu0 %v11937_v59 }
 0x228   : > { %v3259_v30 = vpop.f32.mrf.mxu1  ;;  %v4257_v60 = vpop.f32.mrf.mxu0 }
 0x229   : > { %v10918_v27 = vadd.f32 %v4257_v60, %v3561_v53 }
 0x22a   : > { %v3261_v31 = vpop.f32.mrf.mxu1  ;;  %v4259_v44 = vpop.f32.mrf.mxu0 }
 0x22b   : > { %v3570_v6 = vadd.f32 %v3261_v31, %v10568_v32  ;;  %v4949_v32 = vrot.slane %v9799_v52, 1 }
 0x22c   : > { %v3263_v43 = vpop.f32.mrf.mxu1  ;;  %v4261_v45 = vpop.f32.mrf.mxu0 }
 0x22d   : > { %v3571_v20 = vadd.f32 %v3263_v43, %v10571_v35 }
 0x22e   : > { %v3267_v13 = vpop.f32.mrf.mxu1  ;;  %v4265_v21 = vpop.f32.mrf.mxu0  ;;  %9391 = vmatmul.mubr.msk.bf16.gmra.mxu1 %vm586_vm1, %v4948_v16  ;;  %9440 = vmatmul.mubr.msk.bf16.gmra.mxu0 %vm586_vm1, %v9798_v55  ;;  %v9802_v16 = vld [vmem:[%s10049_s18 + $0x40] sm:$0xff]  }
 0x22f   : > { %v3572_v53 = vadd.f32 %v3267_v13, %v10576_v47  ;;  %v10928_v4 = vadd.f32 %v4265_v21, %v3564_v38  ;;  %5164 = vmatprep.mubr.bf16.mxu1 %v11937_v59  ;;  %5962 = vmatprep.mubr.bf16.mxu0 %v11937_v59  ;;  %v4950_v47 = vsel %vm2228_vm3, %v4947_v26, %v4949_v32  ;;  %v9801_v38 = vld [vmem:[%s10049_s18 + $0x4c] sm:$0xff]   ;;  %v9803_v13 = vld [vmem:[%s10049_s18 + $0x54] sm:$0xff]  }
 0x230   : > { %v3269_v1 = vpop.f32.mrf.mxu1  ;;  %v4267_v24 = vpop.f32.mrf.mxu0 }
 0x231   : > { %v3573_v35 = vadd.f32 %v3269_v1, %v10581_v36  ;;  %v10933_v9 = vadd.f32 %v4267_v24, %v3565_v48  ;;  %v4951_v48 = vrot.slane %v9801_v38, 1 }
 0x232   : > { %v3271_v11 = vpop.f32.mrf.mxu1  ;;  %v4269_v46 = vpop.f32.mrf.mxu0 }
 0x233   : > { %v10936_v10 = vadd.f32 %v4269_v46, %v3566_v34  ;;  %v4952_v45 = vsel %vm2228_vm3, %v4949_v32, %v4951_v48 }
 0x234   : > { %v3273_v61 = vpop.f32.mrf.mxu1  ;;  %v4271_v3 = vpop.f32.mrf.mxu0 }
 0x235   : > { %v10940_v30 = vadd.f32 %v4271_v3, %v3567_v14  ;;  %v9805_v3 = vld [vmem:[%s10049_s18 + $0x5c] sm:$0xff]  }
 0x236   : > { %v3277_v60 = vpop.f32.mrf.mxu1  ;;  %v4275_v31 = vpop.f32.mrf.mxu0  ;;  %9392 = vmatmul.mubr.msk.bf16.gmra.mxu1 %vm586_vm1, %v4950_v47  ;;  %9441 = vmatmul.mubr.msk.bf16.gmra.mxu0 %vm586_vm1, %v9800_v18  ;;  %v9804_v47 = vld [vmem:[%s10049_s18 + $0x48] sm:$0xff]  }
 0x237   : > { %v3576_v36 = vadd.f32 %v3277_v60, %v10590_v15  ;;  %5174 = vmatprep.mubr.bf16.mxu1 %v11937_v59  ;;  %5972 = vmatprep.mubr.bf16.mxu0 %v11937_v59 }
 0x238   : > { %v3279_v34 = vpop.f32.mrf.mxu1  ;;  %v4277_v26 = vpop.f32.mrf.mxu0 }
 0x239   : > { %v3577_v44 = vadd.f32 %v3279_v34, %v10595_v29 }
 0x23a   : > { %v3281_v14 = vpop.f32.mrf.mxu1  ;;  %v4279_v55 = vpop.f32.mrf.mxu0 }
 0x23b   : > { %v3578_v52 = vadd.f32 %v3281_v14, %v10599_v49  ;;  %v10950_v43 = vadd.f32 %v4279_v55, %v3570_v6  ;;  %v4953_v6 = vrot.slane %v9803_v13, 1 }
 0x23c   : > { %v3283_v15 = vpop.f32.mrf.mxu1  ;;  %v4281_v21 = vpop.f32.mrf.mxu0 }
 0x23d   : > { %v3579_v1 = vadd.f32 %v3283_v15, %v10602_v42  ;;  %v10955_v24 = vadd.f32 %v4281_v21, %v3571_v20  ;;  %v4954_v61 = vsel %vm2228_vm3, %v4951_v48, %v4953_v6  ;;  %v9806_v21 = vld [vmem:[%s10049_s18 + $0x50] sm:$0xff]  }
 0x23e   : > { %v3287_v11 = vpop.f32.mrf.mxu1  ;;  %v4285_v29 = vpop.f32.mrf.mxu0  ;;  %9393 = vmatmul.mubr.msk.bf16.gmra.mxu1 %vm586_vm1, %v4952_v45  ;;  %9442 = vmatmul.mubr.msk.bf16.gmra.mxu0 %vm586_vm1, %v9802_v16 }
 0x23f   : > { %v10959_v49 = vadd.f32 %v4285_v29, %v3572_v53  ;;  %5184 = vmatprep.mubr.bf16.mxu1 %v11937_v59  ;;  %5982 = vmatprep.mubr.bf16.mxu0 %v11937_v59 }
 0x240   : > { %v3289_v32 = vpop.f32.mrf.mxu1  ;;  %v4287_v46 = vpop.f32.mrf.mxu0 }
 0x241   : > { %v10963_v18 = vadd.f32 %v4287_v46, %v3573_v35 }
 0x242   : > { %v3291_v42 = vpop.f32.mrf.mxu1  ;;  %v4289_v20 = vpop.f32.mrf.mxu0 }
 0x243   : > { %v3582_v38 = vadd.f32 %v3291_v42, %v10613_v62  ;;  %v4955_v62 = vrot.slane %v9805_v3, 1 }
 0x244   : > { %v3293_v60 = vpop.f32.mrf.mxu1  ;;  %v4291_v53 = vpop.f32.mrf.mxu0 }
 0x245   : > { %v3583_v31 = vadd.f32 %v3293_v60, %v10616_v40  ;;  %v11994_v40 = vld [vmem:[#allocation30_spill] sm:$0xff] }
 0x246   : > { %v3297_v34 = vpop.f32.mrf.mxu1  ;;  %v4295_v26 = vpop.f32.mrf.mxu0  ;;  %9394 = vmatmul.mubr.msk.bf16.gmra.mxu1 %vm586_vm1, %v4954_v61  ;;  %9443 = vmatmul.mubr.msk.bf16.gmra.mxu0 %vm586_vm1, %v9804_v47  ;;  %v9808_v60 = vld [vmem:[%s10049_s18 + $0x58] sm:$0xff]  }
 0x247   : > { %v3584_v35 = vadd.f32 %v3297_v34, %v10626_v25  ;;  %v10973_v14 = vadd.f32 %v4295_v26, %v3576_v36  ;;  %5194 = vmatprep.mubr.bf16.mxu1 %v11937_v59  ;;  %5992 = vmatprep.mubr.bf16.mxu0 %v11937_v59  ;;  %v4956_v25 = vsel %vm2228_vm3, %v4953_v6, %v4955_v62  ;;  %v9807_v36 = vld [vmem:[%s10049_s18 + $0x64] sm:$0xff]  }
 0x248   : > { %v3299_v48 = vpop.f32.mrf.mxu1  ;;  %v4297_v55 = vpop.f32.mrf.mxu0 }
 0x249   : > { %v3585_v16 = vadd.f32 %v3299_v48, %v11994_v40  ;;  %v10978_v45 = vadd.f32 %v4297_v55, %v3577_v44  ;;  %v9809_v48 = vld [vmem:[%s10049_s18 + $0x6c] sm:$0xff]  }
 0x24a   : > { %v3301_v13 = vpop.f32.mrf.mxu1  ;;  %v4299_v15 = vpop.f32.mrf.mxu0 }
 0x24b   : > { %v10981_v11 = vadd.f32 %v4299_v15, %v3578_v52  ;;  %v4957_v52 = vrot.slane %v9807_v36, 1  ;;  %v9810_v36 = vld [vmem:[%s10049_s18 + $0x60] sm:$0xff]  }
 0x24c   : > { %v3303_v29 = vpop.f32.mrf.mxu1  ;;  %v4301_v32 = vpop.f32.mrf.mxu0 }
 0x24d   : > { %v10985_v46 = vadd.f32 %v4301_v32, %v3579_v1  ;;  %v4958_v26 = vsel %vm2228_vm3, %v4955_v62, %v4957_v52 }
 0x24e   : > { %v3307_v42 = vpop.f32.mrf.mxu1  ;;  %v4305_v20 = vpop.f32.mrf.mxu0  ;;  %9395 = vmatmul.mubr.msk.bf16.gmra.mxu1 %vm586_vm1, %v4956_v25  ;;  %9444 = vmatmul.mubr.msk.bf16.gmra.mxu0 %vm586_vm1, %v9806_v21 }
 0x24f   : > { %v3588_v44 = vadd.f32 %v3307_v42, %v10647_v54  ;;  %5204 = vmatprep.mubr.bf16.mxu1 %v11937_v59  ;;  %6002 = vmatprep.mubr.bf16.mxu0 %v11937_v59  ;;  %v9811_v42 = vld [vmem:[%s10049_s18 + $0x74] sm:$0xff]  }
 0x250   : > { %v3309_v6 = vpop.f32.mrf.mxu1  ;;  %v4307_v47 = vpop.f32.mrf.mxu0 }
 0x251   : > { %v3589_v61 = vadd.f32 %v3309_v6, %v10652_v0 }
 0x252   : > { %v3311_v1 = vpop.f32.mrf.mxu1  ;;  %v4309_v3 = vpop.f32.mrf.mxu0 }
 0x253   : > { %v3590_v53 = vadd.f32 %v3311_v1, %v10656_v7  ;;  %v10995_v34 = vadd.f32 %v4309_v3, %v3582_v38  ;;  %v4959_v38 = vrot.slane %v9809_v48, 1 }
 0x254   : > { %v3313_v54 = vpop.f32.mrf.mxu1  ;;  %v4311_v55 = vpop.f32.mrf.mxu0 }
 0x255   : > { %v3591_v40 = vadd.f32 %v3313_v54, %v10659_v56  ;;  %v11000_v13 = vadd.f32 %v4311_v55, %v3583_v31  ;;  %v4960_v32 = vsel %vm2228_vm3, %v4957_v52, %v4959_v38  ;;  %v9812_v55 = vld [vmem:[%s10049_s18 + $0x68] sm:$0xff]  }
 0x256   : > { %v3317_v15 = vpop.f32.mrf.mxu1  ;;  %v4315_v0 = vpop.f32.mrf.mxu0  ;;  %9396 = vmatmul.mubr.msk.bf16.gmra.mxu1 %vm586_vm1, %v4958_v26  ;;  %9445 = vmatmul.mubr.msk.bf16.gmra.mxu0 %vm586_vm1, %v9808_v60 }
 0x257   : > { %v11004_v7 = vadd.f32 %v4315_v0, %v3584_v35  ;;  %5214 = vmatprep.mubr.bf16.mxu1 %v11937_v59  ;;  %6012 = vmatprep.mubr.bf16.mxu0 %v11937_v59 }
 0x258   : > { %v3319_v62 = vpop.f32.mrf.mxu1  ;;  %v4317_v21 = vpop.f32.mrf.mxu0 }
 0x259   : > { %v11008_v25 = vadd.f32 %v4317_v21, %v3585_v16 }
 0x25a   : > { %v3321_v56 = vpop.f32.mrf.mxu1  ;;  %v4319_v31 = vpop.f32.mrf.mxu0 }
 0x25b   : > { %v3594_v29 = vadd.f32 %v3321_v56, %v10670_v23  ;;  %v4961_v23 = vrot.slane %v9811_v42, 1 }
 0x25c   : > { %v3323_v20 = vpop.f32.mrf.mxu1  ;;  %v4321_v35 = vpop.f32.mrf.mxu0 }
 0x25d   : > { %v3595_v6 = vadd.f32 %v3323_v20, %v10673_v57  ;;  %v9814_v35 = vld [vmem:[%s10049_s18 + $0x70] sm:$0xff]  }
 0x25e   : > { %v3327_v47 = vpop.f32.mrf.mxu1  ;;  %v4325_v1 = vpop.f32.mrf.mxu0  ;;  %9397 = vmatmul.mubr.msk.bf16.gmra.mxu1 %vm586_vm1, %v4960_v32  ;;  %9446 = vmatmul.mubr.msk.bf16.gmra.mxu0 %vm586_vm1, %v9810_v36  ;;  %v11996_v32 = vld [vmem:[#allocation32_spill] sm:$0xff] }
 0x25f   : > { %v3596_v16 = vadd.f32 %v3327_v47, %v10678_v17  ;;  %v11018_v3 = vadd.f32 %v4325_v1, %v3588_v44  ;;  %5224 = vmatprep.mubr.bf16.mxu1 %v11937_v59  ;;  %6022 = vmatprep.mubr.bf16.mxu0 %v11937_v59  ;;  %v4962_v17 = vsel %vm2228_vm3, %v4959_v38, %v4961_v23  ;;  %v9813_v44 = vld [vmem:[%s10049_s18 + $0x7c] sm:$0xff]   ;;  %v11997_v47 = vld [vmem:[#allocation33_spill] sm:$0xff] }
 0x260   : > { %v3329_v52 = vpop.f32.mrf.mxu1  ;;  %v4327_v60 = vpop.f32.mrf.mxu0 }
 0x261   : > { %v3597_v57 = vadd.f32 %v3329_v52, %v10683_v37  ;;  %v11023_v26 = vadd.f32 %v4327_v60, %v3589_v61  ;;  %v11995_v37 = vld [vmem:[#allocation31_spill] sm:$0xff] }
 0x262   : > { %v3331_v48 = vpop.f32.mrf.mxu1  ;;  %v4329_v54 = vpop.f32.mrf.mxu0 }
 0x263   : > { %v11026_v15 = vadd.f32 %v4329_v54, %v3590_v53  ;;  %v4963_v53 = vrot.slane %v9813_v44, 1  ;;  %v9815_v48 = vld [vmem:[%s10049_s18 + $0x84] sm:$0xff]  }
 0x264   : > { %v3333_v0 = vpop.f32.mrf.mxu1  ;;  %v4331_v62 = vpop.f32.mrf.mxu0 }
 0x265   : > { %v11030_v21 = vadd.f32 %v4331_v62, %v3591_v40  ;;  %v4964_v60 = vsel %vm2228_vm3, %v4961_v23, %v4963_v53 }
 0x266   : > { %v3337_v56 = vpop.f32.mrf.mxu1  ;;  %v4335_v31 = vpop.f32.mrf.mxu0  ;;  %9398 = vmatmul.mubr.msk.bf16.gmra.mxu1 %vm586_vm1, %v4962_v17  ;;  %9447 = vmatmul.mubr.msk.bf16.gmra.mxu0 %vm586_vm1, %v9812_v55  ;;  %v11998_v17 = vld [vmem:[#allocation34_spill] sm:$0xff] }
 0x267   : > { %v3600_v61 = vadd.f32 %v3337_v56, %v11995_v37  ;;  %5234 = vmatprep.mubr.bf16.mxu1 %v11937_v59  ;;  %6032 = vmatprep.mubr.bf16.mxu0 %v11937_v59 }
 0x268   : > { %v3339_v38 = vpop.f32.mrf.mxu1  ;;  %v4337_v36 = vpop.f32.mrf.mxu0 }
 0x269   : > { %v3601_v42 = vadd.f32 %v3339_v38, %v11996_v32  ;;  %v9816_v32 = vld [vmem:[%s10049_s18 + $0x78] sm:$0xff]  }
 0x26a   : > { %v3341_v40 = vpop.f32.mrf.mxu1  ;;  %v4339_v20 = vpop.f32.mrf.mxu0 }
 0x26b   : > { %v3602_v1 = vadd.f32 %v3341_v40, %v11997_v47  ;;  %v11040_v52 = vadd.f32 %v4339_v20, %v3594_v29  ;;  %v4965_v29 = vrot.slane %v9815_v48, 1  ;;  %v11999_v40 = vld [vmem:[#allocation35_spill] sm:$0xff] }
 0x26c   : > { %v3343_v54 = vpop.f32.mrf.mxu1  ;;  %v4341_v55 = vpop.f32.mrf.mxu0 }
 0x26d   : > { %v3603_v0 = vadd.f32 %v3343_v54, %v11998_v17  ;;  %v11045_v44 = vadd.f32 %v4341_v55, %v3595_v6  ;;  %v4966_v47 = vsel %vm2228_vm3, %v4963_v53, %v4965_v29  ;;  %v12000_v54 = vld [vmem:[#allocation4_spill] sm:$0xff] }
 0x26e   : > { %v3347_v62 = vpop.f32.mrf.mxu1  ;;  %v4345_v56 = vpop.f32.mrf.mxu0  ;;  %9399 = vmatmul.mubr.msk.bf16.gmra.mxu1 %vm586_vm1, %v4964_v60  ;;  %9448 = vmatmul.mubr.msk.bf16.gmra.mxu0 %vm586_vm1, %v9814_v35  ;;  %v9817_v60 = vld [vmem:[%s10049_s18 + $0x8c] sm:$0xff]  }
 0x26f   : > { %v11049_v31 = vadd.f32 %v4345_v56, %v3596_v16  ;;  %5244 = vmatprep.mubr.bf16.mxu1 %v11937_v59  ;;  %6042 = vmatprep.mubr.bf16.mxu0 %v11937_v59  ;;  %v4967_v53 = vrot.slane %v9817_v60, 1 }
 0x270   : > { %v3349_v23 = vpop.f32.mrf.mxu1  ;;  %v4347_v37 = vpop.f32.mrf.mxu0 }
 0x271   : > { %v11053_v38 = vadd.f32 %v4347_v37, %v3597_v57  ;;  %v12001_v57 = vld [vmem:[#allocation5_spill] sm:$0xff] }
 0x272   : > { %v3351_v6 = vpop.f32.mrf.mxu1  ;;  %v4349_v36 = vpop.f32.mrf.mxu0 }
 0x273   : > { %v3606_v20 = vadd.f32 %v3351_v6, %v11999_v40  ;;  %v12003_v6 = vld [vmem:[#allocation36_spill] sm:$0xff] }
 0x274   : > { %v3353_v35 = vpop.f32.mrf.mxu1  ;;  %v4351_v16 = vpop.f32.mrf.mxu0 }
 0x275   : > { %v3607_v55 = vadd.f32 %v3353_v35, %v12000_v54  ;;  %v9818_v16 = vld [vmem:[%s10049_s18 + $0x80] sm:$0xff]  }
 0x276   : > { %v3357_v17 = vpop.f32.mrf.mxu1  ;;  %v4355_v62 = vpop.f32.mrf.mxu0  ;;  %9400 = vmatmul.mubr.msk.bf16.gmra.mxu1 %vm586_vm1, %v4966_v47  ;;  %9449 = vmatmul.mubr.msk.bf16.gmra.mxu0 %vm586_vm1, %v9816_v32  ;;  %v4968_v32 = vsel %vm2228_vm3, %v4965_v29, %v4967_v53 }
 0x277   : > { %v3608_v48 = vadd.f32 %v3357_v17, %v12001_v57  ;;  %v11063_v56 = vadd.f32 %v4355_v62, %v3600_v61  ;;  %5254 = vmatprep.mubr.bf16.mxu1 %v11937_v59  ;;  %6052 = vmatprep.mubr.bf16.mxu0 %v11937_v59  ;;  %v9819_v61 = vld [vmem:[%s10049_s18 + $0x94] sm:$0xff]  }
 0x278   : > { %v3359_v23 = vpop.f32.mrf.mxu1  ;;  %v4357_v37 = vpop.f32.mrf.mxu0 }
 0x279   : > { %12002 = vst [vmem:[#allocation23_spill] sm:$0xff] %v11063_v56  ;;  %v3609_v36 = vadd.f32 %v3359_v23, %v12003_v6  ;;  %v11068_v40 = vadd.f32 %v4357_v37, %v3601_v42  ;;  %v12007_v42 = vld [vmem:[#allocation6_spill] sm:$0xff]  ;;  %v12008_v6 = vld [vmem:[#allocation7_spill] sm:$0xff] }
 0x27a   : > { %v3361_v35 = vpop.f32.mrf.mxu1  ;;  %v4359_v47 = vpop.f32.mrf.mxu0 }
 0x27b   : > { %12004 = vst [vmem:[#allocation24_spill] sm:$0xff] %v11068_v40  ;;  %v11071_v54 = vadd.f32 %v4359_v47, %v3602_v1  ;;  %v4969_v1 = vrot.slane %v9819_v61, 1 }
 0x27c   : > { %v3363_v17 = vpop.f32.mrf.mxu1  ;;  %v4361_v62 = vpop.f32.mrf.mxu0 }
 0x27d   : > { %12005 = vst [vmem:[#allocation25_spill] sm:$0xff] %v11071_v54  ;;  %v11075_v57 = vadd.f32 %v4361_v62, %v3603_v0  ;;  %v9820_v17 = vld [vmem:[%s10049_s18 + $0x88] sm:$0xff]   ;;  %v12011_v54 = vld [vmem:[#allocation9_spill] sm:$0xff] }
 0x27e   : > { %v3367_v60 = vpop.f32.mrf.mxu1  ;;  %v4365_v56 = vpop.f32.mrf.mxu0  ;;  %9401 = vmatmul.mubr.msk.bf16.gmra.mxu1 %vm586_vm1, %v4968_v32  ;;  %9450 = vmatmul.mubr.msk.bf16.gmra.mxu0 %vm586_vm1, %v9818_v16  ;;  %v4970_v16 = vsel %vm2228_vm3, %v4967_v53, %v4969_v1  ;;  %v9821_v32 = vld [vmem:[%s10049_s18 + $0x9c] sm:$0xff]  }
 0x27f   : > { %12006 = vst [vmem:[#allocation26_spill] sm:$0xff] %v11075_v57  ;;  %v3612_v23 = vadd.f32 %v3367_v60, %v12007_v42  ;;  %5264 = vmatprep.mubr.bf16.mxu1 %v11937_v59  ;;  %6062 = vmatprep.mubr.bf16.mxu0 %v11937_v59  ;;  %v12009_v56 = vld [vmem:[#allocation8_spill] sm:$0xff] }
 0x280   : > { %v3369_v29 = vpop.f32.mrf.mxu1  ;;  %v4367_v37 = vpop.f32.mrf.mxu0 }
 0x281   : > { %v3613_v35 = vadd.f32 %v3369_v29, %v12008_v6 }
 0x282   : > { %v3371_v0 = vpop.f32.mrf.mxu1  ;;  %v4369_v47 = vpop.f32.mrf.mxu0 }
 0x283   : > { %v3614_v62 = vadd.f32 %v3371_v0, %v12009_v56  ;;  %v11085_v57 = vadd.f32 %v4369_v47, %v3606_v20  ;;  %v4971_v20 = vrot.slane %v9821_v32, 1  ;;  %v9822_v56 = vld [vmem:[%s10049_s18 + $0x90] sm:$0xff]  }
 0x284   : > { %v3373_v60 = vpop.f32.mrf.mxu1  ;;  %v4371_v42 = vpop.f32.mrf.mxu0 }
 0x285   : > { %12010 = vst [vmem:[#allocation27_spill] sm:$0xff] %v11085_v57  ;;  %v3615_v40 = vadd.f32 %v3373_v60, %v12011_v54  ;;  %v11090_v61 = vadd.f32 %v4371_v42, %v3607_v55  ;;  %v12015_v60 = vld [vmem:[#allocation10_spill] sm:$0xff] }
 0x286   : > { %v3377_v37 = vpop.f32.mrf.mxu1  ;;  %v4375_v29 = vpop.f32.mrf.mxu0  ;;  %9402 = vmatmul.mubr.msk.bf16.gmra.mxu1 %vm586_vm1, %v4970_v16  ;;  %9451 = vmatmul.mubr.msk.bf16.gmra.mxu0 %vm586_vm1, %v9820_v17  ;;  %v4972_v16 = vsel %vm2228_vm3, %v4969_v1, %v4971_v20 }
 0x287   : > { %12012 = vst [vmem:[#allocation28_spill] sm:$0xff] %v11090_v61  ;;  %v11094_v6 = vadd.f32 %v4375_v29, %v3608_v48  ;;  %5274 = vmatprep.mubr.bf16.mxu1 %v11937_v59  ;;  %6072 = vmatprep.mubr.bf16.mxu0 %v11937_v59  ;;  %v9823_v37 = vld [vmem:[%s10049_s18 + $0xa4] sm:$0xff]  }
 0x288   : > { %v3379_v53 = vpop.f32.mrf.mxu1  ;;  %v4377_v0 = vpop.f32.mrf.mxu0  ;;  %v12016_v29 = vld [vmem:[#allocation11_spill] sm:$0xff]  ;;  %v4973_v1 = vrot.slane %v9823_v37, 1 }
 0x289   : > { %12013 = vst [vmem:[#allocation29_spill] sm:$0xff] %v11094_v6  ;;  %v11098_v47 = vadd.f32 %v4377_v0, %v3609_v36  ;;  %v12017_v36 = vld [vmem:[#allocation12_spill] sm:$0xff] }
 0x28a   : > { %v3381_v55 = vpop.f32.mrf.mxu1  ;;  %v4379_v54 = vpop.f32.mrf.mxu0 }
 0x28b   : > { %12014 = vst [vmem:[#allocation30_spill] sm:$0xff] %v11098_v47  ;;  %v3618_v42 = vadd.f32 %v3381_v55, %v12015_v60  ;;  %v12019_v54 = vld [vmem:[#allocation13_spill] sm:$0xff] }
 0x28c   : > { %v3383_v17 = vpop.f32.mrf.mxu1  ;;  %v4381_v48 = vpop.f32.mrf.mxu0 }
 0x28d   : > { %v3619_v6 = vadd.f32 %v3383_v17, %v12016_v29  ;;  %v9824_v29 = vld [vmem:[%s10049_s18 + $0x98] sm:$0xff]  }
 0x28e   : > { %v3387_v61 = vpop.f32.mrf.mxu1  ;;  %v4385_v57 = vpop.f32.mrf.mxu0  ;;  %9403 = vmatmul.mubr.msk.bf16.gmra.mxu1 %vm586_vm1, %v4972_v16  ;;  %9452 = vmatmul.mubr.msk.bf16.gmra.mxu0 %vm586_vm1, %v9822_v56 }
 0x28f   : > { %v3620_v32 = vadd.f32 %v3387_v61, %v12017_v36  ;;  %v11108_v53 = vadd.f32 %v4385_v57, %v3612_v23  ;;  %5284 = vmatprep.mubr.bf16.mxu1 %v11937_v59  ;;  %6082 = vmatprep.mubr.bf16.mxu0 %v11937_v59  ;;  %v4974_v61 = vsel %vm2228_vm3, %v4971_v20, %v4973_v1  ;;  %v9825_v57 = vld [vmem:[%s10049_s18 + $0xac] sm:$0xff]  }
 0x290   : > { %v3389_v0 = vpop.f32.mrf.mxu1  ;;  %v4387_v55 = vpop.f32.mrf.mxu0 }
 0x291   : > { %12018 = vst [vmem:[#allocation31_spill] sm:$0xff] %v11108_v53  ;;  %v3621_v60 = vadd.f32 %v3389_v0, %v12019_v54  ;;  %v11113_v17 = vadd.f32 %v4387_v55, %v3613_v35  ;;  %v12023_v35 = vld [vmem:[#allocation14_spill] sm:$0xff]  ;;  %v12024_v54 = vld [vmem:[#allocation15_spill] sm:$0xff] }
 0x292   : > { %v3391_v48 = vpop.f32.mrf.mxu1  ;;  %v4389_v16 = vpop.f32.mrf.mxu0 }
 0x293   : > { %12020 = vst [vmem:[#allocation32_spill] sm:$0xff] %v11113_v17  ;;  %v11116_v47 = vadd.f32 %v4389_v16, %v3614_v62  ;;  %v4975_v62 = vrot.slane %v9825_v57, 1 }
 0x294   : > { %v3393_v23 = vpop.f32.mrf.mxu1  ;;  %v4391_v56 = vpop.f32.mrf.mxu0 }
 0x295   : > { %12021 = vst [vmem:[#allocation33_spill] sm:$0xff] %v11116_v47  ;;  %v11120_v36 = vadd.f32 %v4391_v56, %v3615_v40  ;;  %v9826_v23 = vld [vmem:[%s10049_s18 + $0xa0] sm:$0xff]   ;;  %v12027_v47 = vld [vmem:[#allocation17_spill] sm:$0xff] }
 0x296   : > { %v3397_v37 = vpop.f32.mrf.mxu1  ;;  %v4395_v53 = vpop.f32.mrf.mxu0  ;;  %9404 = vmatmul.mubr.msk.bf16.gmra.mxu1 %vm586_vm1, %v4974_v61  ;;  %9453 = vmatmul.mubr.msk.bf16.gmra.mxu0 %vm586_vm1, %v9824_v29  ;;  %v4976_v29 = vsel %vm2228_vm3, %v4973_v1, %v4975_v62  ;;  %v9827_v61 = vld [vmem:[%s10049_s18 + $0xb4] sm:$0xff]  }
 0x297   : > { %12022 = vst [vmem:[#allocation34_spill] sm:$0xff] %v11120_v36  ;;  %v3624_v0 = vadd.f32 %v3397_v37, %v12023_v35  ;;  %5294 = vmatprep.mubr.bf16.mxu1 %v11937_v59  ;;  %6092 = vmatprep.mubr.bf16.mxu0 %v11937_v59  ;;  %v12025_v53 = vld [vmem:[#allocation16_spill] sm:$0xff] }
 0x298   : > { %v3399_v20 = vpop.f32.mrf.mxu1  ;;  %v4397_v55 = vpop.f32.mrf.mxu0 }
 0x299   : > { %v3625_v48 = vadd.f32 %v3399_v20, %v12024_v54 }
 0x29a   : > { %v3401_v40 = vpop.f32.mrf.mxu1  ;;  %v4399_v16 = vpop.f32.mrf.mxu0 }
 0x29b   : > { %v3626_v56 = vadd.f32 %v3401_v40, %v12025_v53  ;;  %v11130_v36 = vadd.f32 %v4399_v16, %v3618_v42  ;;  %v4977_v42 = vrot.slane %v9827_v61, 1  ;;  %v9828_v53 = vld [vmem:[%s10049_s18 + $0xa8] sm:$0xff]  }
 0x29c   : > { %v3403_v37 = vpop.f32.mrf.mxu1  ;;  %v4401_v35 = vpop.f32.mrf.mxu0 }
 0x29d   : > { %12026 = vst [vmem:[#allocation35_spill] sm:$0xff] %v11130_v36  ;;  %v3627_v17 = vadd.f32 %v3403_v37, %v12027_v47  ;;  %v11135_v57 = vadd.f32 %v4401_v35, %v3619_v6  ;;  %v12031_v37 = vld [vmem:[#allocation18_spill] sm:$0xff] }
 0x29e   : > { %v3407_v55 = vpop.f32.mrf.mxu1  ;;  %v4405_v20 = vpop.f32.mrf.mxu0  ;;  %9405 = vmatmul.mubr.msk.bf16.gmra.mxu1 %vm586_vm1, %v4976_v29  ;;  %9454 = vmatmul.mubr.msk.bf16.gmra.mxu0 %vm586_vm1, %v9826_v23  ;;  %v4978_v29 = vsel %vm2228_vm3, %v4975_v62, %v4977_v42 }
 0x29f   : > { %12028 = vst [vmem:[#allocation4_spill] sm:$0xff] %v11135_v57  ;;  %v11139_v54 = vadd.f32 %v4405_v20, %v3620_v32  ;;  %5304 = vmatprep.mubr.bf16.mxu1 %v11937_v59  ;;  %6102 = vmatprep.mubr.bf16.mxu0 %v11937_v59  ;;  %v9829_v55 = vld [vmem:[%s10049_s18 + $0xbc] sm:$0xff]  }
 0x2a0   : > { %v3409_v1 = vpop.f32.mrf.mxu1  ;;  %v4407_v40 = vpop.f32.mrf.mxu0  ;;  %v12032_v20 = vld [vmem:[#allocation19_spill] sm:$0xff]  ;;  %v4979_v62 = vrot.slane %v9829_v55, 1 }
 0x2a1   : > { %12029 = vst [vmem:[#allocation5_spill] sm:$0xff] %v11139_v54  ;;  %v11143_v16 = vadd.f32 %v4407_v40, %v3621_v60  ;;  %v12033_v60 = vld [vmem:[#allocation20_spill] sm:$0xff] }
 0x2a2   : > { %v3411_v6 = vpop.f32.mrf.mxu1  ;;  %v4409_v47 = vpop.f32.mrf.mxu0 }
 0x2a3   : > { %12030 = vst [vmem:[#allocation36_spill] sm:$0xff] %v11143_v16  ;;  %v3630_v35 = vadd.f32 %v3411_v6, %v12031_v37  ;;  %v12035_v47 = vld [vmem:[#allocation21_spill] sm:$0xff] }
 0x2a4   : > { %v3413_v23 = vpop.f32.mrf.mxu1  ;;  %v4411_v32 = vpop.f32.mrf.mxu0 }
 0x2a5   : > { %v3631_v54 = vadd.f32 %v3413_v23, %v12032_v20  ;;  %v9830_v20 = vld [vmem:[%s10049_s18 + $0xb0] sm:$0xff]  }
 0x2a6   : > { %v3417_v57 = vpop.f32.mrf.mxu1  ;;  %v4415_v36 = vpop.f32.mrf.mxu0  ;;  %9406 = vmatmul.mubr.msk.bf16.gmra.mxu1 %vm586_vm1, %v4978_v29  ;;  %9455 = vmatmul.mubr.msk.bf16.gmra.mxu0 %vm586_vm1, %v9828_v53 }
 0x2a7   : > { %v3632_v61 = vadd.f32 %v3417_v57, %v12033_v60  ;;  %v11153_v1 = vadd.f32 %v4415_v36, %v3624_v0  ;;  %5314 = vmatprep.mubr.bf16.mxu1 %v11937_v59  ;;  %6112 = vmatprep.mubr.bf16.mxu0 %v11937_v59  ;;  %v4980_v57 = vsel %vm2228_vm3, %v4977_v42, %v4979_v62  ;;  %v9831_v36 = vld [vmem:[%s10049_s18 + $0xc4] sm:$0xff]  }
 0x2a8   : > { %v3419_v40 = vpop.f32.mrf.mxu1  ;;  %v4417_v6 = vpop.f32.mrf.mxu0 }
 0x2a9   : > { %12034 = vst [vmem:[#allocation6_spill] sm:$0xff] %v11153_v1  ;;  %v3633_v37 = vadd.f32 %v3419_v40, %v12035_v47  ;;  %v11158_v23 = vadd.f32 %v4417_v6, %v3625_v48  ;;  %v12037_v48 = vld [vmem:[#allocation22_spill] sm:$0xff] }
 0x2aa   : > { %v3421_v32 = vpop.f32.mrf.mxu1  ;;  %v4419_v29 = vpop.f32.mrf.mxu0 }
 0x2ab   : > { %v11161_v16 = vadd.f32 %v4419_v29, %v3626_v56  ;;  %v4981_v56 = vrot.slane %v9831_v36, 1  ;;  %v9832_v29 = vld [vmem:[%s10049_s18 + $0xb8] sm:$0xff]  }
 0x2ac   : > { %v3423_v0 = vpop.f32.mrf.mxu1  ;;  %v4421_v53 = vpop.f32.mrf.mxu0 }
 0x2ad   : > { %v11165_v60 = vadd.f32 %v4421_v53, %v3627_v17  ;;  %v9836_v53 = vld [vmem:[%s10049_s18 + $0x18] sm:$0xff]  }
 0x2ae   : > { %v3427_v55 = vpop.f32.mrf.mxu1  ;;  %v4425_v1 = vpop.f32.mrf.mxu0  ;;  %9407 = vmatmul.mubr.msk.bf16.gmra.mxu1 %vm586_vm1, %v4980_v57  ;;  %9456 = vmatmul.mubr.msk.bf16.gmra.mxu0 %vm586_vm1, %v9830_v20  ;;  %v4982_v20 = vsel %vm2228_vm3, %v4979_v62, %v4981_v56  ;;  %v6628_v62 = vshll.u32 %v9836_v53, 16 }
 0x2af   : > { %12036 = vst [vmem:[#allocation7_spill] sm:$0xff] %v11165_v60  ;;  %v3636_v40 = vadd.f32 %v3427_v55, %v12037_v48  ;;  %5324 = vmatprep.mubr.bf16.mxu1 %v11937_v59  ;;  %6122 = vmatprep.mubr.bf16.mxu0 %v11937_v59  ;;  %v9833_v1 = vld [vmem:[%s10049_s18 + $0xcc] ss:$0 sps:$4 sm:$0x11]  }
 0x2b0   : > { %v3429_v42 = vpop.f32.mrf.mxu1  ;;  %v4427_v6 = vpop.f32.mrf.mxu0 }
 0x2b1   : > { %v3637_v47 = vadd.f32 %v3429_v42, %v10834_v22 }
 0x2b2   : > { %v3431_v17 = vpop.f32.mrf.mxu1  ;;  %v4429_v32 = vpop.f32.mrf.mxu0 }
 0x2b3   : > { %v3638_v57 = vadd.f32 %v3431_v17, %v10837_v8  ;;  %v11176_v0 = vadd.f32 %v4429_v32, %v3630_v35  ;;  %v4983_v8 = vrot.slane %v9833_v1, 1  ;;  %v9837_v35 = vld [vmem:[%s10049_s18 + $0x20] sm:$0xff]   ;;  %v6626_v1 = vshrl.u32 %v9836_v53, 16 }
 0x2b4   : > { %v3433_v55 = vpop.f32.mrf.mxu1  ;;  %v4431_v48 = vpop.f32.mrf.mxu0 }
 0x2b5   : > { %12038 = vst [vmem:[#allocation8_spill] sm:$0xff] %v11176_v0  ;;  %v3639_v36 = vadd.f32 %v3433_v55, %v10842_v58  ;;  %v11181_v60 = vadd.f32 %v4431_v48, %v3631_v54  ;;  %v4984_v48 = vsel %vm2228_vm3, %v4981_v56, %v4983_v8  ;;  %v9839_v8 = vld [vmem:[%s10049_s18 + $0x28] sm:$0xff]  }
 0x2b6   : > { %v3437_v6 = vpop.f32.mrf.mxu1  ;;  %v4435_v22 = vpop.f32.mrf.mxu0  ;;  %9408 = vmatmul.mubr.msk.bf16.gmra.mxu1 %vm586_vm1, %v4982_v20  ;;  %9457 = vmatmul.mubr.msk.bf16.gmra.mxu0 %vm586_vm1, %v9832_v29  ;;  %v9834_v20 = vld [vmem:[%s10049_s18 + $0xc0] sm:$0xff]  }
 0x2b7   : > { %12039 = vst [vmem:[#allocation9_spill] sm:$0xff] %v11181_v60  ;;  %v11185_v42 = vadd.f32 %v4435_v22, %v3632_v61  ;;  %5334 = vmatprep.mubr.bf16.mxu1 %v11937_v59  ;;  %6132 = vmatprep.mubr.bf16.mxu0 %v11937_v59  ;;  %v6630_v61 = vrot.slane %v6628_v62, 1  ;;  %v6633_v6 = vshll.u32 %v9837_v35, 16 }
 0x2b8   : > { %v3439_v17 = vpop.f32.mrf.mxu1  ;;  %v4437_v58 = vpop.f32.mrf.mxu0 }
 0x2b9   : > { %12040 = vst [vmem:[#allocation10_spill] sm:$0xff] %v11185_v42  ;;  %v11190_v54 = vadd.f32 %v4437_v58, %v3633_v37  ;;  %v6635_v53 = vrot.slane %v6633_v6, 1 }
 0x2ba   : > { %v3441_v32 = vpop.f32.mrf.mxu1  ;;  %v4439_v55 = vpop.f32.mrf.mxu0 }
 0x2bb   : > { %v3642_v29 = vadd.f32 %v3441_v32, %v10855_v33  ;;  %v6631_v33 = vor.u32 %v6630_v61, %v6626_v1 }
 0x2bc   : > { %v3443_v22 = vpop.f32.mrf.mxu1  ;;  %v4441_v42 = vpop.f32.mrf.mxu0 }
 0x2bd   : > { %v3643_v60 = vadd.f32 %v3443_v22, %v10861_v41 }
 0x2be   : > { %v3447_v0 = vpop.f32.mrf.mxu1  ;;  %v4445_v17 = vpop.f32.mrf.mxu0  ;;  %9409 = vmatmul.mubr.msk.bf16.gmra.mxu1 %vm586_vm1, %v4984_v48  ;;  %9458 = vmatmul.mubr.msk.bf16.gmra.mxu0 %vm586_vm1, %v9834_v20  ;;  %v9835_v48 = vld [vmem:[%s10049_s18 + $0xc8] sm:$0xff]  }
 0x2bf   : > { %v3644_v37 = vadd.f32 %v3447_v0, %v10867_v39  ;;  %v11199_v56 = vadd.f32 %v4445_v17, %v3636_v40  ;;  %6142 = vmatprep.mubr.bf16.mxu0 %v11937_v59  ;;  %6940 = vmatprep.mubr.bf16.mxu1 %v11937_v59  ;;  %v6636_v39 = vsel %vm1209_vm2, %v6631_v33, %v6635_v53  ;;  %v6637_v40 = vshrl.u32 %v9837_v35, 16  ;;  %v9840_v35 = vld [vmem:[%s10049_s18 + $0x30] sm:$0xff]  }
 0x2c0   : > { %v3449_v42 = vpop.f32.mrf.mxu1  ;;  %v4447_v41 = vpop.f32.mrf.mxu0  ;;  %v6641_v0 = vshll.u32 %v9839_v8, 16 }
 0x2c1   : > { %v3645_v62 = vadd.f32 %v3449_v42, %v10871_v63  ;;  %v11205_v58 = vadd.f32 %v4447_v41, %v3637_v47  ;;  %v6639_v47 = vor.u32 %v6637_v40, %v6635_v53 }
 0x2c2   : > { %v3451_v32 = vpop.f32.mrf.mxu1  ;;  %v4449_v55 = vpop.f32.mrf.mxu0 }
 0x2c3   : > { %v11208_v20 = vadd.f32 %v4449_v55, %v3638_v57  ;;  %v6643_v57 = vrot.slane %v6641_v0, 1  ;;  %v9838_v55 = vld [vmem:[%s10049_s18 + $0xd0] sm:$0xff]  }
 0x2c4   : > { %v3453_v22 = vpop.f32.mrf.mxu1  ;;  %v4451_v1 = vpop.f32.mrf.mxu0 }
 0x2c5   : > { %v11211_v61 = vadd.f32 %v4451_v1, %v3639_v36  ;;  %v6644_v22 = vsel %vm1209_vm2, %v6639_v47, %v6643_v57  ;;  %v6649_v1 = vshll.u32 %v9840_v35, 16 }
 0x2c6   : > { %v4455_v6 = vpop.f32.mrf.mxu0  ;;  %v5106_v17 = vpop.f32.mrf.mxu1  ;;  %9459 = vmatmul.mubr.msk.bf16.gmra.mxu0 %vm586_vm1, %v9835_v48  ;;  %9489 = vmatmul.mubr.msk.bf16.vlgmr.msra.gmra.mxu1 %vm586_vm1, %v6636_v39  ;;  %v6645_v48 = vshrl.u32 %v9839_v8, 16 }
 0x2c7   : > { %v5441_v63 = vadd.f32 %v5106_v17, %v10883_v51  ;;  %6152 = vmatprep.mubr.bf16.mxu0 %v11937_v59  ;;  %6950 = vmatprep.mubr.bf16.mxu1 %v11937_v59  ;;  %v9841_v6 = vld [vmem:[%s10049_s18 + $0x18] sm:$0xfe]   ;;  %v9842_v17 = vld [vmem:[%s10049_s18 + $0x20] sm:$0xff]   ;;  %v6651_v8 = vrot.slane %v6649_v1, 1 }
 0x2c8   : > { %v4457_v36 = vpop.f32.mrf.mxu0  ;;  %v5108_v33 = vpop.f32.mrf.mxu1  ;;  %v7643_v47 = vrot.slane %v9841_v6, 1 }
 0x2c9   : > { %v5442_v42 = vadd.f32 %v5108_v33, %v10888_v5 }
 0x2ca   : > { %v4459_v41 = vpop.f32.mrf.mxu0  ;;  %v5110_v32 = vpop.f32.mrf.mxu1 }
 0x2cb   : > { %v11221_v39 = vadd.f32 %v4459_v41, %v3642_v29  ;;  %v5443_v51 = vadd.f32 %v5110_v32, %v10891_v50  ;;  %v6647_v29 = vor.u32 %v6645_v48, %v6643_v57  ;;  %v9843_v41 = vld [vmem:[%s10049_s18 + $0x38] sm:$0xff]  }
 0x2cc   : > { %v4461_v53 = vpop.f32.mrf.mxu0  ;;  %v5112_v40 = vpop.f32.mrf.mxu1 }
 0x2cd   : > { %v11227_v0 = vadd.f32 %v4461_v53, %v3643_v60  ;;  %v5444_v5 = vadd.f32 %v5112_v40, %v10895_v28  ;;  %v7644_v60 = vrot.slane %v9842_v17, 1  ;;  %v6652_v57 = vsel %vm1209_vm2, %v6647_v29, %v6651_v8 }
 0x2ce   : > { %v4465_v36 = vpop.f32.mrf.mxu0  ;;  %v5116_v33 = vpop.f32.mrf.mxu1  ;;  %9460 = vmatmul.mubr.msk.bf16.gmra.mxu0 %vm586_vm1, %v9838_v55  ;;  %9490 = vmatmul.mubr.msk.bf16.gmra.mxu1 %vm586_vm1, %v6644_v22  ;;  %v6653_v22 = vshrl.u32 %v9840_v35, 16  ;;  %v9845_v35 = vld [vmem:[%s10049_s18 + $0x40] sm:$0xff]  }
 0x2cf   : > { %v11232_v50 = vadd.f32 %v4465_v36, %v3644_v37  ;;  %6960 = vmatprep.mubr.bf16.mxu1 %v11937_v59  ;;  %7811 = vmatprep.mubr.bf16.mxu0 %v11937_v59  ;;  %v7645_v48 = vsel %vm2228_vm3, %v7643_v47, %v7644_v60  ;;  %v6657_v36 = vshll.u32 %v9843_v41, 16  ;;  %v9844_v33 = vld [vmem:[%s10049_s18 + $0x28] sm:$0xff]  }
 0x2d0   : > { %v4467_v32 = vpop.f32.mrf.mxu0  ;;  %v5118_v28 = vpop.f32.mrf.mxu1 }
 0x2d1   : > { %12041 = vst [vmem:[#allocation11_spill] sm:$0xff] %v11232_v50  ;;  %v11237_v53 = vadd.f32 %v4467_v32, %v3645_v62  ;;  %v6655_v62 = vor.u32 %v6653_v22, %v6651_v8  ;;  %v6659_v47 = vrot.slane %v6657_v36, 1  ;;  %v7646_v32 = vrot.slane %v9844_v33, 1 }
 0x2d2   : > { %v4469_v40 = vpop.f32.mrf.mxu0  ;;  %v5120_v55 = vpop.f32.mrf.mxu1  ;;  %v6661_v22 = vshrl.u32 %v9843_v41, 16 }
 0x2d3   : > { %v5447_v37 = vadd.f32 %v5120_v55, %v10905_v12 }
 0x2d4   : > { %v4471_v1 = vpop.f32.mrf.mxu0  ;;  %v5122_v6 = vpop.f32.mrf.mxu1 }
 0x2d5   : > { %v5448_v17 = vadd.f32 %v5122_v6, %v10910_v19  ;;  %v6665_v1 = vshll.u32 %v9845_v35, 16  ;;  %v9846_v6 = vld [vmem:[%s10049_s18 + $0x30] sm:$0xff]  }
 0x2d6   : > { %v5126_v50 = vpop.f32.mrf.mxu1  ;;  %v5924_v28 = vpop.f32.mrf.mxu0  ;;  %9491 = vmatmul.mubr.msk.bf16.gmra.mxu1 %vm586_vm1, %v6652_v57  ;;  %9541 = vmatmul.mubr.msk.bf16.vlgmr.msra.gmra.mxu0 %vm586_vm1, %v7645_v48 }
 0x2d7   : > { %v5449_v12 = vadd.f32 %v5126_v50, %v10914_v2  ;;  %v11248_v29 = vadd.f32 %v5924_v28, %v5441_v63  ;;  %6970 = vmatprep.mubr.bf16.mxu1 %v11937_v59  ;;  %7821 = vmatprep.mubr.bf16.mxu0 %v11937_v59  ;;  %v6660_v63 = vsel %vm1209_vm2, %v6655_v62, %v6659_v47  ;;  %v6667_v41 = vrot.slane %v6665_v1, 1 }
 0x2d8   : > { %v5128_v19 = vpop.f32.mrf.mxu1  ;;  %v5926_v40 = vpop.f32.mrf.mxu0  ;;  %v7647_v50 = vsel %vm2228_vm3, %v7644_v60, %v7646_v32  ;;  %v9847_v60 = vld [vmem:[%s10049_s18 + $0x48] sm:$0xff]  }
 0x2d9   : > { %12042 = vst [vmem:[#allocation12_spill] sm:$0xff] %v11248_v29  ;;  %v5450_v55 = vadd.f32 %v5128_v19, %v10918_v27  ;;  %v11253_v57 = vadd.f32 %v5926_v40, %v5442_v42  ;;  %v6663_v42 = vor.u32 %v6661_v22, %v6659_v47  ;;  %v7648_v19 = vrot.slane %v9846_v6, 1  ;;  %v9848_v6 = vld [vmem:[%s10049_s18 + $0x38] sm:$0xff]  }
 0x2da   : > { %v5130_v48 = vpop.f32.mrf.mxu1  ;;  %v5928_v8 = vpop.f32.mrf.mxu0 }
 0x2db   : > { %v11256_v2 = vadd.f32 %v5928_v8, %v5443_v51  ;;  %v7649_v47 = vsel %vm2228_vm3, %v7646_v32, %v7648_v19 }
 0x2dc   : > { %v5132_v36 = vpop.f32.mrf.mxu1  ;;  %v5930_v33 = vpop.f32.mrf.mxu0 }
 0x2dd   : > { %v11260_v28 = vadd.f32 %v5930_v33, %v5444_v5 }
 0x2de   : > { %v5136_v29 = vpop.f32.mrf.mxu1  ;;  %v5934_v27 = vpop.f32.mrf.mxu0  ;;  %9492 = vmatmul.mubr.msk.bf16.gmra.mxu1 %vm586_vm1, %v6660_v63  ;;  %9542 = vmatmul.mubr.msk.bf16.gmra.mxu0 %vm586_vm1, %v7647_v50  ;;  %v6668_v63 = vsel %vm1209_vm2, %v6663_v42, %v6667_v41  ;;  %v9849_v42 = vld [vmem:[%s10049_s18 + $0x50] sm:$0xff]  }
 0x2df   : > { %v5453_v51 = vadd.f32 %v5136_v29, %v10928_v4  ;;  %6980 = vmatprep.mubr.bf16.mxu1 %v11937_v59  ;;  %7831 = vmatprep.mubr.bf16.mxu0 %v11937_v59  ;;  %v6669_v4 = vshrl.u32 %v9845_v35, 16  ;;  %v6673_v29 = vshll.u32 %v9847_v60, 16  ;;  %v7650_v35 = vrot.slane %v9848_v6, 1 }
 0x2e0   : > { %v5138_v62 = vpop.f32.mrf.mxu1  ;;  %v5936_v5 = vpop.f32.mrf.mxu0 }
 0x2e1   : > { %v5454_v40 = vadd.f32 %v5138_v62, %v10933_v9 }
 0x2e2   : > { %v5140_v48 = vpop.f32.mrf.mxu1  ;;  %v5938_v8 = vpop.f32.mrf.mxu0 }
 0x2e3   : > { %v5455_v22 = vadd.f32 %v5140_v48, %v10936_v10  ;;  %v11272_v1 = vadd.f32 %v5938_v8, %v5447_v37  ;;  %v6671_v10 = vor.u32 %v6669_v4, %v6667_v41  ;;  %v6675_v37 = vrot.slane %v6673_v29, 1 }
 0x2e4   : > { %v5142_v50 = vpop.f32.mrf.mxu1  ;;  %v5940_v36 = vpop.f32.mrf.mxu0 }
 0x2e5   : > { %v5456_v33 = vadd.f32 %v5142_v50, %v10940_v30  ;;  %v11276_v27 = vadd.f32 %v5940_v36, %v5448_v17  ;;  %v7651_v50 = vsel %vm2228_vm3, %v7648_v19, %v7650_v35  ;;  %v6681_v36 = vshll.u32 %v9849_v42, 16 }
 0x2e6   : > { %v5146_v9 = vpop.f32.mrf.mxu1  ;;  %v5944_v62 = vpop.f32.mrf.mxu0  ;;  %9493 = vmatmul.mubr.msk.bf16.gmra.mxu1 %vm586_vm1, %v6668_v63  ;;  %9543 = vmatmul.mubr.msk.bf16.gmra.mxu0 %vm586_vm1, %v7649_v47  ;;  %v6677_v63 = vshrl.u32 %v9847_v60, 16  ;;  %v6676_v47 = vsel %vm1209_vm2, %v6671_v10, %v6675_v37  ;;  %v9851_v60 = vld [vmem:[%s10049_s18 + $0x58] sm:$0xff]  }
 0x2e7   : > { %v11280_v32 = vadd.f32 %v5944_v62, %v5449_v12  ;;  %6990 = vmatprep.mubr.bf16.mxu1 %v11937_v59  ;;  %7841 = vmatprep.mubr.bf16.mxu0 %v11937_v59  ;;  %v9850_v9 = vld [vmem:[%s10049_s18 + $0x40] sm:$0xff]   ;;  %v6683_v19 = vrot.slane %v6681_v36, 1 }
 0x2e8   : > { %v5148_v30 = vpop.f32.mrf.mxu1  ;;  %v5946_v17 = vpop.f32.mrf.mxu0 }
 0x2e9   : > { %v11285_v5 = vadd.f32 %v5946_v17, %v5450_v55  ;;  %v6679_v55 = vor.u32 %v6677_v63, %v6675_v37  ;;  %v7652_v30 = vrot.slane %v9850_v9, 1  ;;  %v6685_v63 = vshrl.u32 %v9849_v42, 16 }
 0x2ea   : > { %v5150_v48 = vpop.f32.mrf.mxu1  ;;  %v5948_v8 = vpop.f32.mrf.mxu0 }
 0x2eb   : > { %v5459_v12 = vadd.f32 %v5150_v48, %v10950_v43 }
 0x2ec   : > { %v5152_v41 = vpop.f32.mrf.mxu1  ;;  %v5950_v4 = vpop.f32.mrf.mxu0 }
 0x2ed   : > { %v5460_v29 = vadd.f32 %v5152_v41, %v10955_v24  ;;  %v9852_v41 = vld [vmem:[%s10049_s18 + $0x48] sm:$0xff]   ;;  %v7653_v4 = vsel %vm2228_vm3, %v7650_v35, %v7652_v30  ;;  %v9853_v35 = vld [vmem:[%s10049_s18 + $0x60] sm:$0xff]  }
 0x2ee   : > { %v5156_v6 = vpop.f32.mrf.mxu1  ;;  %v5954_v62 = vpop.f32.mrf.mxu0  ;;  %9494 = vmatmul.mubr.msk.bf16.gmra.mxu1 %vm586_vm1, %v6676_v47  ;;  %9544 = vmatmul.mubr.msk.bf16.gmra.mxu0 %vm586_vm1, %v7651_v50  ;;  %v6689_v50 = vshll.u32 %v9851_v60, 16 }
 0x2ef   : > { %v5461_v43 = vadd.f32 %v5156_v6, %v10959_v49  ;;  %v11296_v10 = vadd.f32 %v5954_v62, %v5453_v51  ;;  %7000 = vmatprep.mubr.bf16.mxu1 %v11937_v59  ;;  %7851 = vmatprep.mubr.bf16.mxu0 %v11937_v59  ;;  %v6684_v51 = vsel %vm1209_vm2, %v6679_v55, %v6683_v19 }
 0x2f0   : > { %v5158_v24 = vpop.f32.mrf.mxu1  ;;  %v5956_v17 = vpop.f32.mrf.mxu0  ;;  %v6691_v42 = vrot.slane %v6689_v50, 1 }
 0x2f1   : > { %v5462_v48 = vadd.f32 %v5158_v24, %v10963_v18  ;;  %v11301_v8 = vadd.f32 %v5956_v17, %v5454_v40  ;;  %v6687_v40 = vor.u32 %v6685_v63, %v6683_v19  ;;  %v7654_v24 = vrot.slane %v9852_v41, 1 }
 0x2f2   : > { %v5160_v47 = vpop.f32.mrf.mxu1  ;;  %v5958_v37 = vpop.f32.mrf.mxu0  ;;  %v6697_v41 = vshll.u32 %v9853_v35, 16 }
 0x2f3   : > { %v11304_v49 = vadd.f32 %v5958_v37, %v5455_v22  ;;  %v7655_v19 = vsel %vm2228_vm3, %v7652_v30, %v7654_v24 }
 0x2f4   : > { %v5162_v36 = vpop.f32.mrf.mxu1  ;;  %v5960_v9 = vpop.f32.mrf.mxu0 }
 0x2f5   : > { %v11308_v6 = vadd.f32 %v5960_v9, %v5456_v33 }
 0x2f6   : > { %v5166_v62 = vpop.f32.mrf.mxu1  ;;  %v5964_v18 = vpop.f32.mrf.mxu0  ;;  %9495 = vmatmul.mubr.msk.bf16.gmra.mxu1 %vm586_vm1, %v6684_v51  ;;  %9545 = vmatmul.mubr.msk.bf16.gmra.mxu0 %vm586_vm1, %v7653_v4  ;;  %v6692_v51 = vsel %vm1209_vm2, %v6687_v40, %v6691_v42  ;;  %v9854_v4 = vld [vmem:[%s10049_s18 + $0x50] sm:$0xff]   ;;  %v9855_v40 = vld [vmem:[%s10049_s18 + $0x68] sm:$0xff]  }
 0x2f7   : > { %v5465_v22 = vadd.f32 %v5166_v62, %v10973_v14  ;;  %7010 = vmatprep.mubr.bf16.mxu1 %v11937_v59  ;;  %7861 = vmatprep.mubr.bf16.mxu0 %v11937_v59  ;;  %v6693_v14 = vshrl.u32 %v9851_v60, 16  ;;  %v7656_v60 = vrot.slane %v9854_v4, 1 }
 0x2f8   : > { %v5168_v55 = vpop.f32.mrf.mxu1  ;;  %v5966_v33 = vpop.f32.mrf.mxu0 }
 0x2f9   : > { %v5466_v17 = vadd.f32 %v5168_v55, %v10978_v45 }
 0x2fa   : > { %v5170_v47 = vpop.f32.mrf.mxu1  ;;  %v5968_v37 = vpop.f32.mrf.mxu0 }
 0x2fb   : > { %v5467_v63 = vadd.f32 %v5170_v47, %v10981_v11  ;;  %v11320_v50 = vadd.f32 %v5968_v37, %v5459_v12  ;;  %v6695_v11 = vor.u32 %v6693_v14, %v6691_v42  ;;  %v6699_v12 = vrot.slane %v6697_v41, 1 }
 0x2fc   : > { %v5172_v36 = vpop.f32.mrf.mxu1  ;;  %v5970_v9 = vpop.f32.mrf.mxu0 }
 0x2fd   : > { %v5468_v62 = vadd.f32 %v5172_v36, %v10985_v46  ;;  %v11324_v18 = vadd.f32 %v5970_v9, %v5460_v29  ;;  %v7657_v36 = vsel %vm2228_vm3, %v7654_v24, %v7656_v60  ;;  %v6705_v9 = vshll.u32 %v9855_v40, 16 }
 0x2fe   : > { %v5176_v45 = vpop.f32.mrf.mxu1  ;;  %v5974_v55 = vpop.f32.mrf.mxu0  ;;  %9496 = vmatmul.mubr.msk.bf16.gmra.mxu1 %vm586_vm1, %v6692_v51  ;;  %9546 = vmatmul.mubr.msk.bf16.gmra.mxu0 %vm586_vm1, %v7655_v19  ;;  %v6701_v51 = vshrl.u32 %v9853_v35, 16  ;;  %v6700_v19 = vsel %vm1209_vm2, %v6695_v11, %v6699_v12  ;;  %v9857_v35 = vld [vmem:[%s10049_s18 + $0x70] sm:$0xff]  }
 0x2ff   : > { %v11328_v30 = vadd.f32 %v5974_v55, %v5461_v43  ;;  %7020 = vmatprep.mubr.bf16.mxu1 %v11937_v59  ;;  %7871 = vmatprep.mubr.bf16.mxu0 %v11937_v59  ;;  %v9856_v45 = vld [vmem:[%s10049_s18 + $0x58] sm:$0xff]   ;;  %v6707_v24 = vrot.slane %v6705_v9, 1 }
 0x300   : > { %v5178_v46 = vpop.f32.mrf.mxu1  ;;  %v5976_v29 = vpop.f32.mrf.mxu0 }
 0x301   : > { %v11333_v33 = vadd.f32 %v5976_v29, %v5462_v48  ;;  %v6703_v48 = vor.u32 %v6701_v51, %v6699_v12  ;;  %v7658_v46 = vrot.slane %v9856_v45, 1  ;;  %v6709_v51 = vshrl.u32 %v9855_v40, 16 }
 0x302   : > { %v5180_v47 = vpop.f32.mrf.mxu1  ;;  %v5978_v37 = vpop.f32.mrf.mxu0 }
 0x303   : > { %v5471_v43 = vadd.f32 %v5180_v47, %v10995_v34 }
 0x304   : > { %v5182_v42 = vpop.f32.mrf.mxu1  ;;  %v5980_v14 = vpop.f32.mrf.mxu0 }
 0x305   : > { %v5472_v41 = vadd.f32 %v5182_v42, %v11000_v13  ;;  %v9858_v42 = vld [vmem:[%s10049_s18 + $0x60] sm:$0xff]   ;;  %v7659_v14 = vsel %vm2228_vm3, %v7656_v60, %v7658_v46  ;;  %v9859_v60 = vld [vmem:[%s10049_s18 + $0x78] sm:$0xff]  }
 0x306   : > { %v5186_v4 = vpop.f32.mrf.mxu1  ;;  %v5984_v55 = vpop.f32.mrf.mxu0  ;;  %9497 = vmatmul.mubr.msk.bf16.gmra.mxu1 %vm586_vm1, %v6700_v19  ;;  %9547 = vmatmul.mubr.msk.bf16.gmra.mxu0 %vm586_vm1, %v7657_v36  ;;  %v6713_v36 = vshll.u32 %v9857_v35, 16 }
 0x307   : > { %v5473_v34 = vadd.f32 %v5186_v4, %v11004_v7  ;;  %v11344_v11 = vadd.f32 %v5984_v55, %v5465_v22  ;;  %7030 = vmatprep.mubr.bf16.mxu1 %v11937_v59  ;;  %7881 = vmatprep.mubr.bf16.mxu0 %v11937_v59  ;;  %v6708_v22 = vsel %vm1209_vm2, %v6703_v48, %v6707_v24 }
 0x308   : > { %v5188_v13 = vpop.f32.mrf.mxu1  ;;  %v5986_v29 = vpop.f32.mrf.mxu0  ;;  %v6715_v40 = vrot.slane %v6713_v36, 1 }
 0x309   : > { %v5474_v47 = vadd.f32 %v5188_v13, %v11008_v25  ;;  %v11349_v37 = vadd.f32 %v5986_v29, %v5466_v17  ;;  %v6711_v17 = vor.u32 %v6709_v51, %v6707_v24  ;;  %v7660_v13 = vrot.slane %v9858_v42, 1 }
 0x30a   : > { %v5190_v19 = vpop.f32.mrf.mxu1  ;;  %v5988_v12 = vpop.f32.mrf.mxu0  ;;  %v6721_v42 = vshll.u32 %v9859_v60, 16 }
 0x30b   : > { %v11352_v7 = vadd.f32 %v5988_v12, %v5467_v63  ;;  %v7661_v24 = vsel %vm2228_vm3, %v7658_v46, %v7660_v13 }
 0x30c   : > { %v5192_v9 = vpop.f32.mrf.mxu1  ;;  %v5990_v45 = vpop.f32.mrf.mxu0 }
 0x30d   : > { %v11356_v4 = vadd.f32 %v5990_v45, %v5468_v62 }
 0x30e   : > { %v5196_v55 = vpop.f32.mrf.mxu1  ;;  %v5994_v25 = vpop.f32.mrf.mxu0  ;;  %9498 = vmatmul.mubr.msk.bf16.gmra.mxu1 %vm586_vm1, %v6708_v22  ;;  %9548 = vmatmul.mubr.msk.bf16.gmra.mxu0 %vm586_vm1, %v7659_v14  ;;  %v6716_v22 = vsel %vm1209_vm2, %v6711_v17, %v6715_v40  ;;  %v9860_v14 = vld [vmem:[%s10049_s18 + $0x68] sm:$0xff]   ;;  %v9861_v17 = vld [vmem:[%s10049_s18 + $0x80] sm:$0xff]  }
 0x30f   : > { %v5477_v63 = vadd.f32 %v5196_v55, %v11018_v3  ;;  %7040 = vmatprep.mubr.bf16.mxu1 %v11937_v59  ;;  %7891 = vmatprep.mubr.bf16.mxu0 %v11937_v59  ;;  %v6717_v3 = vshrl.u32 %v9857_v35, 16  ;;  %v7662_v35 = vrot.slane %v9860_v14, 1 }
 0x310   : > { %v5198_v48 = vpop.f32.mrf.mxu1  ;;  %v5996_v62 = vpop.f32.mrf.mxu0 }
 0x311   : > { %v5478_v29 = vadd.f32 %v5198_v48, %v11023_v26 }
 0x312   : > { %v5200_v19 = vpop.f32.mrf.mxu1  ;;  %v5998_v12 = vpop.f32.mrf.mxu0 }
 0x313   : > { %v5479_v51 = vadd.f32 %v5200_v19, %v11026_v15  ;;  %v11368_v36 = vadd.f32 %v5998_v12, %v5471_v43  ;;  %v6719_v15 = vor.u32 %v6717_v3, %v6715_v40  ;;  %v6723_v43 = vrot.slane %v6721_v42, 1 }
 0x314   : > { %v5202_v9 = vpop.f32.mrf.mxu1  ;;  %v6000_v45 = vpop.f32.mrf.mxu0 }
 0x315   : > { %v5480_v55 = vadd.f32 %v5202_v9, %v11030_v21  ;;  %v11372_v25 = vadd.f32 %v6000_v45, %v5472_v41  ;;  %v7663_v9 = vsel %vm2228_vm3, %v7660_v13, %v7662_v35  ;;  %v6729_v45 = vshll.u32 %v9861_v17, 16 }
 0x316   : > { %v5206_v26 = vpop.f32.mrf.mxu1  ;;  %v6004_v48 = vpop.f32.mrf.mxu0  ;;  %9499 = vmatmul.mubr.msk.bf16.gmra.mxu1 %vm586_vm1, %v6716_v22  ;;  %9549 = vmatmul.mubr.msk.bf16.gmra.mxu0 %vm586_vm1, %v7661_v24  ;;  %v6725_v22 = vshrl.u32 %v9859_v60, 16  ;;  %v6724_v24 = vsel %vm1209_vm2, %v6719_v15, %v6723_v43  ;;  %v9863_v60 = vld [vmem:[%s10049_s18 + $0x88] sm:$0xff]  }
 0x317   : > { %v11376_v46 = vadd.f32 %v6004_v48, %v5473_v34  ;;  %7050 = vmatprep.mubr.bf16.mxu1 %v11937_v59  ;;  %7901 = vmatprep.mubr.bf16.mxu0 %v11937_v59  ;;  %v9862_v26 = vld [vmem:[%s10049_s18 + $0x70] sm:$0xff]   ;;  %v6731_v13 = vrot.slane %v6729_v45, 1 }
 0x318   : > { %v5208_v21 = vpop.f32.mrf.mxu1  ;;  %v6006_v41 = vpop.f32.mrf.mxu0 }
 0x319   : > { %v11381_v62 = vadd.f32 %v6006_v41, %v5474_v47  ;;  %v6727_v47 = vor.u32 %v6725_v22, %v6723_v43  ;;  %v7664_v21 = vrot.slane %v9862_v26, 1  ;;  %v6733_v22 = vshrl.u32 %v9861_v17, 16 }
 0x31a   : > { %v5210_v19 = vpop.f32.mrf.mxu1  ;;  %v6008_v12 = vpop.f32.mrf.mxu0 }
 0x31b   : > { %v5483_v34 = vadd.f32 %v5210_v19, %v11040_v52  ;;  %v7665_v45 = vsel %vm2228_vm3, %v7662_v35, %v7664_v21  ;;  %v6735_v17 = vor.u32 %v6733_v22, %v6731_v13 }
 0x31c   : > { %v5212_v40 = vpop.f32.mrf.mxu1  ;;  %v6010_v3 = vpop.f32.mrf.mxu0 }
 0x31d   : > { %v5484_v42 = vadd.f32 %v5212_v40, %v11045_v44  ;;  %v11400_v40 = vld [vmem:[%s10049_s18 + $0x78] sm:$0xff]  }
 0x31e   : > { %v5216_v14 = vpop.f32.mrf.mxu1  ;;  %v6014_v48 = vpop.f32.mrf.mxu0  ;;  %9500 = vmatmul.mubr.msk.bf16.gmra.mxu1 %vm586_vm1, %v6724_v24  ;;  %9550 = vmatmul.mubr.msk.bf16.gmra.mxu0 %vm586_vm1, %v7663_v9  ;;  %v6737_v9 = vshll.u32 %v9863_v60, 16 }
 0x31f   : > { %v5485_v52 = vadd.f32 %v5216_v14, %v11049_v31  ;;  %v11392_v15 = vadd.f32 %v6014_v48, %v5477_v63  ;;  %7060 = vmatprep.mubr.bf16.mxu1 %v11937_v59  ;;  %7911 = vmatprep.mubr.bf16.mxu0 %v11937_v59  ;;  %v6732_v63 = vsel %vm1209_vm2, %v6727_v47, %v6731_v13 }
 0x320   : > { %v5218_v44 = vpop.f32.mrf.mxu1  ;;  %v6016_v41 = vpop.f32.mrf.mxu0  ;;  %v6739_v48 = vrot.slane %v6737_v9, 1 }
 0x321   : > { %12043 = vst [vmem:[#allocation13_spill] sm:$0xff] %v11392_v15  ;;  %v5486_v19 = vadd.f32 %v5218_v44, %v11053_v38  ;;  %v11397_v12 = vadd.f32 %v6016_v41, %v5478_v29  ;;  %v12047_v44 = vld [vmem:[#allocation23_spill] sm:$0xff] }
 0x322   : > { %v5220_v24 = vpop.f32.mrf.mxu1  ;;  %v6018_v43 = vpop.f32.mrf.mxu0  ;;  %v6740_v22 = vsel %vm1209_vm2, %v6735_v17, %v6739_v48 }
 0x323   : > { %12044 = vst [vmem:[#allocation14_spill] sm:$0xff] %v11397_v12  ;;  %v11402_v31 = vadd.f32 %v6018_v43, %v5479_v51  ;;  %v7666_v51 = vrot.slane %v11400_v40, 1  ;;  %v12048_v24 = vld [vmem:[#allocation24_spill] sm:$0xff]  ;;  %v12049_v40 = vld [vmem:[#allocation25_spill] sm:$0xff] }
 0x324   : > { %v5222_v26 = vpop.f32.mrf.mxu1  ;;  %v6020_v3 = vpop.f32.mrf.mxu0 }
 0x325   : > { %12045 = vst [vmem:[#allocation15_spill] sm:$0xff] %v11402_v31  ;;  %v11406_v14 = vadd.f32 %v6020_v3, %v5480_v55  ;;  %v9865_v55 = vld [vmem:[%s10049_s18 + $0x90] sm:$0xff]   ;;  %v7667_v9 = vsel %vm2228_vm3, %v7664_v21, %v7666_v51  ;;  %v6741_v3 = vshrl.u32 %v9863_v60, 16 }
 0x326   : > { %v5226_v38 = vpop.f32.mrf.mxu1  ;;  %v6024_v29 = vpop.f32.mrf.mxu0  ;;  %9501 = vmatmul.mubr.msk.bf16.gmra.mxu1 %vm586_vm1, %v6732_v63  ;;  %9551 = vmatmul.mubr.msk.bf16.gmra.mxu0 %vm586_vm1, %v7665_v45 }
 0x327   : > { %12046 = vst [vmem:[#allocation16_spill] sm:$0xff] %v11406_v14  ;;  %v11412_v41 = vadd.f32 %v5226_v38, %v12047_v44  ;;  %7070 = vmatprep.mubr.bf16.mxu1 %v11937_v59  ;;  %7921 = vmatprep.mubr.bf16.mxu0 %v11937_v59  ;;  %v6745_v38 = vshll.u32 %v9865_v55, 16  ;;  %v11429_v29 = vld [vmem:[%s10049_s18 + $0x80] sm:$0xff]   ;;  %v6743_v60 = vor.u32 %v6741_v3, %v6739_v48  ;;  %v12056_v14 = vld [vmem:[#allocation28_spill] sm:$0xff] }
 0x328   : > { %v5228_v35 = vpop.f32.mrf.mxu1  ;;  %v6026_v47 = vpop.f32.mrf.mxu0 }
 0x329   : > { %v11418_v43 = vadd.f32 %v5228_v35, %v12048_v24  ;;  %v12051_v47 = vld [vmem:[#allocation26_spill] sm:$0xff] }
 0x32a   : > { %v5230_v63 = vpop.f32.mrf.mxu1  ;;  %v6028_v13 = vpop.f32.mrf.mxu0 }
 0x32b   : > { %v11424_v45 = vadd.f32 %v5230_v63, %v12049_v40  ;;  %v11426_v26 = vadd.f32 %v6028_v13, %v5483_v34  ;;  %v6747_v13 = vrot.slane %v6745_v38, 1  ;;  %v7668_v40 = vrot.slane %v11429_v29, 1  ;;  %v12055_v29 = vld [vmem:[#allocation27_spill] sm:$0xff] }
 0x32c   : > { %v5232_v44 = vpop.f32.mrf.mxu1  ;;  %v6030_v35 = vpop.f32.mrf.mxu0  ;;  %v6749_v38 = vshrl.u32 %v9865_v55, 16 }
 0x32d   : > { %12050 = vst [vmem:[#allocation17_spill] sm:$0xff] %v11426_v26  ;;  %v11434_v17 = vadd.f32 %v5232_v44, %v12051_v47  ;;  %v11436_v21 = vadd.f32 %v6030_v35, %v5484_v42  ;;  %v9867_v44 = vld [vmem:[%s10049_s18 + $0x98] sm:$0xff]  }
 0x32e   : > { %v5236_v24 = vpop.f32.mrf.mxu1  ;;  %v6034_v63 = vpop.f32.mrf.mxu0  ;;  %9502 = vmatmul.mubr.msk.bf16.gmra.mxu1 %vm586_vm1, %v6740_v22  ;;  %9552 = vmatmul.mubr.msk.bf16.gmra.mxu0 %vm586_vm1, %v7667_v9  ;;  %v8651_v22 = vld [vmem:[%s11450_s7 + $0xf8] sm:$0xff]  ;;  %v6751_v55 = vor.u32 %v6749_v38, %v6747_v13 }
 0x32f   : > { %12052 = vst [vmem:[#allocation18_spill] sm:$0xff] %v11436_v21  ;;  %v11441_v34 = vadd.f32 %v6034_v63, %v5485_v52  ;;  %7080 = vmatprep.mubr.bf16.mxu1 %v11937_v59  ;;  %7931 = vmatprep.mubr.bf16.mxu0 %v11937_v59  ;;  %v8635_v9 = vld [vmem:[%s11450_s7 + $0x78] sm:$0xff]  ;;  %v6748_v24 = vsel %vm1209_vm2, %v6743_v60, %v6747_v13  ;;  %v12057_v60 = vld [vmem:[#allocation29_spill] sm:$0xff] }
 0x330   : > { %v5238_v42 = vpop.f32.mrf.mxu1  ;;  %v6036_v52 = vpop.f32.mrf.mxu0  ;;  %9568 = vmatprep.subr.mxu1 %v8651_v22  ;;  %v7669_v63 = vsel %vm2228_vm3, %v7666_v51, %v7668_v40 }
 0x331   : > { %12053 = vst [vmem:[#allocation19_spill] sm:$0xff] %v11441_v34  ;;  %v11454_v35 = vadd.f32 %v6036_v52, %v5486_v19  ;;  %9569 = vmatpush3.msra.mxu1 %v8635_v9  ;;  %v6753_v42 = vshll.u32 %v9867_v44, 16  ;;  %v9868_v34 = vld [vmem:[%s10049_s18 + $0x88] sm:$0xff]   ;;  %v8650_v52 = vld [vmem:[%s11450_s7 + $0xf0] sm:$0xff]  ;;  %v11465_v9 = vld [vmem:[%s10049_s18 + $0xa0] sm:$0xff]  }
 0x332   : > { %v5240_v48 = vpop.f32.mrf.mxu1  ;;  %v6038_v3 = vpop.f32.mrf.mxu0  ;;  %9570 = vmatprep.subr.mxu1 %v8650_v52 }
 0x333   : > { %12054 = vst [vmem:[#allocation20_spill] sm:$0xff] %v11454_v35  ;;  %v5495_v47 = vadd.f32 %v5240_v48, %v12055_v29  ;;  %v8634_v48 = vld [vmem:[%s11450_s7 + $0x70] sm:$0xff] }
 0x334   : > { %v5242_v21 = vpop.f32.mrf.mxu1  ;;  %v6040_v26 = vpop.f32.mrf.mxu0  ;;  %9571 = vmatpush3.msra.mxu1 %v8634_v48 }
 0x335   : > { %v5496_v19 = vadd.f32 %v5242_v21, %v12056_v14  ;;  %v6755_v14 = vrot.slane %v6753_v42, 1  ;;  %v7670_v26 = vrot.slane %v9868_v34, 1 }
 0x336   : > { %v5246_v22 = vpop.f32.mrf.mxu1  ;;  %v6044_v35 = vpop.f32.mrf.mxu0  ;;  %9503 = vmatmul.mubr.msk.bf16.gmra.mxu1 %vm586_vm1, %v6748_v24  ;;  %9553 = vmatmul.mubr.msk.bf16.gmra.mxu0 %vm586_vm1, %v7669_v63  ;;  %v12059_v24 = vld [vmem:[#allocation30_spill] sm:$0xff] }
 0x337   : > { %v5497_v3 = vadd.f32 %v5246_v22, %v12057_v60  ;;  %v11470_v51 = vadd.f32 %v6044_v35, %v11412_v41  ;;  %7090 = vmatprep.mubr.bf16.mxu1 %v11937_v59  ;;  %7941 = vmatprep.mubr.bf16.mxu0 %v11937_v59  ;;  %v6757_v60 = vshrl.u32 %v9867_v44, 16  ;;  %v6761_v41 = vshll.u32 %v11465_v9, 16  ;;  %v9870_v35 = vld [vmem:[%s10049_s18 + $0x90] sm:$0xff]  }
 0x338   : > { %v5248_v21 = vpop.f32.mrf.mxu1  ;;  %v6046_v29 = vpop.f32.mrf.mxu0  ;;  %v6756_v34 = vsel %vm1209_vm2, %v6751_v55, %v6755_v14  ;;  %v7671_v42 = vsel %vm2228_vm3, %v7668_v40, %v7670_v26  ;;  %v9871_v40 = vld [vmem:[%s10049_s18 + $0xa8] sm:$0xff]  }
 0x339   : > { %12058 = vst [vmem:[#allocation21_spill] sm:$0xff] %v11470_v51  ;;  %v5498_v13 = vadd.f32 %v5248_v21, %v12059_v24  ;;  %v11476_v38 = vadd.f32 %v6046_v29, %v11418_v43  ;;  %v6763_v29 = vrot.slane %v6761_v41, 1  ;;  %v7672_v24 = vrot.slane %v9870_v35, 1  ;;  %v12065_v41 = vld [vmem:[#allocation33_spill] sm:$0xff] }
 0x33a   : > { %v5250_v63 = vpop.f32.mrf.mxu1  ;;  %v6048_v22 = vpop.f32.mrf.mxu0 }
 0x33b   : > { %12060 = vst [vmem:[#allocation22_spill] sm:$0xff] %v11476_v38  ;;  %v11481_v51 = vadd.f32 %v6048_v22, %v11424_v45  ;;  %v6759_v45 = vor.u32 %v6757_v60, %v6755_v14  ;;  %v12063_v63 = vld [vmem:[#allocation31_spill] sm:$0xff]  ;;  %v7673_v60 = vsel %vm2228_vm3, %v7670_v26, %v7672_v24  ;;  %v9872_v38 = vld [vmem:[%s10049_s18 + $0x98] sm:$0xff]  }
 0x33c   : > { %v5252_v52 = vpop.f32.mrf.mxu1  ;;  %v6050_v21 = vpop.f32.mrf.mxu0  ;;  %v7674_v26 = vrot.slane %v9872_v38, 1 }
 0x33d   : > { %12061 = vst [vmem:[#allocation23_spill] sm:$0xff] %v11481_v51  ;;  %v11486_v43 = vadd.f32 %v6050_v21, %v11434_v17  ;;  %v12064_v52 = vld [vmem:[#allocation32_spill] sm:$0xff]  ;;  %v6764_v14 = vsel %vm1209_vm2, %v6759_v45, %v6763_v29 }
 0x33e   : > { %v5256_v48 = vpop.f32.mrf.mxu1  ;;  %v6054_v44 = vpop.f32.mrf.mxu0  ;;  %9504 = vmatmul.mubr.msk.bf16.gmra.mxu1 %vm586_vm1, %v6756_v34  ;;  %9554 = vmatmul.mubr.msk.bf16.gmra.mxu0 %vm586_vm1, %v7671_v42 }
 0x33f   : > { %12062 = vst [vmem:[#allocation24_spill] sm:$0xff] %v11486_v43  ;;  %v5501_v55 = vadd.f32 %v5256_v48, %v12063_v63  ;;  %7100 = vmatprep.mubr.bf16.mxu1 %v11937_v59  ;;  %7951 = vmatprep.mubr.bf16.mxu0 %v11937_v59  ;;  %v8649_v44 = vld [vmem:[%s11450_s7 + $0xe8] sm:$0xff]  ;;  %v6765_v48 = vshrl.u32 %v11465_v9, 16  ;;  %v6769_v63 = vshll.u32 %v9871_v40, 16 }
 0x340   : > { %v5258_v17 = vpop.f32.mrf.mxu1  ;;  %v6056_v22 = vpop.f32.mrf.mxu0  ;;  %v8633_v43 = vld [vmem:[%s11450_s7 + $0x68] sm:$0xff]  ;;  %9572 = vmatprep.subr.mxu1 %v8649_v44 }
 0x341   : > { %v5502_v21 = vadd.f32 %v5258_v17, %v12064_v52  ;;  %9573 = vmatpush3.msra.mxu1 %v8633_v43  ;;  %v12066_v52 = vld [vmem:[#allocation34_spill] sm:$0xff]  ;;  %v6767_v9 = vor.u32 %v6765_v48, %v6763_v29  ;;  %v9873_v43 = vld [vmem:[%s10049_s18 + $0xb0] sm:$0xff]   ;;  %v9874_v48 = vld [vmem:[%s10049_s18 + $0xa0] sm:$0xff]  }
 0x342   : > { %v5260_v34 = vpop.f32.mrf.mxu1  ;;  %v6058_v51 = vpop.f32.mrf.mxu0  ;;  %v6777_v29 = vshll.u32 %v9873_v43, 16 }
 0x343   : > { %v5503_v35 = vadd.f32 %v5260_v34, %v12065_v41  ;;  %v11500_v42 = vadd.f32 %v6058_v51, %v5495_v47  ;;  %v6771_v51 = vrot.slane %v6769_v63, 1 }
 0x344   : > { %v5262_v17 = vpop.f32.mrf.mxu1  ;;  %v6060_v22 = vpop.f32.mrf.mxu0 }
 0x345   : > { %v5504_v31 = vadd.f32 %v5262_v17, %v12066_v52  ;;  %v11505_v12 = vadd.f32 %v6060_v22, %v5496_v19  ;;  %v6772_v17 = vsel %vm1209_vm2, %v6767_v9, %v6771_v51  ;;  %v7675_v22 = vsel %vm2228_vm3, %v7672_v24, %v7674_v26  ;;  %v12070_v52 = vld [vmem:[#allocation4_spill] sm:$0xff]  ;;  %v12071_v9 = vld [vmem:[#allocation5_spill] sm:$0xff] }
 0x346   : > { %v5266_v45 = vpop.f32.mrf.mxu1  ;;  %v6064_v15 = vpop.f32.mrf.mxu0  ;;  %9505 = vmatmul.mubr.msk.bf16.gmra.mxu1 %vm586_vm1, %v6764_v14  ;;  %9555 = vmatmul.mubr.msk.bf16.gmra.mxu0 %vm586_vm1, %v7673_v60  ;;  %v6773_v60 = vshrl.u32 %v9871_v40, 16 }
 0x347   : > { %v11509_v47 = vadd.f32 %v6064_v15, %v5497_v3  ;;  %7110 = vmatprep.mubr.bf16.mxu1 %v11937_v59  ;;  %7961 = vmatprep.mubr.bf16.mxu0 %v11937_v59  ;;  %v12069_v15 = vld [vmem:[#allocation35_spill] sm:$0xff] }
 0x348   : > { %v5268_v19 = vpop.f32.mrf.mxu1  ;;  %v6066_v44 = vpop.f32.mrf.mxu0  ;;  %v6775_v40 = vor.u32 %v6773_v60, %v6771_v51 }
 0x349   : > { %12067 = vst [vmem:[#allocation25_spill] sm:$0xff] %v11509_v47  ;;  %v11514_v34 = vadd.f32 %v6066_v44, %v5498_v13  ;;  %v8648_v19 = vld [vmem:[%s11450_s7 + $0xe0] sm:$0xff] }
 0x34a   : > { %v5270_v41 = vpop.f32.mrf.mxu1  ;;  %v6068_v14 = vpop.f32.mrf.mxu0  ;;  %9574 = vmatprep.subr.mxu1 %v8648_v19 }
 0x34b   : > { %12068 = vst [vmem:[#allocation26_spill] sm:$0xff] %v11514_v34  ;;  %v5507_v3 = vadd.f32 %v5270_v41, %v12069_v15  ;;  %v11525_v14 = vld [vmem:[%s10049_s18 + $0xb8] sm:$0xff]   ;;  %v8632_v41 = vld [vmem:[%s11450_s7 + $0x60] sm:$0xff] }
 0x34c   : > { %v5272_v38 = vpop.f32.mrf.mxu1  ;;  %v6070_v63 = vpop.f32.mrf.mxu0  ;;  %9575 = vmatpush3.msra.mxu1 %v8632_v41  ;;  %v12077_v41 = vld [vmem:[#allocation6_spill] sm:$0xff] }
 0x34d   : > { %v5508_v45 = vadd.f32 %v5272_v38, %v12070_v52  ;;  %v6779_v38 = vrot.slane %v6777_v29, 1  ;;  %v7676_v63 = vrot.slane %v9874_v48, 1 }
 0x34e   : > { %v5276_v13 = vpop.f32.mrf.mxu1  ;;  %v6074_v44 = vpop.f32.mrf.mxu0  ;;  %9506 = vmatmul.mubr.msk.bf16.gmra.mxu1 %vm586_vm1, %v6772_v17  ;;  %9556 = vmatmul.mubr.msk.bf16.gmra.mxu0 %vm586_vm1, %v7675_v22  ;;  %v12073_v17 = vld [vmem:[#allocation36_spill] sm:$0xff] }
 0x34f   : > { %v5509_v15 = vadd.f32 %v5276_v13, %v12071_v9  ;;  %v11529_v24 = vadd.f32 %v6074_v44, %v5501_v55  ;;  %7120 = vmatprep.mubr.bf16.mxu1 %v11937_v59  ;;  %7971 = vmatprep.mubr.bf16.mxu0 %v11937_v59  ;;  %v6781_v13 = vshrl.u32 %v9873_v43, 16  ;;  %v6785_v55 = vshll.u32 %v11525_v14, 16  ;;  %v9876_v44 = vld [vmem:[%s10049_s18 + $0xa8] sm:$0xff]  }
 0x350   : > { %v5278_v52 = vpop.f32.mrf.mxu1  ;;  %v6076_v34 = vpop.f32.mrf.mxu0  ;;  %v6780_v29 = vsel %vm1209_vm2, %v6775_v40, %v6779_v38  ;;  %v7677_v48 = vsel %vm2228_vm3, %v7674_v26, %v7676_v63  ;;  %v9877_v26 = vld [vmem:[%s10049_s18 + $0xc0] sm:$0xff]  }
 0x351   : > { %12072 = vst [vmem:[#allocation27_spill] sm:$0xff] %v11529_v24  ;;  %v5510_v22 = vadd.f32 %v5278_v52, %v12073_v17  ;;  %v11534_v51 = vadd.f32 %v6076_v34, %v5502_v21  ;;  %v6783_v43 = vor.u32 %v6781_v13, %v6779_v38 }
 0x352   : > { %v5280_v60 = vpop.f32.mrf.mxu1  ;;  %v6078_v47 = vpop.f32.mrf.mxu0 }
 0x353   : > { %12074 = vst [vmem:[#allocation28_spill] sm:$0xff] %v11534_v51  ;;  %v11538_v9 = vadd.f32 %v6078_v47, %v5503_v35  ;;  %v6787_v35 = vrot.slane %v6785_v55, 1  ;;  %v7678_v47 = vrot.slane %v9876_v44, 1  ;;  %v8647_v60 = vld [vmem:[%s11450_s7 + $0xd8] sm:$0xff] }
 0x354   : > { %v5282_v24 = vpop.f32.mrf.mxu1  ;;  %v6080_v19 = vpop.f32.mrf.mxu0  ;;  %9576 = vmatprep.subr.mxu1 %v8647_v60  ;;  %v9879_v60 = vld [vmem:[%s10049_s18 + $0xc8] sm:$0xff]  }
 0x355   : > { %12075 = vst [vmem:[#allocation29_spill] sm:$0xff] %v11538_v9  ;;  %v11542_v52 = vadd.f32 %v6080_v19, %v5504_v31  ;;  %v8631_v19 = vld [vmem:[%s11450_s7 + $0x58] sm:$0xff]  ;;  %v6788_v38 = vsel %vm1209_vm2, %v6783_v43, %v6787_v35  ;;  %v7679_v13 = vsel %vm2228_vm3, %v7676_v63, %v7678_v47 }
 0x356   : > { %v5286_v21 = vpop.f32.mrf.mxu1  ;;  %v6084_v34 = vpop.f32.mrf.mxu0  ;;  %9507 = vmatmul.mubr.msk.bf16.gmra.mxu1 %vm586_vm1, %v6780_v29  ;;  %9557 = vmatmul.mubr.msk.bf16.gmra.mxu0 %vm586_vm1, %v7677_v48  ;;  %v6789_v48 = vshrl.u32 %v11525_v14, 16 }
 0x357   : > { %12076 = vst [vmem:[#allocation30_spill] sm:$0xff] %v11542_v52  ;;  %v5513_v17 = vadd.f32 %v5286_v21, %v12077_v41  ;;  %7130 = vmatprep.mubr.bf16.mxu1 %v11937_v59  ;;  %7981 = vmatprep.mubr.bf16.mxu0 %v11937_v59  ;;  %v6793_v21 = vshll.u32 %v9877_v26, 16  ;;  %v9878_v41 = vld [vmem:[%s10049_s18 + $0xb0] sm:$0xff]  }
 0x358   : > { %v5288_v31 = vpop.f32.mrf.mxu1  ;;  %v6086_v40 = vpop.f32.mrf.mxu0  ;;  %9577 = vmatpush3.msra.mxu1 %v8631_v19  ;;  %v7680_v63 = vrot.slane %v9878_v41, 1 }
 0x359   : > { %v5514_v24 = vadd.f32 %v5288_v31, %v11158_v23  ;;  %v12078_v40 = vld [vmem:[#allocation7_spill] sm:$0xff]  ;;  %v6795_v14 = vrot.slane %v6793_v21, 1 }
 0x35a   : > { %v5290_v29 = vpop.f32.mrf.mxu1  ;;  %v6088_v34 = vpop.f32.mrf.mxu0 }
 0x35b   : > { %v5515_v55 = vadd.f32 %v5290_v29, %v11161_v16  ;;  %v11556_v44 = vadd.f32 %v6088_v34, %v5507_v3  ;;  %v6791_v3 = vor.u32 %v6789_v48, %v6787_v35  ;;  %v6801_v35 = vshll.u32 %v9879_v60, 16  ;;  %v9880_v48 = vld [vmem:[%s10049_s18 + $0xb8] sm:$0xff]  }
 0x35c   : > { %v5292_v23 = vpop.f32.mrf.mxu1  ;;  %v6090_v31 = vpop.f32.mrf.mxu0 }
 0x35d   : > { %v5516_v52 = vadd.f32 %v5292_v23, %v12078_v40  ;;  %v11561_v9 = vadd.f32 %v6090_v31, %v5508_v45  ;;  %v6796_v23 = vsel %vm1209_vm2, %v6791_v3, %v6795_v14  ;;  %v7681_v31 = vsel %vm2228_vm3, %v7678_v47, %v7680_v63  ;;  %v12082_v40 = vld [vmem:[#allocation9_spill] sm:$0xff] }
 0x35e   : > { %v5296_v43 = vpop.f32.mrf.mxu1  ;;  %v6094_v51 = vpop.f32.mrf.mxu0  ;;  %9508 = vmatmul.mubr.msk.bf16.gmra.mxu1 %vm586_vm1, %v6788_v38  ;;  %9558 = vmatmul.mubr.msk.bf16.gmra.mxu0 %vm586_vm1, %v7679_v13  ;;  %v6797_v13 = vshrl.u32 %v9877_v26, 16  ;;  %v6803_v47 = vrot.slane %v6801_v35, 1 }
 0x35f   : > { %v11565_v16 = vadd.f32 %v6094_v51, %v5509_v15  ;;  %7140 = vmatprep.mubr.bf16.mxu1 %v11937_v59  ;;  %7991 = vmatprep.mubr.bf16.mxu0 %v11937_v59  ;;  %v12081_v15 = vld [vmem:[#allocation8_spill] sm:$0xff] }
 0x360   : > { %v5298_v45 = vpop.f32.mrf.mxu1  ;;  %v6096_v19 = vpop.f32.mrf.mxu0  ;;  %v6799_v26 = vor.u32 %v6797_v13, %v6795_v14 }
 0x361   : > { %12079 = vst [vmem:[#allocation31_spill] sm:$0xff] %v11565_v16  ;;  %v11570_v29 = vadd.f32 %v6096_v19, %v5510_v22  ;;  %v8646_v45 = vld [vmem:[%s11450_s7 + $0xd0] sm:$0xff] }
 0x362   : > { %v5300_v34 = vpop.f32.mrf.mxu1  ;;  %v6098_v38 = vpop.f32.mrf.mxu0  ;;  %9578 = vmatprep.subr.mxu1 %v8646_v45 }
 0x363   : > { %12080 = vst [vmem:[#allocation32_spill] sm:$0xff] %v11570_v29  ;;  %v5519_v51 = vadd.f32 %v5300_v34, %v12081_v15  ;;  %v9881_v38 = vld [vmem:[%s10049_s18 + $0xd0] sm:$0xff]   ;;  %v12083_v15 = vld [vmem:[#allocation10_spill] sm:$0xff] }
 0x364   : > { %v5302_v21 = vpop.f32.mrf.mxu1  ;;  %v6100_v41 = vpop.f32.mrf.mxu0  ;;  %v8630_v34 = vld [vmem:[%s11450_s7 + $0x50] sm:$0xff]  ;;  %v6809_v16 = vshll.u32 %v9881_v38, 16 }
 0x365   : > { %v5520_v43 = vadd.f32 %v5302_v21, %v12082_v40  ;;  %v7682_v21 = vrot.slane %v9880_v48, 1  ;;  %9579 = vmatpush3.msra.mxu1 %v8630_v34  ;;  %v9883_v34 = vld [vmem:[%s10049_s18 + $0xd8] ss:$0 sps:$4 sm:$0x11]  }
 0x366   : > { %v5306_v22 = vpop.f32.mrf.mxu1  ;;  %v6104_v19 = vpop.f32.mrf.mxu0  ;;  %9509 = vmatmul.mubr.msk.bf16.gmra.mxu1 %vm586_vm1, %v6796_v23  ;;  %9559 = vmatmul.mubr.msk.bf16.gmra.mxu0 %vm586_vm1, %v7681_v31  ;;  %v6805_v31 = vshrl.u32 %v9879_v60, 16  ;;  %v6811_v60 = vrot.slane %v6809_v16, 1  ;;  %v6813_v16 = vshrl.u32 %v9881_v38, 16 }
 0x367   : > { %v5521_v3 = vadd.f32 %v5306_v22, %v12083_v15  ;;  %v11583_v29 = vadd.f32 %v6104_v19, %v5513_v17  ;;  %7150 = vmatprep.mubr.bf16.mxu1 %v11937_v59  ;;  %8001 = vmatprep.mubr.bf16.mxu0 %v11937_v59  ;;  %v6804_v17 = vsel %vm1209_vm2, %v6799_v26, %v6803_v47  ;;  %v9882_v15 = vld [vmem:[%s10049_s18 + $0xc0] sm:$0xff]  }
 0x368   : > { %v5308_v41 = vpop.f32.mrf.mxu1  ;;  %v6106_v40 = vpop.f32.mrf.mxu0  ;;  %v7683_v19 = vsel %vm2228_vm3, %v7680_v63, %v7682_v21  ;;  %v7684_v63 = vrot.slane %v9882_v15, 1  ;;  %v6817_v15 = vshll.u32 %v9883_v34, 16 }
 0x369   : > { %12084 = vst [vmem:[#allocation33_spill] sm:$0xff] %v11583_v29  ;;  %v11587_v23 = vadd.f32 %v6106_v40, %v5514_v24 }
 0x36a   : > { %v5310_v14 = vpop.f32.mrf.mxu1  ;;  %v6108_v13 = vpop.f32.mrf.mxu0 }
 0x36b   : > { %v11589_v22 = vadd.f32 %v6108_v13, %v5515_v55  ;;  %v6807_v55 = vor.u32 %v6805_v31, %v6803_v47  ;;  %v8645_v13 = vld [vmem:[%s11450_s7 + $0xc8] sm:$0xff] }
 0x36c   : > { %v5312_v35 = vpop.f32.mrf.mxu1  ;;  %v6110_v48 = vpop.f32.mrf.mxu0  ;;  %9580 = vmatprep.subr.mxu1 %v8645_v13 }
 0x36d   : > { %12085 = vst [vmem:[#allocation34_spill] sm:$0xff] %v11589_v22  ;;  %v11594_v29 = vadd.f32 %v6110_v48, %v5516_v52  ;;  %v8629_v35 = vld [vmem:[%s11450_s7 + $0x48] sm:$0xff]  ;;  %v6812_v47 = vsel %vm1209_vm2, %v6807_v55, %v6811_v60 }
 0x36e   : > { %v5316_v24 = vpop.f32.mrf.mxu1  ;;  %v6114_v45 = vpop.f32.mrf.mxu0  ;;  %9510 = vmatmul.mubr.msk.bf16.gmra.mxu1 %vm586_vm1, %v6804_v17  ;;  %9560 = vmatmul.mubr.msk.bf16.gmra.mxu0 %vm586_vm1, %v7683_v19  ;;  %v7685_v19 = vsel %vm2228_vm3, %v7682_v21, %v7684_v63  ;;  %v6819_v21 = vrot.slane %v6817_v15, 1 }
 0x36f   : > { %12086 = vst [vmem:[#allocation35_spill] sm:$0xff] %v11594_v29  ;;  %v5525_v26 = vadd.f32 %v5316_v24, %v11199_v56  ;;  %7160 = vmatprep.mubr.bf16.mxu1 %v11937_v59  ;;  %8011 = vmatprep.mubr.bf16.mxu0 %v11937_v59  ;;  %v9884_v24 = vld [vmem:[%s10049_s18 + $0xc8] sm:$0xff]  }
 0x370   : > { %v5318_v52 = vpop.f32.mrf.mxu1  ;;  %v6116_v40 = vpop.f32.mrf.mxu0  ;;  %9581 = vmatpush3.msra.mxu1 %v8629_v35 }
 0x371   : > { %v5526_v14 = vadd.f32 %v5318_v52, %v11205_v58 }
 0x372   : > { %v5320_v17 = vpop.f32.mrf.mxu1  ;;  %v6118_v48 = vpop.f32.mrf.mxu0 }
 0x373   : > { %v5527_v56 = vadd.f32 %v5320_v17, %v11208_v20  ;;  %v11607_v31 = vadd.f32 %v6118_v48, %v5519_v51  ;;  %v6815_v20 = vor.u32 %v6813_v16, %v6811_v60  ;;  %v5522_v51 = vadd.f32 %v5308_v41, %v11190_v54  ;;  %v12087_v16 = vld [vmem:[#allocation11_spill] sm:$0xff] }
 0x374   : > { %v5322_v45 = vpop.f32.mrf.mxu1  ;;  %v6120_v40 = vpop.f32.mrf.mxu0 }
 0x375   : > { %v5528_v58 = vadd.f32 %v5322_v45, %v11211_v61  ;;  %v11612_v52 = vadd.f32 %v6120_v40, %v5520_v43  ;;  %v7686_v61 = vrot.slane %v9884_v24, 1  ;;  %v6820_v60 = vsel %vm1209_vm2, %v6815_v20, %v6819_v21  ;;  %v8644_v40 = vld [vmem:[%s11450_s7 + $0xc0] sm:$0xff] }
 0x376   : > { %v5326_v29 = vpop.f32.mrf.mxu1  ;;  %v6124_v22 = vpop.f32.mrf.mxu0  ;;  %9511 = vmatmul.mubr.msk.bf16.gmra.mxu1 %vm586_vm1, %v6812_v47  ;;  %9561 = vmatmul.mubr.msk.bf16.gmra.mxu0 %vm586_vm1, %v7685_v19  ;;  %v8628_v20 = vld [vmem:[%s11450_s7 + $0x40] sm:$0xff] }
 0x377   : > { %v11617_v38 = vadd.f32 %v6124_v22, %v5521_v3  ;;  %7170 = vmatprep.mubr.bf16.mxu1 %v11937_v59  ;;  %8021 = vmatprep.mubr.bf16.mxu0 %v11937_v59  ;;  %v7687_v54 = vsel %vm2228_vm3, %v7684_v63, %v7686_v61  ;;  %v9885_v3 = vld [vmem:[%s10049_s18 + $0xd0] sm:$0xff]  }
 0x378   : > { %v5328_v43 = vpop.f32.mrf.mxu1  ;;  %v6126_v55 = vpop.f32.mrf.mxu0  ;;  %v7688_v63 = vrot.slane %v9885_v3, 1  ;;  %9582 = vmatprep.subr.mxu1 %v8644_v40 }
 0x379   : > { %v11621_v29 = vadd.f32 %v6126_v55, %v5522_v51  ;;  %v9886_v55 = vld [vmem:[%s10049_s18 + $0xd8] ss:$0 sps:$4 sm:$0x11]   ;;  %9583 = vmatpush3.msra.mxu1 %v8628_v20  ;;  %s11791_s18 = scalar_lea.vmem %s11911_s4, %s9099_s15 }
 0x37a   : > { %v5330_v34 = vpop.f32.mrf.mxu1  ;;  %v6128_v13 = vpop.f32.mrf.mxu0 }
 0x37b   : > { %v5531_v35 = vadd.f32 %v5330_v34, %v11221_v39 }
 0x37c   : > { %v5332_v41 = vpop.f32.mrf.mxu1  ;;  %v6130_v22 = vpop.f32.mrf.mxu0 }
 0x37d   : > { %v5532_v17 = vadd.f32 %v5332_v41, %v11227_v0  ;;  %v8406_v41 = vlaneseq }
 0x37e   : > { %v5336_v48 = vpop.f32.mrf.mxu1  ;;  %v6134_v47 = vpop.f32.mrf.mxu0  ;;  %9512 = vmatmul.mubr.msk.bf16.gmra.mxu1 %vm586_vm1, %v6820_v60  ;;  %9562 = vmatmul.mubr.msk.bf16.gmra.mxu0 %vm586_vm1, %v7687_v54 }
 0x37f   : > { %v5533_v39 = vadd.f32 %v5336_v48, %v12087_v16  ;;  %v11631_v19 = vadd.f32 %v6134_v47, %v5525_v26  ;;  %8031 = vmatprep.mubr.bf16.mxu0 %v11937_v59  ;;  %v7689_v26 = vsel %vm2228_vm3, %v7686_v61, %v7688_v63 }
 0x380   : > { %v5338_v15 = vpop.f32.mrf.mxu1  ;;  %v6136_v24 = vpop.f32.mrf.mxu0 }
 0x381   : > { %v5534_v45 = vadd.f32 %v5338_v15, %v11237_v53  ;;  %v11635_v0 = vadd.f32 %v6136_v24, %v5526_v14  ;;  %v7690_v14 = vrot.slane %v9886_v55, 1  ;;  %v8407_v24 = vshrl.u32 %v8406_v41, 7 }
 0x382   : > { %v5340_v51 = vpop.f32.mrf.mxu1  ;;  %v6138_v21 = vpop.f32.mrf.mxu0 }
 0x383   : > { %v11639_v43 = vadd.f32 %v6138_v21, %v5527_v56  ;;  %v8627_v51 = vld [vmem:[%s11450_s7 + $0x38] sm:$0xff] }
 0x384   : > { %v5342_v34 = vpop.f32.mrf.mxu1  ;;  %v6140_v13 = vpop.f32.mrf.mxu0 }
 0x385   : > { %v11644_v60 = vadd.f32 %v6140_v13, %v5528_v58  ;;  %v7691_v58 = vsel %vm2228_vm3, %v7688_v63, %v7690_v14  ;;  %v8404_v13 = vld [vmem:[%s381_s11] sm:$0x3] }
 0x386   : > { %v6144_v54 = vpop.f32.mrf.mxu0  ;;  %v6942_v53 = vpop.f32.mrf.mxu1  ;;  %9563 = vmatmul.mubr.msk.bf16.gmra.mxu0 %vm586_vm1, %v7689_v26 }
 0x387   : > { %8041 = vmatprep.mubr.bf16.mxu0 %v11937_v59  ;;  %v8412_v54 = vsub.s32 1, %v8407_v24 }
 0x388   : > { %v6146_v3 = vpop.f32.mrf.mxu0  ;;  %v6944_v56 = vpop.f32.mrf.mxu1 }
 0x389   : > { %v12090_v3 = vld [vmem:[#allocation12_spill] sm:$0xff] }
 0x38a   : > { %v6148_v61 = vpop.f32.mrf.mxu0  ;;  %v6946_v22 = vpop.f32.mrf.mxu1  ;;  %v7277_v41 = vadd.f32 %v6942_v53, %v12090_v3 }
 0x38b   : > { %v11648_v48 = vadd.f32 %v6148_v61, %v5531_v35  ;;  %v8643_v35 = vld [vmem:[%s11450_s7 + $0xb8] sm:$0xff] }
 0x38c   : > { %v6150_v47 = vpop.f32.mrf.mxu0  ;;  %v6948_v16 = vpop.f32.mrf.mxu1  ;;  %9584 = vmatprep.subr.mxu1 %v8643_v35 }
 0x38d   : > { %v11651_v15 = vadd.f32 %v6150_v47, %v5532_v17  ;;  %v8408_v17 = vsub.s32 0, %v8407_v24  ;;  %9585 = vmatpush3.msra.mxu1 %v8627_v51 }
 0x38e   : > { %v6154_v59 = vpop.f32.mrf.mxu0  ;;  %v6952_v40 = vpop.f32.mrf.mxu1  ;;  %9564 = vmatmul.mubr.msk.bf16.gmra.mxu0 %vm586_vm1, %v7691_v58 }
 0x38f   : > { %v11654_v20 = vadd.f32 %v6154_v59, %v5533_v39  ;;  %v11664_v61 = vrot.slane %v8404_v13, %v8408_v17  ;;  %v7278_v59 = vadd.f32 %v6944_v56, %v11253_v57  ;;  %v11667_v40 = vrot.slane %v8404_v13, %v8412_v54  ;;  %v8626_v57 = vld [vmem:[%s11450_s7 + $0x30] sm:$0xff] }
 0x390   : > { %v6156_v21 = vpop.f32.mrf.mxu0  ;;  %v6954_v63 = vpop.f32.mrf.mxu1  ;;  %v7280_v17 = vadd.f32 %v6948_v16, %v11260_v28 }
 0x391   : > { %12088 = vst [vmem:[#allocation4_spill] sm:$0xff] %v11654_v20  ;;  %v11661_v26 = vadd.f32 %v6156_v21, %v5534_v45  ;;  %v7279_v21 = vadd.f32 %v6946_v22, %v11256_v2  ;;  %v8642_v20 = vld [vmem:[%s11450_s7 + $0xb0] sm:$0xff] }
 0x392   : > { %v6158_v55 = vpop.f32.mrf.mxu0  ;;  %v6956_v34 = vpop.f32.mrf.mxu1  ;;  %9586 = vmatprep.subr.mxu1 %v8642_v20 }
 0x393   : > { %12089 = vst [vmem:[#allocation5_spill] sm:$0xff] %v11661_v26  ;;  %9587 = vmatpush3.msra.mxu1 %v8626_v57 }
 0x394   : > { %v6160_v14 = vpop.f32.mrf.mxu0  ;;  %v6958_v39 = vpop.f32.mrf.mxu1 }
 0x396   : > { %v6962_v58 = vpop.f32.mrf.mxu1  ;;  %v7813_v47 = vpop.f32.mrf.mxu0 }
 0x397   : > { %v8148_v45 = vadd.f32 %v7813_v47, %v7277_v41  ;;  %v7285_v57 = vadd.f32 %v6962_v58, %v11280_v32 }
 0x398   : > { %v6964_v35 = vpop.f32.mrf.mxu1  ;;  %v7815_v51 = vpop.f32.mrf.mxu0 }
 0x399   : > { %v8149_v24 = vadd.f32 %v7815_v51, %v7278_v59  ;;  %v8416_v63 = vadd.f32 %v11664_v61, %v8148_v45  ;;  %v7283_v51 = vadd.f32 %v6956_v34, %v11272_v1 }
 0x39a   : > { %v6966_v55 = vpop.f32.mrf.mxu1  ;;  %v7817_v53 = vpop.f32.mrf.mxu0 }
 0x39b   : > { %v8150_v14 = vadd.f32 %v7817_v53, %v7279_v21  ;;  %v8480_v3 = vmax.f32 %v8416_v63, 0.0  ;;  %v8417_v26 = vadd.f32 %v11667_v40, %v8149_v24 }
 0x39c   : > { %v6968_v56 = vpop.f32.mrf.mxu1  ;;  %v7819_v13 = vpop.f32.mrf.mxu0 }
 0x39d   : > { %v8151_v54 = vadd.f32 %v7819_v13, %v7280_v17  ;;  %8723 = vxpose.xlu0.b32.start [1/16] %v8480_v3, 128  ;;  %v8481_v41 = vmax.f32 %v8417_v26, 0.0  ;;  %v8418_v2 = vadd.f32 %v11664_v61, %v8150_v14  ;;  %v7284_v26 = vadd.f32 %v6958_v39, %v11276_v27  ;;  %v8641_v27 = vld [vmem:[%s11450_s7 + $0xa8] sm:$0xff] }
 0x39e   : > { %v6972_v22 = vpop.f32.mrf.mxu1  ;;  %v7823_v47 = vpop.f32.mrf.mxu0  ;;  %v8625_v39 = vld [vmem:[%s11450_s7 + $0x28] sm:$0xff]  ;;  %9588 = vmatprep.subr.mxu1 %v8641_v27 }
 0x39f   : > { %8755 = vxpose.xlu1.b32.start [1/16] %v8481_v41, 128  ;;  %v8482_v59 = vmax.f32 %v8418_v2, 0.0  ;;  %v8419_v28 = vadd.f32 %v11667_v40, %v8151_v54  ;;  %9589 = vmatpush3.msra.mxu1 %v8625_v39 }
 0x3a0   : > { %v6974_v16 = vpop.f32.mrf.mxu1  ;;  %v7825_v45 = vpop.f32.mrf.mxu0 }
 0x3a1   : > { %8724 = vxpose.xlu0.b32.cont [2/16] %v8482_v59, 128  ;;  %v8544_v21 = vadd.f32 %v8482_v59, %v8480_v3  ;;  %v8483_v24 = vmax.f32 %v8419_v28, 0.0  ;;  %v7286_v3 = vadd.f32 %v6964_v35, %v11285_v5 }
 0x3a2   : > { %v6976_v20 = vpop.f32.mrf.mxu1  ;;  %v7827_v63 = vpop.f32.mrf.mxu0 }
 0x3a3   : > { %v8154_v55 = vadd.f32 %v7827_v63, %v7283_v51  ;;  %8756 = vxpose.xlu1.b32.cont [2/16] %v8483_v24, 128  ;;  %v8581_v53 = vadd.f32 %v8483_v24, %v8481_v41 }
 0x3a4   : > { %v6978_v17 = vpop.f32.mrf.mxu1  ;;  %v7829_v14 = vpop.f32.mrf.mxu0 }
 0x3a5   : > { %v8155_v56 = vadd.f32 %v7829_v14, %v7284_v26  ;;  %v8420_v13 = vadd.f32 %v11664_v61, %v8154_v55  ;;  %v7289_v14 = vadd.f32 %v6972_v22, %v11296_v10  ;;  %v7292_v39 = vadd.f32 %v6978_v17, %v11308_v6 }
 0x3a6   : > { %v6982_v1 = vpop.f32.mrf.mxu1  ;;  %v7833_v34 = vpop.f32.mrf.mxu0 }
 0x3a7   : > { %v8156_v54 = vadd.f32 %v7833_v34, %v7285_v57  ;;  %v8484_v2 = vmax.f32 %v8420_v13, 0.0  ;;  %v8421_v47 = vadd.f32 %v11667_v40, %v8155_v56  ;;  %v7290_v1 = vadd.f32 %v6974_v16, %v11301_v8  ;;  %v8640_v8 = vld [vmem:[%s11450_s7 + $0xa0] sm:$0xff] }
 0x3a8   : > { %v6984_v59 = vpop.f32.mrf.mxu1  ;;  %v7835_v28 = vpop.f32.mrf.mxu0  ;;  %v8624_v16 = vld [vmem:[%s11450_s7 + $0x20] sm:$0xff]  ;;  %9590 = vmatprep.subr.mxu1 %v8640_v8 }
 0x3a9   : > { %v8157_v41 = vadd.f32 %v7835_v28, %v7286_v3  ;;  %8725 = vxpose.xlu0.b32.cont [3/16] %v8484_v2, 128  ;;  %v8545_v45 = vadd.f32 %v8544_v21, %v8484_v2  ;;  %v8485_v32 = vmax.f32 %v8421_v47, 0.0  ;;  %v8422_v58 = vadd.f32 %v11664_v61, %v8156_v54  ;;  %9591 = vmatpush3.msra.mxu1 %v8624_v16 }
 0x3aa   : > { %v6986_v51 = vpop.f32.mrf.mxu1  ;;  %v7837_v24 = vpop.f32.mrf.mxu0  ;;  %v7291_v2 = vadd.f32 %v6976_v20, %v11304_v49 }
 0x3ab   : > { %8757 = vxpose.xlu1.b32.cont [3/16] %v8485_v32, 128  ;;  %v8582_v5 = vadd.f32 %v8581_v53, %v8485_v32  ;;  %v8486_v35 = vmax.f32 %v8422_v58, 0.0  ;;  %v8423_v63 = vadd.f32 %v11667_v40, %v8157_v41 }
 0x3ac   : > { %v6988_v26 = vpop.f32.mrf.mxu1  ;;  %v7839_v55 = vpop.f32.mrf.mxu0 }
 0x3ad   : > { %8726 = vxpose.xlu0.b32.cont [4/16] %v8486_v35, 128  ;;  %v8546_v57 = vadd.f32 %v8545_v45, %v8486_v35  ;;  %v8487_v56 = vmax.f32 %v8423_v63, 0.0 }
 0x3ae   : > { %v6992_v13 = vpop.f32.mrf.mxu1  ;;  %v7843_v21 = vpop.f32.mrf.mxu0 }
 0x3af   : > { %v8160_v34 = vadd.f32 %v7843_v21, %v7289_v14  ;;  %8758 = vxpose.xlu1.b32.cont [4/16] %v8487_v56, 128  ;;  %v8583_v3 = vadd.f32 %v8582_v5, %v8487_v56  ;;  %v7295_v56 = vadd.f32 %v6986_v51, %v11320_v50 }
 0x3b0   : > { %v6994_v53 = vpop.f32.mrf.mxu1  ;;  %v7845_v54 = vpop.f32.mrf.mxu0 }
 0x3b1   : > { %v8161_v47 = vadd.f32 %v7845_v54, %v7290_v1  ;;  %v8424_v27 = vadd.f32 %v11664_v61, %v8160_v34  ;;  %v7296_v54 = vadd.f32 %v6988_v26, %v11324_v18  ;;  %v8639_v18 = vld [vmem:[%s11450_s7 + $0x98] sm:$0xff] }
 0x3b2   : > { %v6996_v10 = vpop.f32.mrf.mxu1  ;;  %v7847_v22 = vpop.f32.mrf.mxu0  ;;  %v8623_v26 = vld [vmem:[%s11450_s7 + $0x18] sm:$0xff]  ;;  %9592 = vmatprep.subr.mxu1 %v8639_v18 }
 0x3b3   : > { %v8162_v59 = vadd.f32 %v7847_v22, %v7291_v2  ;;  %v8488_v28 = vmax.f32 %v8424_v27, 0.0  ;;  %v8425_v41 = vadd.f32 %v11667_v40, %v8161_v47  ;;  %v7297_v10 = vadd.f32 %v6992_v13, %v11328_v30  ;;  %9593 = vmatpush3.msra.mxu1 %v8623_v26 }
 0x3b4   : > { %v6998_v45 = vpop.f32.mrf.mxu1  ;;  %v7849_v32 = vpop.f32.mrf.mxu0 }
 0x3b5   : > { %v8163_v58 = vadd.f32 %v7849_v32, %v7292_v39  ;;  %8727 = vxpose.xlu0.b32.cont [5/16] %v8488_v28, 128  ;;  %v8547_v24 = vadd.f32 %v8546_v57, %v8488_v28  ;;  %v8489_v49 = vmax.f32 %v8425_v41, 0.0  ;;  %v8426_v20 = vadd.f32 %v11664_v61, %v8162_v59 }
 0x3b6   : > { %v7002_v5 = vpop.f32.mrf.mxu1  ;;  %v7853_v35 = vpop.f32.mrf.mxu0  ;;  %v7298_v59 = vadd.f32 %v6994_v53, %v11333_v33 }
 0x3b7   : > { %8759 = vxpose.xlu1.b32.cont [5/16] %v8489_v49, 128  ;;  %v8584_v6 = vadd.f32 %v8583_v3, %v8489_v49  ;;  %v8490_v17 = vmax.f32 %v8426_v20, 0.0  ;;  %v8427_v63 = vadd.f32 %v11667_v40, %v8163_v58 }
 0x3b8   : > { %v7004_v55 = vpop.f32.mrf.mxu1  ;;  %v7855_v14 = vpop.f32.mrf.mxu0 }
 0x3b9   : > { %8728 = vxpose.xlu0.b32.cont [6/16] %v8490_v17, 128  ;;  %v8548_v21 = vadd.f32 %v8547_v24, %v8490_v17  ;;  %v8491_v1 = vmax.f32 %v8427_v63, 0.0  ;;  %v7301_v17 = vadd.f32 %v7002_v5, %v11344_v11 }
 0x3ba   : > { %v7006_v34 = vpop.f32.mrf.mxu1  ;;  %v7857_v57 = vpop.f32.mrf.mxu0 }
 0x3bb   : > { %v8166_v2 = vadd.f32 %v7857_v57, %v7295_v56  ;;  %8760 = vxpose.xlu1.b32.cont [6/16] %v8491_v1, 128  ;;  %v8585_v47 = vadd.f32 %v8584_v6, %v8491_v1  ;;  %v7302_v1 = vadd.f32 %v7004_v55, %v11349_v37  ;;  %v8638_v37 = vld [vmem:[%s11450_s7 + $0x90] sm:$0xff] }
 0x3bc   : > { %v7008_v3 = vpop.f32.mrf.mxu1  ;;  %v7859_v27 = vpop.f32.mrf.mxu0  ;;  %v8622_v55 = vld [vmem:[%s11450_s7 + $0x10] sm:$0xff]  ;;  %9594 = vmatprep.subr.mxu1 %v8638_v37 }
 0x3bd   : > { %v8167_v22 = vadd.f32 %v7859_v27, %v7296_v54  ;;  %v8428_v39 = vadd.f32 %v11664_v61, %v8166_v2  ;;  %v7303_v27 = vadd.f32 %v7006_v34, %v11352_v7  ;;  %9595 = vmatpush3.msra.mxu1 %v8622_v55  ;;  %v12091_v37 = vld [vmem:[#allocation13_spill] sm:$0xff] }
 0x3be   : > { %v7012_v50 = vpop.f32.mrf.mxu1  ;;  %v7863_v51 = vpop.f32.mrf.mxu0 }
 0x3bf   : > { %v8168_v28 = vadd.f32 %v7863_v51, %v7297_v10  ;;  %v8492_v41 = vmax.f32 %v8428_v39, 0.0  ;;  %v8429_v8 = vadd.f32 %v11667_v40, %v8167_v22  ;;  %v7304_v39 = vadd.f32 %v7008_v3, %v11356_v4 }
 0x3c0   : > { %v7014_v16 = vpop.f32.mrf.mxu1  ;;  %v7865_v45 = vpop.f32.mrf.mxu0 }
 0x3c1   : > { %v8169_v32 = vadd.f32 %v7865_v45, %v7298_v59  ;;  %8729 = vxpose.xlu0.b32.cont [7/16] %v8492_v41, 128  ;;  %v8549_v58 = vadd.f32 %v8548_v21, %v8492_v41  ;;  %v8493_v30 = vmax.f32 %v8429_v8, 0.0  ;;  %v8430_v13 = vadd.f32 %v11664_v61, %v8168_v28 }
 0x3c2   : > { %v7016_v24 = vpop.f32.mrf.mxu1  ;;  %v7867_v49 = vpop.f32.mrf.mxu0 }
 0x3c3   : > { %8761 = vxpose.xlu1.b32.cont [7/16] %v8493_v30, 128  ;;  %v8586_v33 = vadd.f32 %v8585_v47, %v8493_v30  ;;  %v8494_v53 = vmax.f32 %v8430_v13, 0.0  ;;  %v8431_v20 = vadd.f32 %v11667_v40, %v8169_v32  ;;  %v7307_v30 = vadd.f32 %v7016_v24, %v11368_v36 }
 0x3c4   : > { %v7018_v35 = vpop.f32.mrf.mxu1  ;;  %v7869_v6 = vpop.f32.mrf.mxu0 }
 0x3c5   : > { %8730 = vxpose.xlu0.b32.cont [8/16] %v8494_v53, 128  ;;  %v8550_v63 = vadd.f32 %v8549_v58, %v8494_v53  ;;  %v8495_v14 = vmax.f32 %v8431_v20, 0.0  ;;  %v7308_v20 = vadd.f32 %v7018_v35, %v11372_v25 }
 0x3c6   : > { %v7022_v56 = vpop.f32.mrf.mxu1  ;;  %v7873_v21 = vpop.f32.mrf.mxu0 }
 0x3c7   : > { %v8172_v57 = vadd.f32 %v7873_v21, %v7301_v17  ;;  %8762 = vxpose.xlu1.b32.cont [8/16] %v8495_v14, 128  ;;  %v8587_v54 = vadd.f32 %v8586_v33, %v8495_v14  ;;  %v7309_v21 = vadd.f32 %v7022_v56, %v11376_v46 }
 0x3c8   : > { %v7024_v2 = vpop.f32.mrf.mxu1  ;;  %v7875_v47 = vpop.f32.mrf.mxu0 }
 0x3c9   : > { %v8173_v10 = vadd.f32 %v7875_v47, %v7302_v1  ;;  %v8432_v22 = vadd.f32 %v11664_v61, %v8172_v57  ;;  %v7310_v36 = vadd.f32 %v7024_v2, %v11381_v62 }
 0x3ca   : > { %v7026_v11 = vpop.f32.mrf.mxu1  ;;  %v7877_v5 = vpop.f32.mrf.mxu0 }
 0x3cb   : > { %v8174_v50 = vadd.f32 %v7877_v5, %v7303_v27  ;;  %v8496_v51 = vmax.f32 %v8432_v22, 0.0  ;;  %v8433_v59 = vadd.f32 %v11667_v40, %v8173_v10 }
 0x3cc   : > { %v7028_v28 = vpop.f32.mrf.mxu1  ;;  %v7879_v41 = vpop.f32.mrf.mxu0 }
 0x3cd   : > { %v8175_v8 = vadd.f32 %v7879_v41, %v7304_v39  ;;  %8731 = vxpose.xlu0.b32.cont [9/16] %v8496_v51, 128  ;;  %v8551_v18 = vadd.f32 %v8550_v63, %v8496_v51  ;;  %v8497_v7 = vmax.f32 %v8433_v59, 0.0  ;;  %v8434_v34 = vadd.f32 %v11664_v61, %v8174_v50 }
 0x3ce   : > { %v7032_v26 = vpop.f32.mrf.mxu1  ;;  %v7883_v16 = vpop.f32.mrf.mxu0 }
 0x3cf   : > { %8763 = vxpose.xlu1.b32.cont [9/16] %v8497_v7, 128  ;;  %v8588_v4 = vadd.f32 %v8587_v54, %v8497_v7  ;;  %v8498_v3 = vmax.f32 %v8434_v34, 0.0  ;;  %v8435_v45 = vadd.f32 %v11667_v40, %v8175_v8  ;;  %v7313_v55 = vadd.f32 %v7032_v26, %v12091_v37  ;;  %v12092_v7 = vld [vmem:[#allocation14_spill] sm:$0xff] }
 0x3d0   : > { %v7034_v32 = vpop.f32.mrf.mxu1  ;;  %v7885_v58 = vpop.f32.mrf.mxu0 }
 0x3d1   : > { %8732 = vxpose.xlu0.b32.cont [10/16] %v8498_v3, 128  ;;  %v8552_v13 = vadd.f32 %v8551_v18, %v8498_v3  ;;  %v8499_v49 = vmax.f32 %v8435_v45, 0.0  ;;  %v7314_v34 = vadd.f32 %v7034_v32, %v12092_v7  ;;  %v12093_v58 = vld [vmem:[#allocation15_spill] sm:$0xff] }
 0x3d2   : > { %v7036_v33 = vpop.f32.mrf.mxu1  ;;  %v7887_v53 = vpop.f32.mrf.mxu0 }
 0x3d3   : > { %v8178_v6 = vadd.f32 %v7887_v53, %v7307_v30  ;;  %8764 = vxpose.xlu1.b32.cont [10/16] %v8499_v49, 128  ;;  %v8589_v17 = vadd.f32 %v8588_v4, %v8499_v49  ;;  %v7315_v30 = vadd.f32 %v7036_v33, %v12093_v58 }
 0x3d4   : > { %v7038_v63 = vpop.f32.mrf.mxu1  ;;  %v7889_v14 = vpop.f32.mrf.mxu0 }
 0x3d5   : > { %v8179_v1 = vadd.f32 %v7889_v14, %v7308_v20  ;;  %v8436_v57 = vadd.f32 %v11664_v61, %v8178_v6  ;;  %v12094_v20 = vld [vmem:[#allocation16_spill] sm:$0xff] }
 0x3d6   : > { %v7042_v54 = vpop.f32.mrf.mxu1  ;;  %v7893_v47 = vpop.f32.mrf.mxu0  ;;  %v7316_v6 = vadd.f32 %v7038_v63, %v12094_v20 }
 0x3d7   : > { %v8180_v24 = vadd.f32 %v7893_v47, %v7309_v21  ;;  %v8500_v27 = vmax.f32 %v8436_v57, 0.0  ;;  %v8437_v10 = vadd.f32 %v11667_v40, %v8179_v1  ;;  %v8637_v21 = vld [vmem:[%s11450_s7 + $0x88] sm:$0xff]  ;;  %v8636_v57 = vld [vmem:[%s11450_s7 + $0x80] sm:$0xff] }
 0x3d8   : > { %v7044_v22 = vpop.f32.mrf.mxu1  ;;  %v7895_v25 = vpop.f32.mrf.mxu0  ;;  %v8621_v1 = vld [vmem:[%s11450_s7 + $0x8] sm:$0xff]  ;;  %9596 = vmatprep.subr.mxu1 %v8637_v21 }
 0x3d9   : > { %v8181_v35 = vadd.f32 %v7895_v25, %v7310_v36  ;;  %8733 = vxpose.xlu0.b32.cont [11/16] %v8500_v27, 128  ;;  %v8553_v11 = vadd.f32 %v8552_v13, %v8500_v27  ;;  %v8501_v5 = vmax.f32 %v8437_v10, 0.0  ;;  %v8438_v39 = vadd.f32 %v11664_v61, %v8180_v24  ;;  %v8620_v36 = vld [vmem:[%s11450_s7] sm:$0xff]  ;;  %9597 = vmatpush3.msra.mxu1 %v8621_v1  ;;  %s406_s7 = scalar_lea.vmem %s11912_s5, %s405_s28 }
 0x3da   : > { %v7046_v46 = vpop.f32.mrf.mxu1  ;;  %v7897_v56 = vpop.f32.mrf.mxu0  ;;  %9598 = vmatprep.subr.mxu1 %v8636_v57 }
 0x3db   : > { %8765 = vxpose.xlu1.b32.cont [11/16] %v8501_v5, 128  ;;  %v8590_v50 = vadd.f32 %v8589_v17, %v8501_v5  ;;  %v8502_v51 = vmax.f32 %v8438_v39, 0.0  ;;  %v8439_v59 = vadd.f32 %v11667_v40, %v8181_v35  ;;  %9599 = vmatpush3.msra.mxu1 %v8620_v36  ;;  %v12095_v56 = vld [vmem:[#allocation17_spill] sm:$0xff] }
 0x3dc   : > { %v7048_v62 = vpop.f32.mrf.mxu1  ;;  %v7899_v2 = vpop.f32.mrf.mxu0 }
 0x3dd   : > { %8734 = vxpose.xlu0.b32.cont [12/16] %v8502_v51, 128  ;;  %v8554_v28 = vadd.f32 %v8553_v11, %v8502_v51  ;;  %v8503_v41 = vmax.f32 %v8439_v59, 0.0 }
 0x3de   : > { %v7052_v8 = vpop.f32.mrf.mxu1  ;;  %v7903_v18 = vpop.f32.mrf.mxu0 }
 0x3df   : > { %v8184_v16 = vadd.f32 %v7903_v18, %v7313_v55  ;;  %8766 = vxpose.xlu1.b32.cont [12/16] %v8503_v41, 128  ;;  %v8591_v4 = vadd.f32 %v8590_v50, %v8503_v41  ;;  %v7319_v50 = vadd.f32 %v7046_v46, %v12095_v56  ;;  %v12096_v55 = vld [vmem:[#allocation18_spill] sm:$0xff]  ;;  %v12098_v46 = vld [vmem:[#allocation20_spill] sm:$0xff] }
 0x3e0   : > { %v7054_v3 = vpop.f32.mrf.mxu1  ;;  %v7905_v45 = vpop.f32.mrf.mxu0 }
 0x3e1   : > { %v8185_v13 = vadd.f32 %v7905_v45, %v7314_v34  ;;  %v8440_v26 = vadd.f32 %v11664_v61, %v8184_v16  ;;  %v12097_v16 = vld [vmem:[#allocation19_spill] sm:$0xff] }
 0x3e2   : > { %v7056_v49 = vpop.f32.mrf.mxu1  ;;  %v7907_v53 = vpop.f32.mrf.mxu0 }
 0x3e3   : > { %v8186_v17 = vadd.f32 %v7907_v53, %v7315_v30  ;;  %v8504_v14 = vmax.f32 %v8440_v26, 0.0  ;;  %v8441_v32 = vadd.f32 %v11667_v40, %v8185_v13  ;;  %v7322_v26 = vadd.f32 %v7054_v3, %v12098_v46 }
 0x3e4   : > { %v7058_v54 = vpop.f32.mrf.mxu1  ;;  %v7909_v47 = vpop.f32.mrf.mxu0 }
 0x3e5   : > { %v8187_v24 = vadd.f32 %v7909_v47, %v7316_v6  ;;  %8735 = vxpose.xlu0.b32.cont [13/16] %v8504_v14, 128  ;;  %v8555_v33 = vadd.f32 %v8554_v28, %v8504_v14  ;;  %v8505_v27 = vmax.f32 %v8441_v32, 0.0  ;;  %v8442_v10 = vadd.f32 %v11664_v61, %v8186_v17 }
 0x3e6   : > { %v7062_v22 = vpop.f32.mrf.mxu1  ;;  %v7913_v63 = vpop.f32.mrf.mxu0  ;;  %v7320_v28 = vadd.f32 %v7048_v62, %v12096_v55 }
 0x3e7   : > { %8767 = vxpose.xlu1.b32.cont [13/16] %v8505_v27, 128  ;;  %v8592_v25 = vadd.f32 %v8591_v4, %v8505_v27  ;;  %v8506_v35 = vmax.f32 %v8442_v10, 0.0  ;;  %v8443_v11 = vadd.f32 %v11667_v40, %v8187_v24  ;;  %v7321_v4 = vadd.f32 %v7052_v8, %v12097_v16  ;;  %v12099_v24 = vld [vmem:[#allocation21_spill] sm:$0xff] }
 0x3e8   : > { %v7064_v5 = vpop.f32.mrf.mxu1  ;;  %v7915_v39 = vpop.f32.mrf.mxu0 }
 0x3e9   : > { %8736 = vxpose.xlu0.b32.cont [14/16] %v8506_v35, 128  ;;  %v8556_v51 = vadd.f32 %v8555_v33, %v8506_v35  ;;  %v8507_v59 = vmax.f32 %v8443_v11, 0.0  ;;  %v7325_v33 = vadd.f32 %v7062_v22, %v12099_v24  ;;  %v12100_v35 = vld [vmem:[#allocation22_spill] sm:$0xff]  ;;  %v12102_v22 = vld [vmem:[#allocation24_spill] sm:$0xff] }
 0x3ea   : > { %v7066_v2 = vpop.f32.mrf.mxu1  ;;  %v7917_v37 = vpop.f32.mrf.mxu0  ;;  %v7326_v11 = vadd.f32 %v7064_v5, %v12100_v35 }
 0x3eb   : > { %v8190_v41 = vadd.f32 %v7917_v37, %v7319_v50  ;;  %8768 = vxpose.xlu1.b32.cont [14/16] %v8507_v59, 128  ;;  %v8593_v18 = vadd.f32 %v8592_v25, %v8507_v59  ;;  %v12101_v59 = vld [vmem:[#allocation23_spill] sm:$0xff] }
 0x3ec   : > { %v7068_v7 = vpop.f32.mrf.mxu1  ;;  %v7919_v34 = vpop.f32.mrf.mxu0  ;;  %v7327_v37 = vadd.f32 %v7066_v2, %v12101_v59 }
 0x3ed   : > { %v8191_v45 = vadd.f32 %v7919_v34, %v7320_v28  ;;  %v8444_v58 = vadd.f32 %v11664_v61, %v8190_v41  ;;  %v7328_v34 = vadd.f32 %v7068_v7, %v12102_v22 }
 0x3ee   : > { %v7072_v30 = vpop.f32.mrf.mxu1  ;;  %v7923_v13 = vpop.f32.mrf.mxu0 }
 0x3ef   : > { %v8192_v49 = vadd.f32 %v7923_v13, %v7321_v4  ;;  %v8508_v53 = vmax.f32 %v8444_v58, 0.0  ;;  %v8445_v20 = vadd.f32 %v11667_v40, %v8191_v45 }
 0x3f0   : > { %v7074_v6 = vpop.f32.mrf.mxu1  ;;  %v7925_v62 = vpop.f32.mrf.mxu0 }
 0x3f1   : > { %v8193_v17 = vadd.f32 %v7925_v62, %v7322_v26  ;;  %8737 = vxpose.xlu0.b32.cont [15/16] %v8508_v53, 128  ;;  %v8557_v14 = vadd.f32 %v8556_v51, %v8508_v53  ;;  %v8509_v32 = vmax.f32 %v8445_v20, 0.0  ;;  %v8446_v21 = vadd.f32 %v11664_v61, %v8192_v49 }
 0x3f2   : > { %v7076_v8 = vpop.f32.mrf.mxu1  ;;  %v7927_v1 = vpop.f32.mrf.mxu0 }
 0x3f3   : > { %8769 = vxpose.xlu1.b32.cont [15/16] %v8509_v32, 128  ;;  %v8594_v57 = vadd.f32 %v8593_v18, %v8509_v32  ;;  %v8510_v54 = vmax.f32 %v8446_v21, 0.0  ;;  %v8447_v47 = vadd.f32 %v11667_v40, %v8193_v17  ;;  %v7331_v17 = vadd.f32 %v7076_v8, %v11500_v42  ;;  %v12104_v42 = vld [vmem:[#allocation26_spill] sm:$0xff] }
 0x3f4   : > { %v7078_v3 = vpop.f32.mrf.mxu1  ;;  %v7929_v36 = vpop.f32.mrf.mxu0 }
 0x3f5   : > { %8738 = vxpose.xlu0.b32.end [16/16] %v8510_v54, 128  ;;  %v8558_v27 = vadd.f32 %v8557_v14, %v8510_v54  ;;  %v8511_v10 = vmax.f32 %v8447_v47, 0.0 }
 0x3f6   : > { %v7082_v63 = vpop.f32.mrf.mxu1  ;;  %v7933_v25 = vpop.f32.mrf.mxu0 }
 0x3f7   : > { %v8196_v39 = vadd.f32 %v7933_v25, %v7325_v33  ;;  %8770 = vxpose.xlu1.b32.end [16/16] %v8511_v10, 128  ;;  %v8595_v56 = vadd.f32 %v8594_v57, %v8511_v10  ;;  %v7332_v57 = vadd.f32 %v7078_v3, %v11505_v12  ;;  %v12103_v33 = vld [vmem:[#allocation25_spill] sm:$0xff] }
 0x3f8   : > { %v7084_v50 = vpop.f32.mrf.mxu1  ;;  %v7935_v51 = vpop.f32.mrf.mxu0 }
 0x3f9   : > { %v8197_v55 = vadd.f32 %v7935_v51, %v7326_v11  ;;  %v8448_v28 = vadd.f32 %v11664_v61, %v8196_v39  ;;  %v7334_v8 = vadd.f32 %v7084_v50, %v12104_v42 }
 0x3fa   : > { %v7086_v41 = vpop.f32.mrf.mxu1  ;;  %v7937_v18 = vpop.f32.mrf.mxu0 }
 0x3fb   : > { %v8198_v16 = vadd.f32 %v7937_v18, %v7327_v37  ;;  %v8512_v4 = vmax.f32 %v8448_v28, 0.0  ;;  %v8449_v45 = vadd.f32 %v11667_v40, %v8197_v55 }
 0x3fc   : > { %v7088_v58 = vpop.f32.mrf.mxu1  ;;  %v7939_v5 = vpop.f32.mrf.mxu0 }
 0x3fd   : > { %v8450_v30 = vadd.f32 %v11664_v61, %v8198_v16  ;;  %v8199_v13 = vadd.f32 %v7939_v5, %v7328_v34  ;;  %8787 = vxpose.xlu0.b32.start [1/16] %v8512_v4, 128  ;;  %v8559_v46 = vadd.f32 %v8558_v27, %v8512_v4  ;;  %v8513_v26 = vmax.f32 %v8449_v45, 0.0  ;;  %v12105_v4 = vld [vmem:[#allocation27_spill] sm:$0xff] }
 0x3fe   : > { %v7092_v2 = vpop.f32.mrf.mxu1  ;;  %v7943_v49 = vpop.f32.mrf.mxu0  ;;  %v7333_v27 = vadd.f32 %v7082_v63, %v12103_v33 }
 0x3ff   : > { %v8514_v53 = vmax.f32 %v8450_v30, 0.0  ;;  %v8451_v20 = vadd.f32 %v11667_v40, %v8199_v13  ;;  %8819 = vxpose.xlu1.b32.start [1/16] %v8513_v26, 128  ;;  %v8596_v6 = vadd.f32 %v8595_v56, %v8513_v26  ;;  %v7337_v45 = vadd.f32 %v7092_v2, %v12105_v4  ;;  %v12108_v2 = vld [vmem:[#allocation30_spill] sm:$0xff] }
 0x400   : > { %v7094_v7 = vpop.f32.mrf.mxu1  ;;  %v7945_v62 = vpop.f32.mrf.mxu0 }
 0x401   : > { %v8515_v14 = vmax.f32 %v8451_v20, 0.0  ;;  %v8560_v32 = vadd.f32 %v8559_v46, %v8514_v53  ;;  %8788 = vxpose.xlu0.b32.cont [2/16] %v8514_v53, 128  ;;  %v12106_v46 = vld [vmem:[#allocation28_spill] sm:$0xff]  ;;  %v12107_v62 = vld [vmem:[#allocation29_spill] sm:$0xff] }
 0x402   : > { %v7096_v21 = vpop.f32.mrf.mxu1  ;;  %v7947_v1 = vpop.f32.mrf.mxu0  ;;  %v7338_v26 = vadd.f32 %v7094_v7, %v12106_v46 }
 0x403   : > { %v8597_v54 = vadd.f32 %v8596_v6, %v8515_v14  ;;  %v8202_v47 = vadd.f32 %v7947_v1, %v7331_v17  ;;  %8820 = vxpose.xlu1.b32.cont [2/16] %v8515_v14, 128  ;;  %v7339_v17 = vadd.f32 %v7096_v21, %v12107_v62 }
 0x404   : > { %v7098_v36 = vpop.f32.mrf.mxu1  ;;  %v7949_v24 = vpop.f32.mrf.mxu0 }
 0x405   : > { %v8452_v10 = vadd.f32 %v11664_v61, %v8202_v47  ;;  %v8203_v25 = vadd.f32 %v7949_v24, %v7332_v57 }
 0x406   : > { %v7102_v35 = vpop.f32.mrf.mxu1  ;;  %v7953_v11 = vpop.f32.mrf.mxu0 }
 0x407   : > { %v8516_v39 = vmax.f32 %v8452_v10, 0.0  ;;  %v8453_v56 = vadd.f32 %v11667_v40, %v8203_v25  ;;  %v8204_v51 = vadd.f32 %v7953_v11, %v7333_v27 }
 0x408   : > { %v7104_v59 = vpop.f32.mrf.mxu1  ;;  %v7955_v12 = vpop.f32.mrf.mxu0 }
 0x409   : > { %v8561_v3 = vadd.f32 %v8560_v32, %v8516_v39  ;;  %v8517_v37 = vmax.f32 %v8453_v56, 0.0  ;;  %v8454_v55 = vadd.f32 %v11664_v61, %v8204_v51  ;;  %v8205_v28 = vadd.f32 %v7955_v12, %v7334_v8  ;;  %8789 = vxpose.xlu0.b32.cont [3/16] %v8516_v39, 128 }
 0x40a   : > { %v7106_v63 = vpop.f32.mrf.mxu1  ;;  %v7957_v41 = vpop.f32.mrf.mxu0 }
 0x40b   : > { %v8598_v18 = vadd.f32 %v8597_v54, %v8517_v37  ;;  %v8518_v22 = vmax.f32 %v8454_v55, 0.0  ;;  %v8455_v34 = vadd.f32 %v11667_v40, %v8205_v28  ;;  %8821 = vxpose.xlu1.b32.cont [3/16] %v8517_v37, 128  ;;  %v7340_v54 = vadd.f32 %v7098_v36, %v12108_v2 }
 0x40c   : > { %v7108_v50 = vpop.f32.mrf.mxu1  ;;  %v7959_v16 = vpop.f32.mrf.mxu0  ;;  %v7343_v59 = vadd.f32 %v7106_v63, %v11556_v44  ;;  %v12110_v44 = vld [vmem:[#allocation32_spill] sm:$0xff] }
 0x40d   : > { %v8562_v58 = vadd.f32 %v8561_v3, %v8518_v22  ;;  %v8519_v5 = vmax.f32 %v8455_v34, 0.0  ;;  %8790 = vxpose.xlu0.b32.cont [4/16] %v8518_v22, 128  ;;  %v7344_v28 = vadd.f32 %v7108_v50, %v11561_v9  ;;  %v12109_v16 = vld [vmem:[#allocation31_spill] sm:$0xff] }
 0x40e   : > { %v7112_v30 = vpop.f32.mrf.mxu1  ;;  %v7963_v13 = vpop.f32.mrf.mxu0 }
 0x40f   : > { %v8599_v49 = vadd.f32 %v8598_v18, %v8519_v5  ;;  %v8208_v53 = vadd.f32 %v7963_v13, %v7337_v45  ;;  %8822 = vxpose.xlu1.b32.cont [4/16] %v8519_v5, 128  ;;  %v7345_v4 = vadd.f32 %v7112_v30, %v12109_v16 }
 0x410   : > { %v7114_v20 = vpop.f32.mrf.mxu1  ;;  %v7965_v6 = vpop.f32.mrf.mxu0 }
 0x411   : > { %v8456_v14 = vadd.f32 %v11664_v61, %v8208_v53  ;;  %v8209_v32 = vadd.f32 %v7965_v6, %v7338_v26  ;;  %v7346_v63 = vadd.f32 %v7114_v20, %v12110_v44 }
 0x412   : > { %v7116_v1 = vpop.f32.mrf.mxu1  ;;  %v7967_v57 = vpop.f32.mrf.mxu0 }
 0x413   : > { %v8520_v47 = vmax.f32 %v8456_v14, 0.0  ;;  %v8457_v24 = vadd.f32 %v11667_v40, %v8209_v32  ;;  %v8210_v33 = vadd.f32 %v7967_v57, %v7339_v17 }
 0x414   : > { %v7118_v27 = vpop.f32.mrf.mxu1  ;;  %v7969_v7 = vpop.f32.mrf.mxu0 }
 0x415   : > { %v8563_v10 = vadd.f32 %v8562_v58, %v8520_v47  ;;  %v8521_v25 = vmax.f32 %v8457_v24, 0.0  ;;  %v8458_v35 = vadd.f32 %v11664_v61, %v8210_v33  ;;  %v8211_v11 = vadd.f32 %v7969_v7, %v7340_v54  ;;  %8791 = vxpose.xlu0.b32.cont [5/16] %v8520_v47, 128  ;;  %v12111_v54 = vld [vmem:[#allocation33_spill] sm:$0xff] }
 0x416   : > { %v7122_v21 = vpop.f32.mrf.mxu1  ;;  %v7973_v42 = vpop.f32.mrf.mxu0 }
 0x417   : > { %v8600_v8 = vadd.f32 %v8599_v49, %v8521_v25  ;;  %v8522_v39 = vmax.f32 %v8458_v35, 0.0  ;;  %v8459_v56 = vadd.f32 %v11667_v40, %v8211_v11  ;;  %8823 = vxpose.xlu1.b32.cont [5/16] %v8521_v25, 128  ;;  %v7349_v47 = vadd.f32 %v7122_v21, %v12111_v54 }
 0x418   : > { %v7124_v36 = vpop.f32.mrf.mxu1  ;;  %v7975_v51 = vpop.f32.mrf.mxu0 }
 0x419   : > { %v8564_v12 = vadd.f32 %v8563_v10, %v8522_v39  ;;  %v8523_v3 = vmax.f32 %v8459_v56, 0.0  ;;  %8792 = vxpose.xlu0.b32.cont [6/16] %v8522_v39, 128  ;;  %v7350_v10 = vadd.f32 %v7124_v36, %v11587_v23 }
 0x41a   : > { %v7126_v37 = vpop.f32.mrf.mxu1  ;;  %v7977_v55 = vpop.f32.mrf.mxu0 }
 0x41b   : > { %v8601_v41 = vadd.f32 %v8600_v8, %v8523_v3  ;;  %v8214_v18 = vadd.f32 %v7977_v55, %v7343_v59  ;;  %8824 = vxpose.xlu1.b32.cont [6/16] %v8523_v3, 128  ;;  %v12112_v8 = vld [vmem:[#allocation34_spill] sm:$0xff] }
 0x41c   : > { %v7128_v22 = vpop.f32.mrf.mxu1  ;;  %v7979_v34 = vpop.f32.mrf.mxu0  ;;  %v7351_v39 = vadd.f32 %v7126_v37, %v12112_v8 }
 0x41d   : > { %v8460_v45 = vadd.f32 %v11664_v61, %v8214_v18  ;;  %v8215_v58 = vadd.f32 %v7979_v34, %v7344_v28 }
 0x41e   : > { %v7132_v5 = vpop.f32.mrf.mxu1  ;;  %v7983_v13 = vpop.f32.mrf.mxu0 }
 0x41f   : > { %v8524_v46 = vmax.f32 %v8460_v45, 0.0  ;;  %v8461_v26 = vadd.f32 %v11667_v40, %v8215_v58  ;;  %v8216_v49 = vadd.f32 %v7983_v13, %v7345_v4 }
 0x420   : > { %v7134_v53 = vpop.f32.mrf.mxu1  ;;  %v7985_v9 = vpop.f32.mrf.mxu0 }
 0x421   : > { %v8565_v50 = vadd.f32 %v8564_v12, %v8524_v46  ;;  %v8525_v6 = vmax.f32 %v8461_v26, 0.0  ;;  %v8462_v62 = vadd.f32 %v11664_v61, %v8216_v49  ;;  %v8217_v17 = vadd.f32 %v7985_v9, %v7346_v63  ;;  %8793 = vxpose.xlu0.b32.cont [7/16] %v8524_v46, 128  ;;  %v12113_v12 = vld [vmem:[#allocation35_spill] sm:$0xff] }
 0x422   : > { %v7136_v30 = vpop.f32.mrf.mxu1  ;;  %v7987_v14 = vpop.f32.mrf.mxu0  ;;  %v7352_v3 = vadd.f32 %v7128_v22, %v12113_v12 }
 0x423   : > { %v8602_v32 = vadd.f32 %v8601_v41, %v8525_v6  ;;  %v8526_v1 = vmax.f32 %v8462_v62, 0.0  ;;  %v8463_v57 = vadd.f32 %v11667_v40, %v8217_v17  ;;  %8825 = vxpose.xlu1.b32.cont [7/16] %v8525_v6, 128  ;;  %v7355_v63 = vadd.f32 %v7136_v30, %v11607_v31 }
 0x424   : > { %v7138_v20 = vpop.f32.mrf.mxu1  ;;  %v7989_v2 = vpop.f32.mrf.mxu0 }
 0x425   : > { %v8566_v24 = vadd.f32 %v8565_v50, %v8526_v1  ;;  %v8527_v33 = vmax.f32 %v8463_v57, 0.0  ;;  %8794 = vxpose.xlu0.b32.cont [8/16] %v8526_v1, 128  ;;  %v7356_v9 = vadd.f32 %v7138_v20, %v11612_v52 }
 0x426   : > { %v7142_v27 = vpop.f32.mrf.mxu1  ;;  %v7993_v7 = vpop.f32.mrf.mxu0 }
 0x427   : > { %v8603_v25 = vadd.f32 %v8602_v32, %v8527_v33  ;;  %v8220_v35 = vadd.f32 %v7993_v7, %v7349_v47  ;;  %8826 = vxpose.xlu1.b32.cont [8/16] %v8527_v33, 128  ;;  %v7357_v31 = vadd.f32 %v7142_v27, %v11617_v38 }
 0x428   : > { %v7144_v11 = vpop.f32.mrf.mxu1  ;;  %v7995_v42 = vpop.f32.mrf.mxu0 }
 0x429   : > { %v8464_v56 = vadd.f32 %v11664_v61, %v8220_v35  ;;  %v8221_v51 = vadd.f32 %v7995_v42, %v7350_v10  ;;  %v7358_v2 = vadd.f32 %v7144_v11, %v11621_v29 }
 0x42a   : > { %v7146_v21 = vpop.f32.mrf.mxu1  ;;  %v7997_v59 = vpop.f32.mrf.mxu0 }
 0x42b   : > { %v8528_v55 = vmax.f32 %v8464_v56, 0.0  ;;  %v8465_v28 = vadd.f32 %v11667_v40, %v8221_v51  ;;  %v8222_v23 = vadd.f32 %v7997_v59, %v7351_v39 }
 0x42c   : > { %v7148_v36 = vpop.f32.mrf.mxu1  ;;  %v7999_v41 = vpop.f32.mrf.mxu0 }
 0x42d   : > { %v8567_v18 = vadd.f32 %v8566_v24, %v8528_v55  ;;  %v8529_v34 = vmax.f32 %v8465_v28, 0.0  ;;  %v8466_v37 = vadd.f32 %v11664_v61, %v8222_v23  ;;  %v8223_v16 = vadd.f32 %v7999_v41, %v7352_v3  ;;  %8795 = vxpose.xlu0.b32.cont [9/16] %v8528_v55, 128 }
 0x42e   : > { %v7152_v4 = vpop.f32.mrf.mxu1  ;;  %v8003_v45 = vpop.f32.mrf.mxu0 }
 0x42f   : > { %v8604_v58 = vadd.f32 %v8603_v25, %v8529_v34  ;;  %v8530_v5 = vmax.f32 %v8466_v37, 0.0  ;;  %v8467_v13 = vadd.f32 %v11667_v40, %v8223_v16  ;;  %8827 = vxpose.xlu1.b32.cont [9/16] %v8529_v34, 128  ;;  %v7361_v21 = vadd.f32 %v7152_v4, %v11631_v19 }
 0x430   : > { %v7154_v22 = vpop.f32.mrf.mxu1  ;;  %v8005_v44 = vpop.f32.mrf.mxu0 }
 0x431   : > { %v8568_v46 = vadd.f32 %v8567_v18, %v8530_v5  ;;  %v8531_v26 = vmax.f32 %v8467_v13, 0.0  ;;  %8796 = vxpose.xlu0.b32.cont [10/16] %v8530_v5, 128  ;;  %v7362_v23 = vadd.f32 %v7154_v22, %v11635_v0 }
 0x432   : > { %v7156_v49 = vpop.f32.mrf.mxu1  ;;  %v8007_v53 = vpop.f32.mrf.mxu0 }
 0x433   : > { %v8605_v50 = vadd.f32 %v8604_v58, %v8531_v26  ;;  %v8226_v6 = vadd.f32 %v8007_v53, %v7355_v63  ;;  %8828 = vxpose.xlu1.b32.cont [10/16] %v8531_v26, 128  ;;  %v7363_v19 = vadd.f32 %v7156_v49, %v11639_v43 }
 0x434   : > { %v7158_v62 = vpop.f32.mrf.mxu1  ;;  %v8009_v17 = vpop.f32.mrf.mxu0 }
 0x435   : > { %v8468_v30 = vadd.f32 %v11664_v61, %v8226_v6  ;;  %v8227_v14 = vadd.f32 %v8009_v17, %v7356_v9  ;;  %v8739_v32 = vpop.trf.xlu0  ;;  %v7364_v0 = vadd.f32 %v7158_v62, %v11644_v60 }
 0x436   : > { %v7162_v1 = vpop.f32.mrf.mxu1  ;;  %v8013_v57 = vpop.f32.mrf.mxu0  ;;  %8851 = vst [vmem:[%s11791_s18] sm:$0xff] %v8739_v32 }
 0x437   : > { %v8532_v54 = vmax.f32 %v8468_v30, 0.0  ;;  %v8469_v52 = vadd.f32 %v11667_v40, %v8227_v14  ;;  %v8228_v20 = vadd.f32 %v8013_v57, %v7357_v31  ;;  %v8771_v47 = vpop.trf.xlu1 }
 0x438   : > { %v7164_v24 = vpop.f32.mrf.mxu1  ;;  %v8015_v33 = vpop.f32.mrf.mxu0  ;;  %8883 = vst [vmem:[%s11791_s18 + $0x100] sm:$0xff] %v8771_v47 }
 0x439   : > { %v8569_v7 = vadd.f32 %v8568_v46, %v8532_v54  ;;  %v8533_v38 = vmax.f32 %v8469_v52, 0.0  ;;  %v8470_v27 = vadd.f32 %v11664_v61, %v8228_v20  ;;  %v8229_v10 = vadd.f32 %v8015_v33, %v7358_v2  ;;  %8797 = vxpose.xlu0.b32.cont [11/16] %v8532_v54, 128  ;;  %v8740_v25 = vpop.trf.xlu0  ;;  %v12114_v33 = vld [vmem:[#allocation4_spill] sm:$0xff] }
 0x43a   : > { %v7166_v35 = vpop.f32.mrf.mxu1  ;;  %v8017_v42 = vpop.f32.mrf.mxu0  ;;  %8853 = vst [vmem:[%s11791_s18 + $0x10] sm:$0xff] %v8740_v25  ;;  %v12115_v25 = vld [vmem:[#allocation5_spill] sm:$0xff] }
 0x43b   : > { %v8606_v29 = vadd.f32 %v8605_v50, %v8533_v38  ;;  %v8534_v11 = vmax.f32 %v8470_v27, 0.0  ;;  %v8471_v8 = vadd.f32 %v11667_v40, %v8229_v10  ;;  %8829 = vxpose.xlu1.b32.cont [11/16] %v8533_v38, 128  ;;  %v8772_v39 = vpop.trf.xlu1  ;;  %v7367_v14 = vadd.f32 %v7166_v35, %v11648_v48 }
 0x43c   : > { %v7168_v56 = vpop.f32.mrf.mxu1  ;;  %v8019_v51 = vpop.f32.mrf.mxu0  ;;  %8885 = vst [vmem:[%s11791_s18 + $0x110] sm:$0xff] %v8772_v39 }
 0x43d   : > { %v8570_v59 = vadd.f32 %v8569_v7, %v8534_v11  ;;  %v8535_v12 = vmax.f32 %v8471_v8, 0.0  ;;  %8798 = vxpose.xlu0.b32.cont [12/16] %v8534_v11, 128  ;;  %v8741_v3 = vpop.trf.xlu0  ;;  %v7368_v54 = vadd.f32 %v7168_v56, %v11651_v15 }
 0x43e   : > { %v7172_v55 = vpop.f32.mrf.mxu1  ;;  %v8023_v28 = vpop.f32.mrf.mxu0  ;;  %8855 = vst [vmem:[%s11791_s18 + $0x20] sm:$0xff] %v8741_v3 }
 0x43f   : > { %v8607_v36 = vadd.f32 %v8606_v29, %v8535_v12  ;;  %v8232_v41 = vadd.f32 %v8023_v28, %v7361_v21  ;;  %8830 = vxpose.xlu1.b32.cont [12/16] %v8535_v12, 128  ;;  %v8773_v18 = vpop.trf.xlu1  ;;  %v7369_v7 = vadd.f32 %v7172_v55, %v12114_v33 }
 0x440   : > { %v7174_v34 = vpop.f32.mrf.mxu1  ;;  %v8025_v37 = vpop.f32.mrf.mxu0  ;;  %8887 = vst [vmem:[%s11791_s18 + $0x120] sm:$0xff] %v8773_v18 }
 0x441   : > { %v8472_v16 = vadd.f32 %v11664_v61, %v8232_v41  ;;  %v8233_v4 = vadd.f32 %v8025_v37, %v7362_v23  ;;  %v8742_v45 = vpop.trf.xlu0  ;;  %v7370_v35 = vadd.f32 %v7174_v34, %v12115_v25 }
 0x442   : > { %v8027_v58 = vpop.f32.mrf.mxu0  ;;  %v7176_v5 = vpop.f32.mrf.mxu1  ;;  %8857 = vst [vmem:[%s11791_s18 + $0x30] sm:$0xff] %v8742_v45 }
 0x443   : > { %v8536_v13 = vmax.f32 %v8472_v16, 0.0  ;;  %v8473_v22 = vadd.f32 %v11667_v40, %v8233_v4  ;;  %v8234_v44 = vadd.f32 %v8027_v58, %v7363_v19  ;;  %v8774_v63 = vpop.trf.xlu1 }
 0x444   : > { %v8029_v46 = vpop.f32.mrf.mxu0  ;;  %v7178_v26 = vpop.f32.mrf.mxu1  ;;  %8889 = vst [vmem:[%s11791_s18 + $0x130] sm:$0xff] %v8774_v63 }
 0x445   : > { %v8571_v43 = vadd.f32 %v8570_v59, %v8536_v13  ;;  %v8537_v49 = vmax.f32 %v8473_v22, 0.0  ;;  %v8474_v53 = vadd.f32 %v11664_v61, %v8234_v44  ;;  %v8235_v9 = vadd.f32 %v8029_v46, %v7364_v0  ;;  %8799 = vxpose.xlu0.b32.cont [13/16] %v8536_v13, 128  ;;  %v8743_v50 = vpop.trf.xlu0 }
 0x446   : > { %v8033_v6 = vpop.f32.mrf.mxu0  ;;  %8859 = vst [vmem:[%s11791_s18 + $0x40] sm:$0xff] %v8743_v50 }
 0x447   : > { %v8608_v60 = vadd.f32 %v8607_v36, %v8537_v49  ;;  %v8538_v62 = vmax.f32 %v8474_v53, 0.0  ;;  %v8475_v17 = vadd.f32 %v11667_v40, %v8235_v9  ;;  %8831 = vxpose.xlu1.b32.cont [13/16] %v8537_v49, 128  ;;  %v8775_v31 = vpop.trf.xlu1 }
 0x448   : > { %v8035_v30 = vpop.f32.mrf.mxu0  ;;  %8891 = vst [vmem:[%s11791_s18 + $0x140] sm:$0xff] %v8775_v31 }
 0x449   : > { %v8572_v32 = vadd.f32 %v8571_v43, %v8538_v62  ;;  %v8539_v1 = vmax.f32 %v8475_v17, 0.0  ;;  %8800 = vxpose.xlu0.b32.cont [14/16] %v8538_v62, 128  ;;  %v8744_v57 = vpop.trf.xlu0 }
 0x44a   : > { %v8037_v2 = vpop.f32.mrf.mxu0  ;;  %8861 = vst [vmem:[%s11791_s18 + $0x50] sm:$0xff] %v8744_v57 }
 0x44b   : > { %v8609_v52 = vadd.f32 %v8608_v60, %v8539_v1  ;;  %v8238_v20 = vadd.f32 %v8037_v2, %v7367_v14  ;;  %8832 = vxpose.xlu1.b32.cont [14/16] %v8539_v1, 128  ;;  %v8776_v47 = vpop.trf.xlu1 }
 0x44c   : > { %v8039_v24 = vpop.f32.mrf.mxu0  ;;  %8893 = vst [vmem:[%s11791_s18 + $0x150] sm:$0xff] %v8776_v47 }
 0x44d   : > { %v8476_v48 = vadd.f32 %v11664_v61, %v8238_v20  ;;  %v8239_v38 = vadd.f32 %v8039_v24, %v7368_v54  ;;  %v8745_v27 = vpop.trf.xlu0 }
 0x44e   : > { %v8043_v10 = vpop.f32.mrf.mxu0  ;;  %8863 = vst [vmem:[%s11791_s18 + $0x60] sm:$0xff] %v8745_v27 }
 0x44f   : > { %v8540_v42 = vmax.f32 %v8476_v48, 0.0  ;;  %v8477_v15 = vadd.f32 %v11667_v40, %v8239_v38  ;;  %v8240_v29 = vadd.f32 %v8043_v10, %v7369_v7  ;;  %v8777_v11 = vpop.trf.xlu1 }
 0x450   : > { %v8045_v8 = vpop.f32.mrf.mxu0  ;;  %8895 = vst [vmem:[%s11791_s18 + $0x160] sm:$0xff] %v8777_v11 }
 0x451   : > { %v8573_v39 = vadd.f32 %v8572_v32, %v8540_v42  ;;  %v8541_v56 = vmax.f32 %v8477_v15, 0.0  ;;  %v8478_v51 = vadd.f32 %v11664_v61, %v8240_v29  ;;  %v8241_v21 = vadd.f32 %v8045_v8, %v7370_v35  ;;  %8801 = vxpose.xlu0.b32.cont [15/16] %v8540_v42, 128  ;;  %v8746_v59 = vpop.trf.xlu0 }
 0x452   : > { %v8047_v12 = vpop.f32.mrf.mxu0  ;;  %8865 = vst [vmem:[%s11791_s18 + $0x70] sm:$0xff] %v8746_v59 }
 0x453   : > { %v8610_v3 = vadd.f32 %v8609_v52, %v8541_v56  ;;  %v8542_v55 = vmax.f32 %v8478_v51, 0.0  ;;  %v8479_v28 = vadd.f32 %v11667_v40, %v8241_v21  ;;  %8833 = vxpose.xlu1.b32.cont [15/16] %v8541_v56, 128  ;;  %v8778_v23 = vpop.trf.xlu1 }
 0x454   : > { %v8049_v36 = vpop.f32.mrf.mxu0  ;;  %8897 = vst [vmem:[%s11791_s18 + $0x170] sm:$0xff] %v8778_v23 }
 0x455   : > { %v8574_v41 = vadd.f32 %v8573_v39, %v8542_v55  ;;  %v8543_v18 = vmax.f32 %v8479_v28, 0.0  ;;  %8802 = vxpose.xlu0.b32.end [16/16] %v8542_v55, 128  ;;  %v8747_v61 = vpop.trf.xlu0 }
 0x456   : > { %8867 = vst [vmem:[%s11791_s18 + $0x80] sm:$0xff] %v8747_v61 }
 0x457   : > { %v8575_v34 = vrot.slane %v8574_v41, 4  ;;  %v8611_v37 = vadd.f32 %v8610_v3, %v8543_v18  ;;  %8834 = vxpose.xlu1.b32.end [16/16] %v8543_v18, 128  ;;  %v8779_v19 = vpop.trf.xlu1 }
 0x458   : > { %8899 = vst [vmem:[%s11791_s18 + $0x180] sm:$0xff] %v8779_v19 }
 0x459   : > { %v8576_v16 = vadd.f32 %v8575_v34, %v8574_v41  ;;  %v8612_v40 = vrot.slane %v8611_v37, 4  ;;  %v8748_v4 = vpop.trf.xlu0 }
 0x45a   : > { %8869 = vst [vmem:[%s11791_s18 + $0x90] sm:$0xff] %v8748_v4 }
 0x45b   : > { %v8577_v45 = vrot.slane %v8576_v16, 2  ;;  %v8613_v58 = vadd.f32 %v8612_v40, %v8611_v37  ;;  %v8780_v5 = vpop.trf.xlu1 }
 0x45c   : > { %8901 = vst [vmem:[%s11791_s18 + $0x190] sm:$0xff] %v8780_v5 }
 0x45d   : > { %v8578_v0 = vadd.f32 %v8577_v45, %v8576_v16  ;;  %v8614_v13 = vrot.slane %v8613_v58, 2  ;;  %v8749_v22 = vpop.trf.xlu0 }
 0x45e   : > { %8871 = vst [vmem:[%s11791_s18 + $0xa0] sm:$0xff] %v8749_v22 }
 0x45f   : > { %v8579_v44 = vrot.slane %v8578_v0, 1  ;;  %v8615_v63 = vadd.f32 %v8614_v13, %v8613_v58  ;;  %v8781_v46 = vpop.trf.xlu1 }
 0x460   : > { %8903 = vst [vmem:[%s11791_s18 + $0x1a0] sm:$0xff] %v8781_v46 }
 0x461   : > { %v8616_v26 = vrot.slane %v8615_v63, 1  ;;  %v8750_v43 = vpop.trf.xlu0  ;;  %v8580_v49 = vadd.f32 %v8579_v44, %v8578_v0 }
 0x462   : > { %8873 = vst [vmem:[%s11791_s18 + $0xb0] sm:$0xff] %v8750_v43 }
 0x463   : > { %v8617_v53 = vadd.f32 %v8616_v26, %v8615_v63  ;;  %v8782_v9 = vpop.trf.xlu1  ;;  %v8618_v60 = vmul.f32 0.00390625, %v8580_v49 }
 0x464   : > { %8905 = vst [vmem:[%s11791_s18 + $0x1b0] sm:$0xff] %v8782_v9 }
 0x465   : > { %v8619_v50 = vmul.f32 0.00390625, %v8617_v53  ;;  %v8751_v6 = vpop.trf.xlu0 }
 0x466   : > { %8875 = vst [vmem:[%s11791_s18 + $0xc0] sm:$0xff] %v8751_v6 }
 0x467   : > { %8716 = vmatprep.mubr.f32.mxu1 %v8619_v50  ;;  %v8783_v62 = vpop.trf.xlu1 }
 0x468   : > { %8717 = vmatmul.mubr.f32.vlgmr.msra.gmra.mxu1 %v8618_v60  ;;  %8907 = vst [vmem:[%s11791_s18 + $0x1c0] sm:$0xff] %v8783_v62 }
 0x469   : > { %v8752_v17 = vpop.trf.xlu0 }
 0x46a   : > { %8877 = vst [vmem:[%s11791_s18 + $0xd0] sm:$0xff] %v8752_v17 }
 0x46b   : > { %v8784_v31 = vpop.trf.xlu1 }
 0x46c   : > { %8909 = vst [vmem:[%s11791_s18 + $0x1d0] sm:$0xff] %v8784_v31 }
 0x46d   : > { %v8753_v30 = vpop.trf.xlu0 }
 0x46e   : > { %8879 = vst [vmem:[%s11791_s18 + $0xe0] sm:$0xff] %v8753_v30 }
 0x46f   : > { %v8785_v14 = vpop.trf.xlu1 }
 0x470   : > { %8911 = vst [vmem:[%s11791_s18 + $0x1e0] sm:$0xff] %v8785_v14 }
 0x471   : > { %v8754_v32 = vpop.trf.xlu0 }
 0x472   : > { %8881 = vst [vmem:[%s11791_s18 + $0xf0] sm:$0xff] %v8754_v32 }
 0x473   : > { %v8786_v1 = vpop.trf.xlu1 }
 0x474   : > { %8913 = vst [vmem:[%s11791_s18 + $0x1f0] sm:$0xff] %v8786_v1 }
 0x495   : > { %v8803_v57 = vpop.trf.xlu0 }
 0x496   : > { %8852 = vst [vmem:[%s11791_s18 + $0x8] sm:$0xff] %v8803_v57 }
 0x497   : > { %v8835_v2 = vpop.trf.xlu1 }
 0x498   : > { %8884 = vst [vmem:[%s11791_s18 + $0x108] sm:$0xff] %v8835_v2 }
 0x499   : > { %v8804_v54 = vpop.trf.xlu0 }
 0x49a   : > { %8854 = vst [vmem:[%s11791_s18 + $0x18] sm:$0xff] %v8804_v54 }
 0x49b   : > { %v8836_v52 = vpop.trf.xlu1 }
 0x49c   : > { %8886 = vst [vmem:[%s11791_s18 + $0x118] sm:$0xff] %v8836_v52 }
 0x49d   : > { %v8805_v20 = vpop.trf.xlu0 }
 0x49e   : > { %8856 = vst [vmem:[%s11791_s18 + $0x28] sm:$0xff] %v8805_v20 }
 0x49f   : > { %v8837_v47 = vpop.trf.xlu1 }
 0x4a0   : > { %8888 = vst [vmem:[%s11791_s18 + $0x128] sm:$0xff] %v8837_v47 }
 0x4a1   : > { %v8806_v24 = vpop.trf.xlu0 }
 0x4a2   : > { %8858 = vst [vmem:[%s11791_s18 + $0x38] sm:$0xff] %v8806_v24 }
 0x4a3   : > { %v8838_v33 = vpop.trf.xlu1 }
 0x4a4   : > { %8890 = vst [vmem:[%s11791_s18 + $0x138] sm:$0xff] %v8838_v33 }
 0x4a5   : > { %v8807_v7 = vpop.trf.xlu0 }
 0x4a6   : > { %8860 = vst [vmem:[%s11791_s18 + $0x48] sm:$0xff] %v8807_v7 }
 0x4a7   : > { %v8839_v48 = vpop.trf.xlu1 }
 0x4a8   : > { %8892 = vst [vmem:[%s11791_s18 + $0x148] sm:$0xff] %v8839_v48 }
 0x4a9   : > { %v8808_v38 = vpop.trf.xlu0 }
 0x4aa   : > { %8862 = vst [vmem:[%s11791_s18 + $0x58] sm:$0xff] %v8808_v38 }
 0x4ab   : > { %v8840_v27 = vpop.trf.xlu1 }
 0x4ac   : > { %8894 = vst [vmem:[%s11791_s18 + $0x158] sm:$0xff] %v8840_v27 }
 0x4ad   : > { %v8809_v10 = vpop.trf.xlu0 }
 0x4ae   : > { %8864 = vst [vmem:[%s11791_s18 + $0x68] sm:$0xff] %v8809_v10 }
 0x4af   : > { %v8841_v25 = vpop.trf.xlu1 }
 0x4b0   : > { %8896 = vst [vmem:[%s11791_s18 + $0x168] sm:$0xff] %v8841_v25 }
 0x4b1   : > { %v8810_v35 = vpop.trf.xlu0 }
 0x4b2   : > { %8866 = vst [vmem:[%s11791_s18 + $0x78] sm:$0xff] %v8810_v35 }
 0x4b3   : > { %v8842_v42 = vpop.trf.xlu1 }
 0x4b4   : > { %8898 = vst [vmem:[%s11791_s18 + $0x178] sm:$0xff] %v8842_v42 }
 0x4b5   : > { %v8811_v15 = vpop.trf.xlu0 }
 0x4b6   : > { %8868 = vst [vmem:[%s11791_s18 + $0x88] sm:$0xff] %v8811_v15 }
 0x4b7   : > { %v8843_v29 = vpop.trf.xlu1 }
 0x4b8   : > { %8900 = vst [vmem:[%s11791_s18 + $0x188] sm:$0xff] %v8843_v29 }
 0x4b9   : > { %v8812_v11 = vpop.trf.xlu0 }
 0x4ba   : > { %8870 = vst [vmem:[%s11791_s18 + $0x98] sm:$0xff] %v8812_v11 }
 0x4bb   : > { %v8844_v8 = vpop.trf.xlu1 }
 0x4bc   : > { %8902 = vst [vmem:[%s11791_s18 + $0x198] sm:$0xff] %v8844_v8 }
 0x4bd   : > { %v8813_v39 = vpop.trf.xlu0 }
 0x4be   : > { %8872 = vst [vmem:[%s11791_s18 + $0xa8] sm:$0xff] %v8813_v39 }
 0x4bf   : > { %v8845_v56 = vpop.trf.xlu1 }
 0x4c0   : > { %8904 = vst [vmem:[%s11791_s18 + $0x1a8] sm:$0xff] %v8845_v56 }
 0x4c1   : > { %v8814_v51 = vpop.trf.xlu0 }
 0x4c2   : > { %8874 = vst [vmem:[%s11791_s18 + $0xb8] sm:$0xff] %v8814_v51 }
 0x4c3   : > { %v8846_v21 = vpop.trf.xlu1 }
 0x4c4   : > { %8906 = vst [vmem:[%s11791_s18 + $0x1b8] sm:$0xff] %v8846_v21 }
 0x4c5   : > { %v8815_v59 = vpop.trf.xlu0 }
 0x4c6   : > { %8876 = vst [vmem:[%s11791_s18 + $0xc8] sm:$0xff] %v8815_v59 }
 0x4c7   : > { %v8847_v12 = vpop.trf.xlu1 }
 0x4c8   : > { %8908 = vst [vmem:[%s11791_s18 + $0x1c8] sm:$0xff] %v8847_v12 }
 0x4c9   : > { %v8816_v3 = vpop.trf.xlu0 }
 0x4ca   : > { %8878 = vst [vmem:[%s11791_s18 + $0xd8] sm:$0xff] %v8816_v3 }
 0x4cb   : > { %v8848_v55 = vpop.trf.xlu1 }
 0x4cc   : > { %8910 = vst [vmem:[%s11791_s18 + $0x1d8] sm:$0xff] %v8848_v55 }
 0x4cd   : > { %v8817_v28 = vpop.trf.xlu0 }
 0x4ce   : > { %8880 = vst [vmem:[%s11791_s18 + $0xe8] sm:$0xff] %v8817_v28 }
 0x4cf   : > { %v8849_v23 = vpop.trf.xlu1 }
 0x4d0   : > { %8912 = vst [vmem:[%s11791_s18 + $0x1e8] sm:$0xff] %v8849_v23 }
 0x4d1   : > { %v8818_v36 = vpop.trf.xlu0 }
 0x4d2   : > { %8882 = vst [vmem:[%s11791_s18 + $0xf8] sm:$0xff] %v8818_v36 }
 0x4d3   : > { %v8850_v41 = vpop.trf.xlu1 }
 0x4d4   : > { %8914 = vst [vmem:[%s11791_s18 + $0x1f8] sm:$0xff] %v8850_v41 }
 0x528   : > { %v9600_v18 = vpop.f32.mrf.mxu1 }
 0x52a   : > { %v9601_v61 = vpop.f32.mrf.mxu1 }
 0x52b   : > { %v9602_v34 = vadd.f32 %v9601_v61, %v9600_v18 }
 0x52d   : > { %8722 = vst [vmem:[%s406_s7] sm:$0x1] %v9602_v34 }
 0x52e PF: > { %s16_s24 = sadd.s32 1, %s9941_s24   ;;  %s12116_s18 = smov %s9921_s19 }
 0x52f   : > { %p13_p0 = scmp.ge.s32.totalorder %s16_s24, 6   ;;  %s12117_s19 = smov %s10023_s29 }
 0x530   : > { %s12118_s20 = smov %s9933_s22  ;;  %s12119_s21 = smov %s9937_s23 }
 0x531   : > { %s12120_s22 = smov %s12123_s25  ;;  %s12121_s23 = smov %s12127_s26 }
 0x532   :  { %15 = sbr.rel (!%p13_p0) target bundleno = 4 (0x4), region = 141 }

</bundles_post_ra>
